<compile_context>
chip_gen: v7x
topology: tpu7x:2x2x1
jax: 0.10.0
libtpu: 0.0.40
codegen_flags: <defaults>
</compile_context>

<pallas_src>
import functools
import math

import jax
import jax.numpy as jnp
from jax import lax
from jax.experimental import pallas as pl
from jax.experimental.pallas import tpu as pltpu


def mhsa_kernel(x_ref, wq_ref, wk_ref, wv_ref, bq_ref, bk_ref, bv_ref,
                out_ref, *, n_heads):
    x = x_ref[0]                                                  # (S, D) f32

    # Fused QKV projection: three (S, D) @ (D, D) MXU matmuls, f32 accumulation.
    q = jnp.dot(x, wq_ref[...], preferred_element_type=jnp.float32) + bq_ref[...]
    k = jnp.dot(x, wk_ref[...], preferred_element_type=jnp.float32) + bk_ref[...]
    v = jnp.dot(x, wv_ref[...], preferred_element_type=jnp.float32) + bv_ref[...]

    d = x.shape[-1]
    w = d // n_heads
    scale = 1.0 / math.sqrt(w)

    head_outs = []
    for h in range(n_heads):                                      # static unroll over heads
        sl = slice(h * w, (h + 1) * w)
        qh, kh, vh = q[:, sl], k[:, sl], v[:, sl]                 # (S, W) each
        # scores = q @ k^T / sqrt(W)  -> (S, S); contract on the W axis of both.
        s = lax.dot_general(qh, kh, (((1,), (1,)), ((), ())),
                            preferred_element_type=jnp.float32) * scale
        # Numerically-stable softmax over keys.
        m = jnp.max(s, axis=-1, keepdims=True)
        p = jnp.exp(s - m)
        attn = p / jnp.sum(p, axis=-1, keepdims=True)
        # TODO(synk): training-mode attention dropout omitted (eval/inference = identity).
        head_outs.append(jnp.dot(attn, vh, preferred_element_type=jnp.float32))

    # Merge heads back to (S, D) and issue one lane-dense store.
    out_ref[0] = jnp.concatenate(head_outs, axis=-1).astype(out_ref.dtype)


def multi_headed_self_attention(x, params, *, n_heads):
    """x: (B, S, D) f32.  Weights stored as (D_in, D_out) so y = x @ W + b
    (i.e. the transpose of PyTorch nn.Linear.weight)."""
    B, S, D = x.shape
    assert D % n_heads == 0, "hidden_dim must be divisible by n_heads"

    grid_spec = pltpu.PrefetchScalarGridSpec(
        num_scalar_prefetch=0,
        grid=(B,),
        in_specs=[
            pl.BlockSpec((1, S, D), lambda b: (b, 0, 0)),   # x slab for this batch element
            pl.BlockSpec((D, D), lambda b: (0, 0)),         # Wq (VMEM-resident)
            pl.BlockSpec((D, D), lambda b: (0, 0)),         # Wk (VMEM-resident)
            pl.BlockSpec((D, D), lambda b: (0, 0)),         # Wv (VMEM-resident)
            pl.BlockSpec((1, D), lambda b: (0, 0)),         # bq
            pl.BlockSpec((1, D), lambda b: (0, 0)),         # bk
            pl.BlockSpec((1, D), lambda b: (0, 0)),         # bv
        ],
        out_specs=pl.BlockSpec((1, S, D), lambda b: (b, 0, 0)),
    )

    return pl.pallas_call(
        functools.partial(mhsa_kernel, n_heads=n_heads),
        out_shape=jax.ShapeDtypeStruct((B, S, D), jnp.float32),
        grid_spec=grid_spec,
        compiler_params=pltpu.CompilerParams(
            dimension_semantics=("parallel",)),      # independent batch rows -> v7x dual-TC
    )(x, params["wq"], params["wk"], params["wv"],
      params["bq"], params["bk"], params["bv"])


def init_params(key, hidden_dim):
    ks = jax.random.split(key, 6)
    scale = 1.0 / math.sqrt(hidden_dim)

    def w(k):
        return jax.random.normal(k, (hidden_dim, hidden_dim), jnp.float32) * scale

    def b(k):
        return jax.random.normal(k, (1, hidden_dim), jnp.float32) * 0.02

    return {"wq": w(ks[0]), "wk": w(ks[1]), "wv": w(ks[2]),
            "bq": b(ks[3]), "bk": b(ks[4]), "bv": b(ks[5])}


def reference_forward(x, params, *, n_heads):
    """Pure-JAX reference matching the PyTorch module (eval mode)."""
    B, S, D = x.shape
    w = D // n_heads
    q = x @ params["wq"] + params["bq"]
    k = x @ params["wk"] + params["bk"]
    v = x @ params["wv"] + params["bv"]

    def split(t):                                   # (B, S, D) -> (B, H, S, W)
        return t.reshape(B, S, n_heads, w).transpose(0, 2, 1, 3)

    qh, kh, vh = split(q), split(k), split(v)
    s = jnp.einsum("bhqw,bhkw->bhqk", qh, kh) / math.sqrt(w)
    p = jax.nn.softmax(s, axis=-1)
    o = jnp.einsum("bhqk,bhkw->bhqw", p, vh)
    return o.transpose(0, 2, 1, 3).reshape(B, S, D)


if __name__ == "__main__":
    HIDDEN, N_HEADS = 128, 4          # W = 32 per head
    B, S = 2, 128

    key = jax.random.PRNGKey(0)
    kp, kx = jax.random.split(key)
    params = init_params(kp, HIDDEN)
    x = jax.random.normal(kx, (B, S, HIDDEN), jnp.float32)

    out = multi_headed_self_attention(x, params, n_heads=N_HEADS)
    out = jax.block_until_ready(out)

    ref = reference_forward(x, params, n_heads=N_HEADS)
    assert out.shape == (B, S, HIDDEN)
    assert jnp.allclose(out, ref, atol=1e-4, rtol=1e-4), "mismatch vs reference"

    print("KERNEL_OK")
</pallas_src>

<mosaic_0001>
module attributes {stable_mosaic.version = 11 : i64} {
  func.func @mhsa_kernel(%arg0: i32, %arg1: memref<1x128x128xf32, #tpu.memory_space<vmem>>, %arg2: memref<128x128xf32, #tpu.memory_space<vmem>>, %arg3: memref<128x128xf32, #tpu.memory_space<vmem>>, %arg4: memref<128x128xf32, #tpu.memory_space<vmem>>, %arg5: memref<1x128xf32, #tpu.memory_space<vmem>>, %arg6: memref<1x128xf32, #tpu.memory_space<vmem>>, %arg7: memref<1x128xf32, #tpu.memory_space<vmem>>, %arg8: memref<1x128x128xf32, #tpu.memory_space<vmem>>) attributes {dimension_semantics = [#tpu.dimension_semantics<parallel>], iteration_bounds = array<i64: 2>, scalar_prefetch = 0 : i64, scratch_operands = 0 : i64, tpu.core_type = #tpu.core_type<tc>, window_params = [{transform_indices = @transform_0, window_bounds = array<i64: 1, 128, 128>}, {pipeline_mode = #tpu.pipeline_mode<synchronous>, transform_indices = @transform_1, window_bounds = array<i64: 128, 128>}, {pipeline_mode = #tpu.pipeline_mode<synchronous>, transform_indices = @transform_2, window_bounds = array<i64: 128, 128>}, {pipeline_mode = #tpu.pipeline_mode<synchronous>, transform_indices = @transform_3, window_bounds = array<i64: 128, 128>}, {pipeline_mode = #tpu.pipeline_mode<synchronous>, transform_indices = @transform_4, window_bounds = array<i64: 1, 128>}, {pipeline_mode = #tpu.pipeline_mode<synchronous>, transform_indices = @transform_5, window_bounds = array<i64: 1, 128>}, {pipeline_mode = #tpu.pipeline_mode<synchronous>, transform_indices = @transform_6, window_bounds = array<i64: 1, 128>}, {transform_indices = @transform_7, window_bounds = array<i64: 1, 128, 128>}]} {
    %c0 = arith.constant 0 : index
    %c0_0 = arith.constant 0 : index
    %c0_1 = arith.constant 0 : index
    %0 = vector.load %arg1[%c0, %c0_0, %c0_1] : memref<1x128x128xf32, #tpu.memory_space<vmem>>, vector<1x128x128xf32>
    %1 = vector.shape_cast %0 : vector<1x128x128xf32> to vector<128x128xf32>
    %c0_2 = arith.constant 0 : index
    %c0_3 = arith.constant 0 : index
    %2 = vector.load %arg2[%c0_2, %c0_3] : memref<128x128xf32, #tpu.memory_space<vmem>>, vector<128x128xf32>
    %cst = arith.constant dense<0.000000e+00> : vector<128x128xf32>
    %3 = tpu.matmul %1, %2, %cst {dimension_numbers = #tpu.dot_dimension_numbers<[1], [0], [0], [1], [0, 0, 1, 1], [], []>} : vector<128x128xf32>, vector<128x128xf32>, vector<128x128xf32> -> vector<128x128xf32>
    %c0_4 = arith.constant 0 : index
    %c0_5 = arith.constant 0 : index
    %4 = vector.load %arg5[%c0_4, %c0_5] : memref<1x128xf32, #tpu.memory_space<vmem>>, vector<1x128xf32>
    %5 = vector.broadcast %4 : vector<1x128xf32> to vector<128x128xf32>
    %6 = arith.addf %3, %5 : vector<128x128xf32>
    %c0_6 = arith.constant 0 : index
    %c0_7 = arith.constant 0 : index
    %7 = vector.load %arg3[%c0_6, %c0_7] : memref<128x128xf32, #tpu.memory_space<vmem>>, vector<128x128xf32>
    %cst_8 = arith.constant dense<0.000000e+00> : vector<128x128xf32>
    %8 = tpu.matmul %1, %7, %cst_8 {dimension_numbers = #tpu.dot_dimension_numbers<[1], [0], [0], [1], [0, 0, 1, 1], [], []>} : vector<128x128xf32>, vector<128x128xf32>, vector<128x128xf32> -> vector<128x128xf32>
    %c0_9 = arith.constant 0 : index
    %c0_10 = arith.constant 0 : index
    %9 = vector.load %arg6[%c0_9, %c0_10] : memref<1x128xf32, #tpu.memory_space<vmem>>, vector<1x128xf32>
    %10 = vector.broadcast %9 : vector<1x128xf32> to vector<128x128xf32>
    %11 = arith.addf %8, %10 : vector<128x128xf32>
    %c0_11 = arith.constant 0 : index
    %c0_12 = arith.constant 0 : index
    %12 = vector.load %arg4[%c0_11, %c0_12] : memref<128x128xf32, #tpu.memory_space<vmem>>, vector<128x128xf32>
    %cst_13 = arith.constant dense<0.000000e+00> : vector<128x128xf32>
    %13 = tpu.matmul %1, %12, %cst_13 {dimension_numbers = #tpu.dot_dimension_numbers<[1], [0], [0], [1], [0, 0, 1, 1], [], []>} : vector<128x128xf32>, vector<128x128xf32>, vector<128x128xf32> -> vector<128x128xf32>
    %c0_14 = arith.constant 0 : index
    %c0_15 = arith.constant 0 : index
    %14 = vector.load %arg7[%c0_14, %c0_15] : memref<1x128xf32, #tpu.memory_space<vmem>>, vector<1x128xf32>
    %15 = vector.broadcast %14 : vector<1x128xf32> to vector<128x128xf32>
    %16 = arith.addf %13, %15 : vector<128x128xf32>
    %17 = vector.extract_strided_slice %6 {offsets = [0, 0], sizes = [128, 32], strides = [1, 1]} : vector<128x128xf32> to vector<128x32xf32>
    %18 = vector.extract_strided_slice %11 {offsets = [0, 0], sizes = [128, 32], strides = [1, 1]} : vector<128x128xf32> to vector<128x32xf32>
    %19 = vector.extract_strided_slice %16 {offsets = [0, 0], sizes = [128, 32], strides = [1, 1]} : vector<128x128xf32> to vector<128x32xf32>
    %cst_16 = arith.constant dense<0.000000e+00> : vector<128x128xf32>
    %20 = tpu.matmul %17, %18, %cst_16 {dimension_numbers = #tpu.dot_dimension_numbers<[1], [1], [0], [0], [0, 0, 1, 0], [], []>} : vector<128x32xf32>, vector<128x32xf32>, vector<128x128xf32> -> vector<128x128xf32>
    %cst_17 = arith.constant 0.176776692 : f32
    %21 = vector.broadcast %cst_17 : f32 to vector<128x128xf32>
    %22 = arith.mulf %20, %21 : vector<128x128xf32>
    %cst_18 = arith.constant dense<0xFF800000> : vector<128xf32>
    %23 = vector.multi_reduction <maximumf>, %22, %cst_18 [1] : vector<128x128xf32> to vector<128xf32>
    %24 = vector.shape_cast %23 : vector<128xf32> to vector<128x1xf32>
    %25 = vector.broadcast %24 : vector<128x1xf32> to vector<128x128xf32>
    %26 = arith.subf %22, %25 : vector<128x128xf32>
    %27 = math.exp %26 : vector<128x128xf32>
    %cst_19 = arith.constant dense<0.000000e+00> : vector<128xf32>
    %28 = vector.multi_reduction <add>, %27, %cst_19 [1] : vector<128x128xf32> to vector<128xf32>
    %29 = vector.shape_cast %28 : vector<128xf32> to vector<128x1xf32>
    %30 = vector.broadcast %29 : vector<128x1xf32> to vector<128x128xf32>
    %31 = arith.divf %27, %30 : vector<128x128xf32>
    %cst_20 = arith.constant dense<0.000000e+00> : vector<128x32xf32>
    %32 = tpu.matmul %31, %19, %cst_20 {dimension_numbers = #tpu.dot_dimension_numbers<[1], [0], [0], [1], [0, 0, 1, 1], [], []>} : vector<128x128xf32>, vector<128x32xf32>, vector<128x32xf32> -> vector<128x32xf32>
    %33 = vector.extract_strided_slice %6 {offsets = [0, 32], sizes = [128, 32], strides = [1, 1]} : vector<128x128xf32> to vector<128x32xf32>
    %34 = vector.extract_strided_slice %11 {offsets = [0, 32], sizes = [128, 32], strides = [1, 1]} : vector<128x128xf32> to vector<128x32xf32>
    %35 = vector.extract_strided_slice %16 {offsets = [0, 32], sizes = [128, 32], strides = [1, 1]} : vector<128x128xf32> to vector<128x32xf32>
    %cst_21 = arith.constant dense<0.000000e+00> : vector<128x128xf32>
    %36 = tpu.matmul %33, %34, %cst_21 {dimension_numbers = #tpu.dot_dimension_numbers<[1], [1], [0], [0], [0, 0, 1, 0], [], []>} : vector<128x32xf32>, vector<128x32xf32>, vector<128x128xf32> -> vector<128x128xf32>
    %cst_22 = arith.constant 0.176776692 : f32
    %37 = vector.broadcast %cst_22 : f32 to vector<128x128xf32>
    %38 = arith.mulf %36, %37 : vector<128x128xf32>
    %cst_23 = arith.constant dense<0xFF800000> : vector<128xf32>
    %39 = vector.multi_reduction <maximumf>, %38, %cst_23 [1] : vector<128x128xf32> to vector<128xf32>
    %40 = vector.shape_cast %39 : vector<128xf32> to vector<128x1xf32>
    %41 = vector.broadcast %40 : vector<128x1xf32> to vector<128x128xf32>
    %42 = arith.subf %38, %41 : vector<128x128xf32>
    %43 = math.exp %42 : vector<128x128xf32>
    %cst_24 = arith.constant dense<0.000000e+00> : vector<128xf32>
    %44 = vector.multi_reduction <add>, %43, %cst_24 [1] : vector<128x128xf32> to vector<128xf32>
    %45 = vector.shape_cast %44 : vector<128xf32> to vector<128x1xf32>
    %46 = vector.broadcast %45 : vector<128x1xf32> to vector<128x128xf32>
    %47 = arith.divf %43, %46 : vector<128x128xf32>
    %cst_25 = arith.constant dense<0.000000e+00> : vector<128x32xf32>
    %48 = tpu.matmul %47, %35, %cst_25 {dimension_numbers = #tpu.dot_dimension_numbers<[1], [0], [0], [1], [0, 0, 1, 1], [], []>} : vector<128x128xf32>, vector<128x32xf32>, vector<128x32xf32> -> vector<128x32xf32>
    %49 = vector.extract_strided_slice %6 {offsets = [0, 64], sizes = [128, 32], strides = [1, 1]} : vector<128x128xf32> to vector<128x32xf32>
    %50 = vector.extract_strided_slice %11 {offsets = [0, 64], sizes = [128, 32], strides = [1, 1]} : vector<128x128xf32> to vector<128x32xf32>
    %51 = vector.extract_strided_slice %16 {offsets = [0, 64], sizes = [128, 32], strides = [1, 1]} : vector<128x128xf32> to vector<128x32xf32>
    %cst_26 = arith.constant dense<0.000000e+00> : vector<128x128xf32>
    %52 = tpu.matmul %49, %50, %cst_26 {dimension_numbers = #tpu.dot_dimension_numbers<[1], [1], [0], [0], [0, 0, 1, 0], [], []>} : vector<128x32xf32>, vector<128x32xf32>, vector<128x128xf32> -> vector<128x128xf32>
    %cst_27 = arith.constant 0.176776692 : f32
    %53 = vector.broadcast %cst_27 : f32 to vector<128x128xf32>
    %54 = arith.mulf %52, %53 : vector<128x128xf32>
    %cst_28 = arith.constant dense<0xFF800000> : vector<128xf32>
    %55 = vector.multi_reduction <maximumf>, %54, %cst_28 [1] : vector<128x128xf32> to vector<128xf32>
    %56 = vector.shape_cast %55 : vector<128xf32> to vector<128x1xf32>
    %57 = vector.broadcast %56 : vector<128x1xf32> to vector<128x128xf32>
    %58 = arith.subf %54, %57 : vector<128x128xf32>
    %59 = math.exp %58 : vector<128x128xf32>
    %cst_29 = arith.constant dense<0.000000e+00> : vector<128xf32>
    %60 = vector.multi_reduction <add>, %59, %cst_29 [1] : vector<128x128xf32> to vector<128xf32>
    %61 = vector.shape_cast %60 : vector<128xf32> to vector<128x1xf32>
    %62 = vector.broadcast %61 : vector<128x1xf32> to vector<128x128xf32>
    %63 = arith.divf %59, %62 : vector<128x128xf32>
    %cst_30 = arith.constant dense<0.000000e+00> : vector<128x32xf32>
    %64 = tpu.matmul %63, %51, %cst_30 {dimension_numbers = #tpu.dot_dimension_numbers<[1], [0], [0], [1], [0, 0, 1, 1], [], []>} : vector<128x128xf32>, vector<128x32xf32>, vector<128x32xf32> -> vector<128x32xf32>
    %65 = vector.extract_strided_slice %6 {offsets = [0, 96], sizes = [128, 32], strides = [1, 1]} : vector<128x128xf32> to vector<128x32xf32>
    %66 = vector.extract_strided_slice %11 {offsets = [0, 96], sizes = [128, 32], strides = [1, 1]} : vector<128x128xf32> to vector<128x32xf32>
    %67 = vector.extract_strided_slice %16 {offsets = [0, 96], sizes = [128, 32], strides = [1, 1]} : vector<128x128xf32> to vector<128x32xf32>
    %cst_31 = arith.constant dense<0.000000e+00> : vector<128x128xf32>
    %68 = tpu.matmul %65, %66, %cst_31 {dimension_numbers = #tpu.dot_dimension_numbers<[1], [1], [0], [0], [0, 0, 1, 0], [], []>} : vector<128x32xf32>, vector<128x32xf32>, vector<128x128xf32> -> vector<128x128xf32>
    %cst_32 = arith.constant 0.176776692 : f32
    %69 = vector.broadcast %cst_32 : f32 to vector<128x128xf32>
    %70 = arith.mulf %68, %69 : vector<128x128xf32>
    %cst_33 = arith.constant dense<0xFF800000> : vector<128xf32>
    %71 = vector.multi_reduction <maximumf>, %70, %cst_33 [1] : vector<128x128xf32> to vector<128xf32>
    %72 = vector.shape_cast %71 : vector<128xf32> to vector<128x1xf32>
    %73 = vector.broadcast %72 : vector<128x1xf32> to vector<128x128xf32>
    %74 = arith.subf %70, %73 : vector<128x128xf32>
    %75 = math.exp %74 : vector<128x128xf32>
    %cst_34 = arith.constant dense<0.000000e+00> : vector<128xf32>
    %76 = vector.multi_reduction <add>, %75, %cst_34 [1] : vector<128x128xf32> to vector<128xf32>
    %77 = vector.shape_cast %76 : vector<128xf32> to vector<128x1xf32>
    %78 = vector.broadcast %77 : vector<128x1xf32> to vector<128x128xf32>
    %79 = arith.divf %75, %78 : vector<128x128xf32>
    %cst_35 = arith.constant dense<0.000000e+00> : vector<128x32xf32>
    %80 = tpu.matmul %79, %67, %cst_35 {dimension_numbers = #tpu.dot_dimension_numbers<[1], [0], [0], [1], [0, 0, 1, 1], [], []>} : vector<128x128xf32>, vector<128x32xf32>, vector<128x32xf32> -> vector<128x32xf32>
    %81 = tpu.concatenate %32, %48, %64, %80 in 1 : vector<128x32xf32>, vector<128x32xf32>, vector<128x32xf32>, vector<128x32xf32> -> vector<128x128xf32>
    %c0_36 = arith.constant 0 : index
    %c0_37 = arith.constant 0 : index
    %c0_38 = arith.constant 0 : index
    %82 = vector.load %arg8[%c0_36, %c0_37, %c0_38] : memref<1x128x128xf32, #tpu.memory_space<vmem>>, vector<1x128x128xf32>
    %83 = vector.shape_cast %82 : vector<1x128x128xf32> to vector<128x128xf32>
    %84 = vector.shape_cast %81 : vector<128x128xf32> to vector<1x128x128xf32>
    tpu.vector_store %arg8[%c0_36, %c0_37, %c0_38], %84 {strides = array<i32>} : memref<1x128x128xf32, #tpu.memory_space<vmem>>, vector<1x128x128xf32>,
    return
  }
  func.func @transform_0(%arg0: i32) -> (i32, i32, i32) {
    %c0_i32 = arith.constant 0 : i32
    %c0_i32_0 = arith.constant 0 : i32
    %c0_i32_1 = arith.constant 0 : i32
    return %arg0, %c0_i32, %c0_i32_0 : i32, i32, i32
  }
  func.func @transform_1(%arg0: i32) -> (i32, i32) {
    %c0_i32 = arith.constant 0 : i32
    %c0_i32_0 = arith.constant 0 : i32
    %c0_i32_1 = arith.constant 0 : i32
    return %c0_i32, %c0_i32_0 : i32, i32
  }
  func.func @transform_2(%arg0: i32) -> (i32, i32) {
    %c0_i32 = arith.constant 0 : i32
    %c0_i32_0 = arith.constant 0 : i32
    %c0_i32_1 = arith.constant 0 : i32
    return %c0_i32, %c0_i32_0 : i32, i32
  }
  func.func @transform_3(%arg0: i32) -> (i32, i32) {
    %c0_i32 = arith.constant 0 : i32
    %c0_i32_0 = arith.constant 0 : i32
    %c0_i32_1 = arith.constant 0 : i32
    return %c0_i32, %c0_i32_0 : i32, i32
  }
  func.func @transform_4(%arg0: i32) -> (i32, i32) {
    %c0_i32 = arith.constant 0 : i32
    %c0_i32_0 = arith.constant 0 : i32
    %c0_i32_1 = arith.constant 0 : i32
    return %c0_i32, %c0_i32_0 : i32, i32
  }
  func.func @transform_5(%arg0: i32) -> (i32, i32) {
    %c0_i32 = arith.constant 0 : i32
    %c0_i32_0 = arith.constant 0 : i32
    %c0_i32_1 = arith.constant 0 : i32
    return %c0_i32, %c0_i32_0 : i32, i32
  }
  func.func @transform_6(%arg0: i32) -> (i32, i32) {
    %c0_i32 = arith.constant 0 : i32
    %c0_i32_0 = arith.constant 0 : i32
    %c0_i32_1 = arith.constant 0 : i32
    return %c0_i32, %c0_i32_0 : i32, i32
  }
  func.func @transform_7(%arg0: i32) -> (i32, i32, i32) {
    %c0_i32 = arith.constant 0 : i32
    %c0_i32_0 = arith.constant 0 : i32
    %c0_i32_1 = arith.constant 0 : i32
    return %arg0, %c0_i32, %c0_i32_0 : i32, i32, i32
  }
}

</mosaic_0001>

<bundles_post_ra>
// kernel: tpu_custom_call.1
= control target key start
LH: loop header
LB: loop body
LE: loop exit
PB: predicated region body
PF: predicated region fallthrough
CT: control target
= control target key end

     0   :  { %12 = vsyncpa [#allocation3], 0  ;;  %s7752_s0 = inlined_call_operand.hbm [shape: f32[2,128,128], index: 0, kind: input, shape index: {}]   ;;  %s7753_s1 = inlined_call_operand.hbm [shape: f32[128,128], index: 1, kind: input, shape index: {}]   ;;  %s7754_s2 = inlined_call_operand.hbm [shape: f32[128,128], index: 2, kind: input, shape index: {}]   ;;  %s7755_s3 = inlined_call_operand.hbm [shape: f32[128,128], index: 3, kind: input, shape index: {}]   ;;  %s7756_s4 = inlined_call_operand.vmem [shape: f32[1,128], index: 4, kind: input, shape index: {}]   ;;  %s7757_s5 = inlined_call_operand.vmem [shape: f32[1,128], index: 5, kind: input, shape index: {}]   ;;  %s7758_s6 = inlined_call_operand.vmem [shape: f32[1,128], index: 6, kind: input, shape index: {}]   ;;  %s7759_s7 = inlined_call_operand.hbm [shape: f32[2,128,128], index: 7, kind: output, shape index: {}]  }
   0x1   :  { %14 = vsyncpa [#allocation3 + $0x1], 0 }
   0x2   :  { %15 = vsyncpa [#allocation6], 0 }
   0x3   :  { %16 = vsyncpa [#allocation9], 0 }
   0x4   :  { %17 = vsyncpa [#allocation4], 0 }
   0x5   :  { %19 = vsyncpa [#allocation4 + $0x1], 0  ;;  %s6035_s24 = smov 0   ;;  %s6037_s25 = smov 0  }
   0x6   :  { %s6039_s26 = smov 0   ;;  %s6041_s27 = smov 0  }
   0x7 LB: > { %s6056_s28 = sadd.s32 4294967295, %s5981_s27   ;;  %s3676_s29 = sadd.s32 4294967294, %s5981_s27   ;;  %s5981_s27 = sphi %s6041_s27, %s7919_s27   ;;  %s5977_s26 = sphi %s6039_s26, %s7918_s26   ;;  %s5973_s25 = sphi %s6037_s25, %s7917_s25   ;;  %s5969_s24 = sphi %s6035_s24, %s7916_s24  }
   0x8   : > { %p45_p0 = scmp.ne.s32.totalorder %s5973_s25, %s5969_s24  ;;  %p7760_p1 = scmp.eq.s32.totalorder %s6056_s28, 0 }
   0x9   : > { %p201_p3 = scmp.eq.s32.totalorder %s3676_s29, 1  ;;  %p3677_p5 = scmp.ge.s32.totalorder %s5981_s27, 1 }
   0xa   : > { %p6065_p4 = por %p7760_p1, %p45_p0  ;;  %p208_p7 = scmp.lt.s32.totalorder %s5981_s27, 3 }
   0xb   : > { %p6070_p6 = por %p201_p3, %p45_p0  ;;  %s5983_s10 = smov [#allocation5]  }
   0xc   : > { %s7792_s30 = scalar_select %p6065_p4, 1, 0 }
   0xd   : > { %s7793_s8 = scalar_select %p6070_p6, 1, 0 }
   0xe   : > { %p6075_p8 = pnand %p3677_p5, %p208_p7  ;;  %s220_s11 = sshll.u32 %s5983_s10, 4  ;;  %s6079_s11 = int_to_ptr.vmem [resolvable:$true] %s220_s11 }
   0xf   : > { %7794 = sst [smem:[#allocation15_spill]] %s7793_s8  ;;  %s5984_s13 = smov [#allocation7]  }
  0x10   : > { %s7795_s9 = scalar_select %p6075_p8, 1, 0 }
  0x11   : > { %p5229_p9 = pneg %p6075_p8  ;;  %s233_s14 = sshll.u32 %s5984_s13, 4  ;;  %s6090_s14 = int_to_ptr.vmem [resolvable:$true] %s233_s14 }
  0x12   : > { %s5985_s15 = smov [#allocation8]   ;;  %s5793_s19 = scalar_lea.hbm %s7753_s1, 2048 }
  0x13   : > { %p6086_p11 = pnand %p5229_p9, %p7760_p1  ;;  %s6092_s16 = sshll.u32 %s5985_s15, 4  ;;  %s247_s16 = int_to_ptr.vmem [resolvable:$true] %s6092_s16 }
  0x14   : > { %p5794_p12 = scmp.ne.s32.totalorder %s7753_s1, %s5793_s19  ;;  %p5800_p5 = scmp.lt.u32.totalorder %s5793_s19, %s7753_s1 }
  0x15   : > { %p6102_p13 = pneg %p6086_p11 }
  0x17   : > { %p5796_p0 = pnand %p6102_p13, %p5794_p12 }
  0x19   : > { %p5797_p3 = pneg %p5796_p0 }
  0x1b   : > { %p5802_p7 = pnand %p5800_p5, %p5797_p3 }
  0x1d   : > { %5805 = shalt.err (!%p5802_p7)
}
  0x1e   : > { %s5806_s10 = scalar_lea.vmem %s6079_s11, 2048  ;;  %p5814_p2 = scmp.lt.s32.totalorder %s6079_s11, %s6079_s11 }
  0x1f   : > { %p5807_p9 = scmp.ne.s32.totalorder %s6079_s11, %s5806_s10  ;;  %p5815_p6 = scmp.lt.s32.totalorder %s5806_s10, %s5806_s10 }
  0x21   : > { %p5809_p10 = pnand %p5807_p9, %p6102_p13  ;;  %p5816_p12 = por %p5815_p6, %p5814_p2 }
  0x23   : > { %p5810_p1 = pneg %p5809_p10 }
  0x25   : > { %p5817_p0 = pnand %p5816_p12, %p5810_p1 }
  0x27   : > { %5820 = shalt.err (!%p5817_p0)
}
  0x28   : > { %s5986_s13 = smov 128   ;;  %s5987_s15 = smov 8  }
  0x29   : > { %5232 = dma.hbm_to_vmem [thread:$0]  (!%p6086_p11), %s7753_s1, 2048, %s6079_s11, [#allocation6], %s5986_s13, %s5986_s13, %s5987_s15  }
  0x2a   : > { %s5821_s21 = scalar_lea.hbm %s7754_s2, 2048 }
  0x2b   : > { %p5822_p1 = scmp.ne.s32.totalorder %s7754_s2, %s5821_s21  ;;  %p5828_p10 = scmp.lt.u32.totalorder %s5821_s21, %s7754_s2 }
  0x2d   : > { %p5824_p2 = pnand %p5822_p1, %p6102_p13 }
  0x2f   : > { %p5825_p6 = pneg %p5824_p2 }
  0x31   : > { %p5830_p3 = pnand %p5828_p10, %p5825_p6 }
  0x33   : > { %5833 = shalt.err (!%p5830_p3)
}
  0x34   : > { %s5834_s11 = scalar_lea.vmem %s6090_s14, 2048  ;;  %p5842_p12 = scmp.lt.s32.totalorder %s6090_s14, %s6090_s14 }
  0x35   : > { %p5835_p5 = scmp.ne.s32.totalorder %s6090_s14, %s5834_s11  ;;  %p5843_p0 = scmp.lt.s32.totalorder %s5834_s11, %s5834_s11 }
  0x37   : > { %p5837_p7 = pnand %p5835_p5, %p6102_p13  ;;  %p5844_p1 = por %p5843_p0, %p5842_p12 }
  0x39   : > { %p5838_p9 = pneg %p5837_p7 }
  0x3b   : > { %p5845_p2 = pnand %p5844_p1, %p5838_p9 }
  0x3d   : > { %5848 = shalt.err (!%p5845_p2)
}
  0x3e   : > { %5235 = dma.hbm_to_vmem [thread:$0]  (!%p6086_p11), %s7754_s2, 2048, %s6090_s14, [#allocation6], %s5986_s13, %s5986_s13, %s5987_s15  }
  0x3f   : > { %s5849_s20 = scalar_lea.hbm %s7755_s3, 2048 }
  0x40   : > { %p5850_p6 = scmp.ne.s32.totalorder %s7755_s3, %s5849_s20  ;;  %p5856_p5 = scmp.lt.u32.totalorder %s5849_s20, %s7755_s3 }
  0x42   : > { %p5852_p10 = pnand %p5850_p6, %p6102_p13 }
  0x44   : > { %p5853_p3 = pneg %p5852_p10 }
  0x46   : > { %p5858_p7 = pnand %p5856_p5, %p5853_p3 }
  0x48   : > { %5861 = shalt.err (!%p5858_p7)
}
  0x49   : > { %s5862_s11 = scalar_lea.vmem %s247_s16, 2048  ;;  %p5870_p1 = scmp.lt.s32.totalorder %s247_s16, %s247_s16 }
  0x4a   : > { %p5863_p9 = scmp.ne.s32.totalorder %s247_s16, %s5862_s11  ;;  %p5871_p2 = scmp.lt.s32.totalorder %s5862_s11, %s5862_s11 }
  0x4c   : > { %p5865_p12 = pnand %p5863_p9, %p6102_p13  ;;  %p5872_p4 = por %p5871_p2, %p5870_p1 }
  0x4e   : > { %p5866_p0 = pneg %p5865_p12 }
  0x50   : > { %p5873_p8 = pnand %p5872_p4, %p5866_p0 }
  0x52   : > { %5876 = shalt.err (!%p5873_p8)
}
  0x53   : > { %5238 = dma.hbm_to_vmem [thread:$0]  (!%p6086_p11), %s7755_s3, 2048, %s247_s16, [#allocation9], %s5986_s13, %s5986_s13, %s5987_s15  }
  0x54   : > { %s6175_s22 = sadd.s32 1, %s5981_s27   ;;  %s32_s17 = sadd.s32 1, %s5977_s26 }
  0x55   : > { %s29_s12 = ssub.s32 %s5981_s27, %s6175_s22  ;;  %p39_p8 = scmp.ne.s32.totalorder %s5977_s26, %s5973_s25 }
  0x56   : > { %p30_p4 = scmp.eq.s32.totalorder %s29_s12, 0  ;;  %p40_p13 = scmp.eq.s32.totalorder %s5981_s27, 0 }
  0x57   : > { %p5250_p6 = scmp.lt.s32.totalorder %s5981_s27, 2  ;;  %p7798_p3 = scmp.eq.s32.totalorder %s6056_s28, 1 }
  0x58   : > { %s6185_s18 = scalar_select %p30_p4, %s5977_s26, %s32_s17  }
  0x59   : > { %p41_p10 = por %p40_p13, %p39_p8  ;;  %p6189_p5 = por %p7798_p3, %p39_p8 }
  0x5a   : > { %s269_s20 = sand.u32 1, %s5977_s26   ;;  %s3827_s21 = sshll.u32 %s5981_s27, 11 }
  0x5b   : > { %s3682_s16 = sshll.u32 %s269_s20, 7  ;;  %s6198_s10 = scalar_lea.hbm %s7752_s0, %s3827_s21 }
  0x5c   : > { %s273_s11 = scalar_lea.vmem [#allocation2], %s3682_s16  ;;  %p6200_p11 = pnand %p5250_p6, %p41_p10 }
  0x5d   : > { %s280_s14 = sshll.u32 %s273_s11, 4  ;;  %s6206_s12 = scalar_lea.sflag [#allocation3], %s269_s20  ;;  %s6204_s14 = int_to_ptr.vmem [resolvable:$true] %s280_s14 }
  0x5e   : > { %s5877_s17 = scalar_lea.hbm %s6198_s10, 2048  ;;  %p5879_p9 = pneg %p6200_p11 }
  0x5f   : > { %p5878_p7 = scmp.ne.s32.totalorder %s6198_s10, %s5877_s17  ;;  %s5882_s23 = scalar_lea.hbm %s7752_s0, 4096 }
  0x60   : > { %p5883_p1 = scmp.lt.u32.totalorder %s6198_s10, %s7752_s0  ;;  %p5884_p2 = scmp.lt.u32.totalorder %s5882_s23, %s5877_s17 }
  0x61   : > { %p5880_p12 = pnand %p5879_p9, %p5878_p7  ;;  %p5886_p8 = scmp.lt.u32.totalorder %s5877_s17, %s6198_s10 }
  0x62   : > { %p5885_p4 = por %p5884_p2, %p5883_p1 }
  0x63   : > { %p5881_p0 = pneg %p5880_p12 }
  0x64   : > { %p5887_p13 = por %p5886_p8, %p5885_p4 }
  0x66   : > { %p5888_p6 = pnand %p5887_p13, %p5881_p0 }
  0x68   : > { %5891 = shalt.err (!%p5888_p6)
}
  0x69   : > { %s5892_s20 = scalar_lea.vmem %s6204_s14, 2048  ;;  %s5988_s21 = smov [#allocation2]  }
  0x6a   : > { %p5893_p10 = scmp.ne.s32.totalorder %s6204_s14, %s5892_s20  ;;  %s5897_s16 = sshll.u32 %s5988_s21, 4  ;;  %s5898_s16 = int_to_ptr.vmem [resolvable:$false] %s5897_s16 }
  0x6b   : > { %s5899_s29 = scalar_lea.vmem %s5898_s16, 4096  ;;  %p5900_p12 = scmp.lt.s32.totalorder %s6204_s14, %s5898_s16 }
  0x6c   : > { %p5895_p3 = pnand %p5893_p10, %p5879_p9  ;;  %p5901_p1 = scmp.lt.s32.totalorder %s5899_s29, %s5892_s20 }
  0x6e   : > { %p5896_p7 = pneg %p5895_p3  ;;  %p5902_p2 = por %p5901_p1, %p5900_p12 }
  0x70   : > { %p5903_p4 = pnand %p5902_p2, %p5896_p7 }
  0x72   : > { %5906 = shalt.err (!%p5903_p4)
}
  0x73   : > { %5242 = dma.hbm_to_vmem [thread:$0]  (!%p6200_p11), %s6198_s10, 2048, %s6204_s14, %s6206_s12, %s5986_s13, %s5986_s13, %s5987_s15  }
  0x74   : > { %p7801_p9 = scmp.ne.s32.totalorder %s7795_s9, 0 }
  0x76   : > { %292 = sbr.rel (%p7801_p9) target bundleno = 3247 (0xcaf), region = 48 }
  0x7d   : > { %s6240_s17 = sand.u32 1, %s5973_s25   ;;  %p7802_p0 = scmp.ne.s32.totalorder %s7792_s30, 0 }
  0x7e   : > { %s3686_s23 = sshll.u32 %s6240_s17, 7  ;;  %s295_s11 = scalar_lea.sflag [#allocation3], %s6240_s17 }
  0x7f   : > { %s6246_s8 = scalar_lea.vmem [#allocation2], %s3686_s23 }
  0x80   : > { %5952 = dma.done.wait (%p7802_p0), %s295_s11, 2048  }
  0x81   : > { %5954 = vsyncadd (%p7802_p0), %s295_s11, 4294965248  ;;  %p7803_p11 = scmp.eq.s32.totalorder %s6056_s28, 0 }
  0x83   : > { %5956 = dma.done.wait (%p7803_p11), [#allocation6], 4096   ;;  %p7804_p8 = pmov %p7803_p11 }
  0x85   : > { %5958 = vsyncadd (%p7804_p8), [#allocation6], 4294963200  ;;  %p7805_p13 = pmov %p7804_p8 }
  0x86   : > { %p7806_p6 = pmov %p7804_p8 }
  0x87   : > { %5960 = dma.done.wait (%p7805_p13), [#allocation9], 2048  }
  0x88   : > { %5962 = vsyncadd (%p7806_p6), [#allocation9], 4294965248  ;;  %v525_v0 = vld [vmem:[#allocation7] sm:$0xff]  ;;  %v526_v1 = vld [vmem:[#allocation7 + $0x8] sm:$0xff]  ;;  %vm861_vm0 = vcmask 261120   ;;  %s5989_s13 = smov 96  }
  0x89   : > { %v527_v2 = vld [vmem:[#allocation7 + $0x10] sm:$0xff]  ;;  %v4829_v3 = vpack.c.bf16 %v526_v1, %v525_v0  ;;  %v528_v4 = vld [vmem:[#allocation7 + $0x18] sm:$0xff]  ;;  %v529_v6 = vld [vmem:[#allocation7 + $0x20] sm:$0xff]  ;;  %s5990_s20 = smov 64   ;;  %s5991_s21 = smov 32   ;;  %vm3510_vm2 = vcmask 523264  }
  0x8a   : > { %v4833_v5 = vpack.c.bf16 %v528_v4, %v527_v2  ;;  %v530_v7 = vld [vmem:[#allocation7 + $0x28] sm:$0xff]  ;;  %v6261_v9 = vld [vmem:[%s6246_s8] sm:$0xff]  ;;  %v531_v10 = vld [vmem:[#allocation7 + $0x30] sm:$0xff]  ;;  %vm3527_vm3 = vcmask 785408   ;;  %s7625_s16 = scalar_lea.vmem [#allocation10], %s3686_s23  ;;  %s3828_s29 = sshll.u32 %s6056_s28, 11 }
  0x8b   : > { %4830 = vmatprep.subr.bf16.mxu1 %v4829_v3  ;;  %v4837_v8 = vpack.c.bf16 %v530_v7, %v529_v6  ;;  %v532_v11 = vld [vmem:[#allocation7 + $0x38] sm:$0xff]  ;;  %4269 = vmatprep.mubr.f32.mxu1 %v6261_v9  ;;  %v357_v12 = vld [vmem:[#allocation5] sm:$0xff]  ;;  %v358_v13 = vld [vmem:[#allocation5 + $0x8] sm:$0xff]  ;;  %s3574_s23 = sshll.u32 %s7625_s16, 4  ;;  %s7699_s30 = scalar_lea.hbm %s7759_s7, %s3828_s29  ;;  %s7701_s23 = int_to_ptr.vmem [resolvable:$true] %s3574_s23 }
  0x8c   : > { %4832 = vmatpush3.bf16.msra.mxu1 %v4829_v3  ;;  %4213 = vmatprep.mubr.f32.mxu0 %v6261_v9  ;;  %v359_v14 = vld [vmem:[#allocation5 + $0x10] sm:$0xff]  ;;  %v4841_v15 = vpack.c.bf16 %v532_v11, %v531_v10  ;;  %v533_v16 = vld [vmem:[#allocation7 + $0x40] sm:$0xff]  ;;  %v4797_v17 = vpack.c.bf16 %v358_v13, %v357_v12  ;;  %v360_v18 = vld [vmem:[#allocation5 + $0x18] sm:$0xff]  ;;  %s3561_s28 = scalar_lea.sflag [#allocation4], %s6240_s17  ;;  %s5907_s9 = scalar_lea.vmem %s7701_s23, 2048 }
  0x8d   : > { %4834 = vmatprep.subr.bf16.mxu1 %v4833_v5  ;;  %v534_v19 = vld [vmem:[#allocation7 + $0x48] sm:$0xff]  ;;  %v4801_v20 = vpack.c.bf16 %v360_v18, %v359_v14  ;;  %v361_v21 = vld [vmem:[#allocation5 + $0x20] sm:$0xff]  ;;  %v535_v24 = vld [vmem:[#allocation7 + $0x50] sm:$0xff]  ;;  %p5908_p10 = scmp.ne.s32.totalorder %s7701_s23, %s5907_s9 }
  0x8e   : > { %v362_v22 = vld [vmem:[#allocation5 + $0x28] sm:$0xff]  ;;  %4798 = vmatprep.subr.bf16.mxu0 %v4797_v17  ;;  %v4845_v23 = vpack.c.bf16 %v534_v19, %v533_v16  ;;  %v536_v26 = vld [vmem:[#allocation7 + $0x58] sm:$0xff]  ;;  %v363_v27 = vld [vmem:[#allocation5 + $0x30] sm:$0xff] }
  0x8f   : > { %4800 = vmatpush3.bf16.msra.mxu0 %v4797_v17  ;;  %v4805_v25 = vpack.c.bf16 %v362_v22, %v361_v21  ;;  %v364_v28 = vld [vmem:[#allocation5 + $0x38] sm:$0xff]  ;;  %v4849_v29 = vpack.c.bf16 %v536_v26, %v535_v24  ;;  %v537_v30 = vld [vmem:[#allocation7 + $0x60] sm:$0xff]  ;;  %v538_v32 = vld [vmem:[#allocation7 + $0x68] sm:$0xff]  ;;  %p5909_p3 = pnand %p5908_p10, %p6189_p5 }
  0x90   : > { %4836 = vmatpush3.bf16.msra.mxu1 %v4833_v5  ;;  %4802 = vmatprep.subr.bf16.mxu0 %v4801_v20  ;;  %v4809_v31 = vpack.c.bf16 %v364_v28, %v363_v27  ;;  %v365_v33 = vld [vmem:[#allocation5 + $0x40] sm:$0xff]  ;;  %v366_v34 = vld [vmem:[#allocation5 + $0x48] sm:$0xff]  ;;  %v4853_v35 = vpack.c.bf16 %v538_v32, %v537_v30  ;;  %v539_v36 = vld [vmem:[#allocation7 + $0x70] sm:$0xff] }
  0x91   : > { %4838 = vmatprep.subr.bf16.mxu1 %v4837_v8  ;;  %v4813_v37 = vpack.c.bf16 %v366_v34, %v365_v33  ;;  %v540_v38 = vld [vmem:[#allocation7 + $0x78] sm:$0xff]  ;;  %v367_v39 = vld [vmem:[#allocation5 + $0x50] sm:$0xff]  ;;  %v369_v43 = vld [vmem:[#allocation5 + $0x60] sm:$0xff]  ;;  %p5910_p7 = pneg %p5909_p3 }
  0x92   : > { %v368_v40 = vld [vmem:[#allocation5 + $0x58] sm:$0xff]  ;;  %v4857_v41 = vpack.c.bf16 %v540_v38, %v539_v36  ;;  %v370_v44 = vld [vmem:[#allocation5 + $0x68] sm:$0xff]  ;;  %v371_v46 = vld [vmem:[#allocation5 + $0x70] sm:$0xff] }
  0x93   : > { %4804 = vmatpush3.bf16.msra.mxu0 %v4801_v20  ;;  %v4817_v42 = vpack.c.bf16 %v368_v40, %v367_v39  ;;  %v4821_v45 = vpack.c.bf16 %v370_v44, %v369_v43  ;;  %v372_v47 = vld [vmem:[#allocation5 + $0x78] sm:$0xff]  ;;  %v6266_v48 = vld [vmem:[%s6246_s8 + $0x8] sm:$0xff]  ;;  %v6269_v49 = vld [vmem:[%s6246_s8 + $0x10] sm:$0xff] }
  0x94   : > { %4840 = vmatpush3.bf16.msra.mxu1 %v4837_v8  ;;  %4806 = vmatprep.subr.bf16.mxu0 %v4805_v25  ;;  %v4825_v50 = vpack.c.bf16 %v372_v47, %v371_v46  ;;  %v693_v51 = vld [vmem:[#allocation8] sm:$0xff]  ;;  %v694_v52 = vld [vmem:[#allocation8 + $0x8] sm:$0xff]  ;;  %v6274_v53 = vld [vmem:[%s6246_s8 + $0x18] sm:$0xff] }
  0x95   : > { %4842 = vmatprep.subr.bf16.mxu1 %v4841_v15  ;;  %v6277_v54 = vld [vmem:[%s6246_s8 + $0x20] sm:$0xff]  ;;  %v4861_v55 = vpack.c.bf16 %v694_v52, %v693_v51  ;;  %v695_v56 = vld [vmem:[#allocation8 + $0x10] sm:$0xff]  ;;  %v696_v57 = vld [vmem:[#allocation8 + $0x18] sm:$0xff] }
  0x96   : > { %v6282_v58 = vld [vmem:[%s6246_s8 + $0x28] sm:$0xff]  ;;  %v6285_v59 = vld [vmem:[%s6246_s8 + $0x30] sm:$0xff]  ;;  %v4865_v60 = vpack.c.bf16 %v696_v57, %v695_v56  ;;  %v697_v61 = vld [vmem:[#allocation8 + $0x20] sm:$0xff] }
  0x97   : > { %4808 = vmatpush3.bf16.msra.mxu0 %v4805_v25  ;;  %v698_v62 = vld [vmem:[#allocation8 + $0x28] sm:$0xff]  ;;  %v6291_v63 = vld [vmem:[%s6246_s8 + $0x38] sm:$0xff]  ;;  %v6294_v0 = vld [vmem:[%s6246_s8 + $0x40] sm:$0xff] }
  0x98   : > { %4844 = vmatpush3.bf16.msra.mxu1 %v4841_v15  ;;  %4810 = vmatprep.subr.bf16.mxu0 %v4809_v31  ;;  %v4869_v1 = vpack.c.bf16 %v698_v62, %v697_v61  ;;  %v699_v2 = vld [vmem:[#allocation8 + $0x30] sm:$0xff]  ;;  %v700_v3 = vld [vmem:[#allocation8 + $0x38] sm:$0xff]  ;;  %v350_v4 = vld [vmem:[%s6246_s8 + $0x48] sm:$0xff] }
  0x99   : > { %4846 = vmatprep.subr.bf16.mxu1 %v4845_v23  ;;  %v351_v5 = vld [vmem:[%s6246_s8 + $0x50] sm:$0xff]  ;;  %v4873_v6 = vpack.c.bf16 %v700_v3, %v699_v2  ;;  %v701_v7 = vld [vmem:[#allocation8 + $0x40] sm:$0xff]  ;;  %v702_v8 = vld [vmem:[#allocation8 + $0x48] sm:$0xff] }
  0x9a   : > { %v352_v10 = vld [vmem:[%s6246_s8 + $0x58] sm:$0xff]  ;;  %v353_v11 = vld [vmem:[%s6246_s8 + $0x60] sm:$0xff]  ;;  %v4877_v12 = vpack.c.bf16 %v702_v8, %v701_v7  ;;  %v703_v13 = vld [vmem:[#allocation8 + $0x50] sm:$0xff] }
  0x9b   : > { %4812 = vmatpush3.bf16.msra.mxu0 %v4809_v31  ;;  %v704_v14 = vld [vmem:[#allocation8 + $0x58] sm:$0xff]  ;;  %v354_v15 = vld [vmem:[%s6246_s8 + $0x68] sm:$0xff]  ;;  %v355_v16 = vld [vmem:[%s6246_s8 + $0x70] sm:$0xff] }
  0x9c   : > { %4848 = vmatpush3.bf16.msra.mxu1 %v4845_v23  ;;  %4814 = vmatprep.subr.bf16.mxu0 %v4813_v37  ;;  %v4881_v17 = vpack.c.bf16 %v704_v14, %v703_v13  ;;  %v705_v18 = vld [vmem:[#allocation8 + $0x60] sm:$0xff]  ;;  %v706_v19 = vld [vmem:[#allocation8 + $0x68] sm:$0xff]  ;;  %v356_v20 = vld [vmem:[%s6246_s8 + $0x78] sm:$0xff] }
  0x9d   : > { %4850 = vmatprep.subr.bf16.mxu1 %v4849_v29  ;;  %v4885_v21 = vpack.c.bf16 %v706_v19, %v705_v18  ;;  %v707_v22 = vld [vmem:[#allocation8 + $0x70] sm:$0xff]  ;;  %v708_v23 = vld [vmem:[#allocation8 + $0x78] sm:$0xff]  ;;  %vm6330_vm1 = vmpackc.low %vm861_vm0, %vm861_vm0 }
  0x9e   : > { %v4889_v24 = vpack.c.bf16 %v708_v23, %v707_v22  ;;  %v6347_v36 = vld [vmem:[%s7756_s4] ss:$0 sm:$0xff] }
  0x9f   : > { %4816 = vmatpush3.bf16.msra.mxu0 %v4813_v37 }
  0xa0   : > { %4852 = vmatpush3.bf16.msra.mxu1 %v4849_v29  ;;  %4818 = vmatprep.subr.bf16.mxu0 %v4817_v42  ;;  %v7807_v29 = vmov 0 }
  0xa1   : > { %4854 = vmatprep.subr.bf16.mxu1 %v4853_v35  ;;  %v7808_v29 = vsel %vm6330_vm1, 4294967295, %v7807_v29 }
  0xa2   : > { %7809 = vst [vmem:[#allocation16_spill] sm:$0xff] %v7808_v29 }
  0xa3   : > { %4820 = vmatpush3.bf16.msra.mxu0 %v4817_v42 }
  0xa4   : > { %4856 = vmatpush3.bf16.msra.mxu1 %v4853_v35  ;;  %4822 = vmatprep.subr.bf16.mxu0 %v4821_v45 }
  0xa5   : > { %4858 = vmatprep.subr.bf16.mxu1 %v4857_v41 }
  0xa7   : > { %4824 = vmatpush3.bf16.msra.mxu0 %v4821_v45 }
  0xa8   : > { %4860 = vmatpush3.bf16.msra.mxu1 %v4857_v41  ;;  %4826 = vmatprep.subr.bf16.mxu0 %v4825_v50 }
  0xab   : > { %4270 = vmatmul.mubr.f32.vlgmr.msra.gmra.mrb[0].mxu1 %v6266_v48  ;;  %4828 = vmatpush3.bf16.msra.mxu0 %v4825_v50 }
  0xac   : > { %4272 = vmatprep.mubr.f32.mxu1 %v6269_v49  ;;  %4862 = vmatprep.subr.bf16.mxu0 %v4861_v55 }
  0xae   : > { %4214 = vmatmul.mubr.f32.vlgmr.msra.gmra.mrb[0].mxu0 %v6266_v48 }
  0xaf   : > { %4273 = vmatmul.mubr.f32.gmra.mrb[2].mxu1 %v6274_v53  ;;  %4864 = vmatpush3.bf16.msra.mxu0 %v4861_v55 }
  0xb0   : > { %4275 = vmatprep.mubr.f32.mxu1 %v6277_v54  ;;  %4216 = vmatprep.mubr.f32.mxu0 %v6269_v49 }
  0xb1   : > { %4866 = vmatprep.subr.bf16.mxu0 %v4865_v60 }
  0xb2   : > { %4217 = vmatmul.mubr.f32.gmra.mrb[2].mxu0 %v6274_v53 }
  0xb3   : > { %4276 = vmatmul.mubr.f32.gmra.mrb[4].mxu1 %v6282_v58  ;;  %4868 = vmatpush3.bf16.msra.mxu0 %v4865_v60 }
  0xb4   : > { %4278 = vmatprep.mubr.f32.mxu1 %v6285_v59  ;;  %4219 = vmatprep.mubr.f32.mxu0 %v6277_v54 }
  0xb5   : > { %4870 = vmatprep.subr.bf16.mxu0 %v4869_v1 }
  0xb6   : > { %4220 = vmatmul.mubr.f32.gmra.mrb[4].mxu0 %v6282_v58 }
  0xb7   : > { %4279 = vmatmul.mubr.f32.gmra.mrb[6].mxu1 %v6291_v63  ;;  %4872 = vmatpush3.bf16.msra.mxu0 %v4869_v1 }
  0xb8   : > { %4281 = vmatprep.mubr.f32.mxu1 %v6294_v0  ;;  %4222 = vmatprep.mubr.f32.mxu0 %v6285_v59 }
  0xb9   : > { %4874 = vmatprep.subr.bf16.mxu0 %v4873_v6 }
  0xba   : > { %4223 = vmatmul.mubr.f32.gmra.mrb[6].mxu0 %v6291_v63 }
  0xbb   : > { %4282 = vmatmul.mubr.f32.gmra.mrb[8].mxu1 %v350_v4  ;;  %4876 = vmatpush3.bf16.msra.mxu0 %v4873_v6 }
  0xbc   : > { %4284 = vmatprep.mubr.f32.mxu1 %v351_v5  ;;  %4225 = vmatprep.mubr.f32.mxu0 %v6294_v0 }
  0xbd   : > { %4878 = vmatprep.subr.bf16.mxu0 %v4877_v12 }
  0xbe   : > { %4226 = vmatmul.mubr.f32.gmra.mrb[8].mxu0 %v350_v4 }
  0xbf   : > { %4285 = vmatmul.mubr.f32.gmra.mrb[10].mxu1 %v352_v10  ;;  %4880 = vmatpush3.bf16.msra.mxu0 %v4877_v12 }
  0xc0   : > { %4287 = vmatprep.mubr.f32.mxu1 %v353_v11  ;;  %4228 = vmatprep.mubr.f32.mxu0 %v351_v5 }
  0xc1   : > { %4882 = vmatprep.subr.bf16.mxu0 %v4881_v17 }
  0xc2   : > { %4229 = vmatmul.mubr.f32.gmra.mrb[10].mxu0 %v352_v10 }
  0xc3   : > { %4288 = vmatmul.mubr.f32.gmra.mrb[12].mxu1 %v354_v15  ;;  %4884 = vmatpush3.bf16.msra.mxu0 %v4881_v17 }
  0xc4   : > { %4290 = vmatprep.mubr.f32.mxu1 %v355_v16  ;;  %4231 = vmatprep.mubr.f32.mxu0 %v353_v11 }
  0xc5   : > { %4886 = vmatprep.subr.bf16.mxu0 %v4885_v21 }
  0xc6   : > { %4232 = vmatmul.mubr.f32.gmra.mrb[12].mxu0 %v354_v15 }
  0xc7   : > { %4291 = vmatmul.mubr.f32.gmra.mrb[14].mxu1 %v356_v20  ;;  %4888 = vmatpush3.bf16.msra.mxu0 %v4885_v21 }
  0xc8   : > { %4234 = vmatprep.mubr.f32.mxu0 %v355_v16  ;;  %4890 = vmatprep.subr.bf16.mxu0 %v4889_v24 }
  0xca   : > { %4235 = vmatmul.mubr.f32.gmra.mrb[14].mxu0 %v356_v20 }
  0xcb   : > { %4892 = vmatpush3.bf16.msra.mxu0 %v4889_v24  ;;  %4325 = vmatprep.mubr.f32.mxu0 %v6261_v9  ;;  %v6324_v9 = vld [vmem:[%s7757_s5] ss:$0 sm:$0xff] }
  0xce   : > { %4326 = vmatmul.mubr.f32.vlgmr.msra.gmra.mrb[16].mxu0 %v6266_v48 }
  0xcf   : > { %4328 = vmatprep.mubr.f32.mxu0 %v6269_v49 }
  0xd2   : > { %4329 = vmatmul.mubr.f32.gmra.mrb[18].mxu0 %v6274_v53 }
  0xd3   : > { %4331 = vmatprep.mubr.f32.mxu0 %v6277_v54 }
  0xd6   : > { %4332 = vmatmul.mubr.f32.gmra.mrb[20].mxu0 %v6282_v58 }
  0xd7   : > { %4334 = vmatprep.mubr.f32.mxu0 %v6285_v59 }
  0xda   : > { %4335 = vmatmul.mubr.f32.gmra.mrb[22].mxu0 %v6291_v63 }
  0xdb   : > { %4337 = vmatprep.mubr.f32.mxu0 %v6294_v0 }
  0xde   : > { %4338 = vmatmul.mubr.f32.gmra.mrb[24].mxu0 %v350_v4 }
  0xdf   : > { %4340 = vmatprep.mubr.f32.mxu0 %v351_v5 }
  0xe2   : > { %4341 = vmatmul.mubr.f32.gmra.mrb[26].mxu0 %v352_v10 }
  0xe3   : > { %4343 = vmatprep.mubr.f32.mxu0 %v353_v11 }
  0xe6   : > { %4344 = vmatmul.mubr.f32.gmra.mrb[28].mxu0 %v354_v15 }
  0xe7   : > { %4346 = vmatprep.mubr.f32.mxu0 %v355_v16 }
  0xea   : > { %4347 = vmatmul.mubr.f32.gmra.mrb[30].mxu0 %v356_v20 }
 0x17e   : > { %v4271_v25 = vpop.f32.mrb[0].mxu1 }
 0x17f   : > { %v620_v26 = vadd.f32 %v4271_v25, %v6324_v9  ;;  %v614_v27 = vpop.f32.mrb[1].mxu1 }
 0x180   : > { %v615_v28 = vadd.f32 %v6324_v9, %v614_v27 }
 0x181   : > { %v6351_v40 = vpop.f32.mrb[0].mxu0 }
 0x182   : > { %v6334_v30 = vpack.i.bf16 %v620_v26, %v615_v28  ;;  %v4893_v31 = vpack.c.bf16 %v620_v26, %v615_v28  ;;  %v4274_v32 = vpop.f32.mrb[2].mxu1  ;;  %v446_v43 = vpop.f32.mrb[1].mxu0 }
 0x183   : > { %v630_v33 = vadd.f32 %v4274_v32, %v6324_v9  ;;  %v624_v34 = vpop.f32.mrb[3].mxu1  ;;  %v6360_v45 = vadd.f32 %v6347_v36, %v446_v43 }
 0x184   : > { %7810 = vst [vmem:[#allocation17_spill] sm:$0xff] %v6334_v30  ;;  %5298 = vrot.lane.b32.xlu0 %v6334_v30, %s5989_s13  ;;  %4895 = vmatprep.subr.msk.bf16.mxu1 %vm6330_vm1, %v4893_v31  ;;  %v625_v35 = vadd.f32 %v6324_v9, %v624_v34 }
 0x185   : > { %4898 = vmatpush3.bf16.xpose.msk.msra.mxu1 %vm6330_vm1, %v4893_v31  ;;  %4381 = vmatprep.mubr.msk.f32.mxu1 %vm861_vm0, %v6360_v45  ;;  %v6366_v49 = vpop.f32.mrb[2].mxu0 }
 0x186   : > { %v6349_v37 = vpack.i.bf16 %v630_v33, %v625_v35  ;;  %v4899_v38 = vpack.c.bf16 %v630_v33, %v625_v35  ;;  %v4277_v39 = vpop.f32.mrb[4].mxu1  ;;  %v6369_v52 = vpop.f32.mrb[3].mxu0 }
 0x187   : > { %v640_v41 = vadd.f32 %v4277_v39, %v6324_v9  ;;  %v634_v42 = vpop.f32.mrb[5].mxu1 }
 0x188   : > { %7811 = vst [vmem:[#allocation18_spill] sm:$0xff] %v6349_v37  ;;  %5303 = vrot.lane.b32.xlu1 %v6349_v37, %s5989_s13  ;;  %4901 = vmatprep.subr.msk.bf16.mxu1 %vm6330_vm1, %v4899_v38  ;;  %v635_v44 = vadd.f32 %v6324_v9, %v634_v42 }
 0x189   : > { %v4221_v57 = vpop.f32.mrb[4].mxu0 }
 0x18a   : > { %v6362_v46 = vpack.i.bf16 %v640_v41, %v635_v44  ;;  %v4905_v47 = vpack.c.bf16 %v640_v41, %v635_v44  ;;  %v4280_v48 = vpop.f32.mrb[6].mxu1  ;;  %v6382_v60 = vadd.f32 %v4221_v57, %v6347_v36  ;;  %v6384_v61 = vpop.f32.mrb[5].mxu0  ;;  %v3693_v44 = vld [vmem:[%s7758_s6] ss:$0 sm:$0xff] }
 0x18b   : > { %v650_v50 = vadd.f32 %v4280_v48, %v6324_v9  ;;  %v644_v51 = vpop.f32.mrb[7].mxu1 }
 0x18c   : > { %7812 = vst [vmem:[#allocation19_spill] sm:$0xff] %v6362_v46  ;;  %5308 = vrot.lane.b32.xlu0 %v6362_v46, %s5989_s13  ;;  %v645_v53 = vadd.f32 %v6324_v9, %v644_v51 }
 0x18d   : > { %4904 = vmatpush3.bf16.xpose.msk.msra.mxu1 %vm6330_vm1, %v4899_v38  ;;  %v4224_v1 = vpop.f32.mrb[6].mxu0 }
 0x18e   : > { %4907 = vmatprep.subr.msk.bf16.mxu1 %vm6330_vm1, %v4905_v47  ;;  %v6378_v54 = vpack.i.bf16 %v650_v50, %v645_v53  ;;  %v4911_v55 = vpack.c.bf16 %v650_v50, %v645_v53  ;;  %v4283_v56 = vpop.f32.mrb[8].mxu1  ;;  %v6393_v5 = vadd.f32 %v4224_v1, %v6347_v36  ;;  %v476_v6 = vpop.f32.mrb[7].mxu0 }
 0x18f   : > { %v660_v58 = vadd.f32 %v4283_v56, %v6324_v9  ;;  %v654_v59 = vpop.f32.mrb[9].mxu1  ;;  %v6397_v8 = vadd.f32 %v6347_v36, %v476_v6 }
 0x190   : > { %7813 = vst [vmem:[#allocation20_spill] sm:$0xff] %v6378_v54  ;;  %5313 = vrot.lane.b32.xlu1 %v6378_v54, %s5989_s13  ;;  %v655_v62 = vadd.f32 %v6324_v9, %v654_v59 }
 0x191   : > { %v4227_v12 = vpop.f32.mrb[8].mxu0 }
 0x192   : > { %v4917_v63 = vpack.c.bf16 %v660_v58, %v655_v62  ;;  %v4286_v0 = vpop.f32.mrb[10].mxu1  ;;  %v6389_v2 = vpack.i.bf16 %v660_v58, %v655_v62  ;;  %v6407_v16 = vadd.f32 %v4227_v12, %v6347_v36  ;;  %v486_v17 = vpop.f32.mrb[9].mxu0 }
 0x193   : > { %v670_v3 = vadd.f32 %v4286_v0, %v6324_v9  ;;  %v664_v4 = vpop.f32.mrb[11].mxu1  ;;  %v6411_v19 = vadd.f32 %v6347_v36, %v486_v17 }
 0x194   : > { %7814 = vst [vmem:[#allocation21_spill] sm:$0xff] %v6389_v2  ;;  %v665_v7 = vadd.f32 %v6324_v9, %v664_v4 }
 0x195   : > { %4910 = vmatpush3.bf16.xpose.msk.msra.mxu1 %vm6330_vm1, %v4905_v47  ;;  %v4230_v22 = vpop.f32.mrb[10].mxu0 }
 0x196   : > { %4913 = vmatprep.subr.msk.bf16.mxu1 %vm6330_vm1, %v4911_v55  ;;  %v4923_v10 = vpack.c.bf16 %v670_v3, %v665_v7  ;;  %v4289_v11 = vpop.f32.mrb[12].mxu1  ;;  %v6403_v13 = vpack.i.bf16 %v670_v3, %v665_v7  ;;  %v6417_v26 = vadd.f32 %v4230_v22, %v6347_v36  ;;  %v496_v27 = vpop.f32.mrb[11].mxu0 }
 0x197   : > { %v680_v14 = vadd.f32 %v4289_v11, %v6324_v9  ;;  %v674_v15 = vpop.f32.mrb[13].mxu1  ;;  %v6421_v31 = vadd.f32 %v6347_v36, %v496_v27 }
 0x198   : > { %7815 = vst [vmem:[#allocation22_spill] sm:$0xff] %v6403_v13  ;;  %v675_v18 = vadd.f32 %v6324_v9, %v674_v15 }
 0x199   : > { %v4233_v33 = vpop.f32.mrb[12].mxu0 }
 0x19a   : > { %v4929_v20 = vpack.c.bf16 %v680_v14, %v675_v18  ;;  %v4292_v21 = vpop.f32.mrb[14].mxu1  ;;  %v6413_v23 = vpack.i.bf16 %v680_v14, %v675_v18  ;;  %v6430_v35 = vadd.f32 %v4233_v33, %v6347_v36  ;;  %v506_v38 = vpop.f32.mrb[13].mxu0 }
 0x19b   : > { %v690_v24 = vadd.f32 %v4292_v21, %v6324_v9  ;;  %v684_v25 = vpop.f32.mrb[15].mxu1  ;;  %v6433_v39 = vadd.f32 %v6347_v36, %v506_v38 }
 0x19c   : > { %7816 = vst [vmem:[#allocation23_spill] sm:$0xff] %v6413_v23  ;;  %v685_v28 = vadd.f32 %v6324_v9, %v684_v25 }
 0x19d   : > { %4916 = vmatpush3.bf16.xpose.msk.msra.mxu1 %vm6330_vm1, %v4911_v55  ;;  %v4236_v9 = vpop.f32.mrb[14].mxu0 }
 0x19e   : > { %4919 = vmatprep.subr.msk.bf16.mxu1 %vm6330_vm1, %v4917_v63  ;;  %v4935_v32 = vpack.c.bf16 %v690_v24, %v685_v28  ;;  %v6427_v34 = vpack.i.bf16 %v690_v24, %v685_v28  ;;  %v6436_v41 = vadd.f32 %v4236_v9, %v6347_v36  ;;  %v516_v42 = vpop.f32.mrb[15].mxu0  ;;  %v6500_v9 = vadd.f32 %v6347_v36, %v6369_v52 }
 0x19f   : > { %v6439_v43 = vadd.f32 %v6347_v36, %v516_v42  ;;  %v6504_v42 = vadd.f32 %v6351_v40, %v6347_v36  ;;  %v6522_v40 = vadd.f32 %v6347_v36, %v6384_v61 }
 0x1a1   : > { %v4327_v47 = vpop.f32.mrb[16].mxu0 }
 0x1a2   : > { %v6448_v48 = vadd.f32 %v4327_v47, %v3693_v44  ;;  %v782_v50 = vpop.f32.mrb[17].mxu0 }
 0x1a3   : > { %v6450_v51 = vadd.f32 %v3693_v44, %v782_v50 }
 0x1a5   : > { %4922 = vmatpush3.bf16.xpose.msk.msra.mxu1 %vm6330_vm1, %v4917_v63  ;;  %v4330_v53 = vpop.f32.mrb[18].mxu0  ;;  %v4941_v55 = vpack.c.bf16 %v6448_v48, %v6450_v51 }
 0x1a6   : > { %4925 = vmatprep.subr.msk.bf16.mxu1 %vm6330_vm1, %v4923_v10  ;;  %v6454_v56 = vadd.f32 %v4330_v53, %v3693_v44  ;;  %v792_v57 = vpop.f32.mrb[19].mxu0 }
 0x1a7   : > { %v6456_v58 = vadd.f32 %v3693_v44, %v792_v57  ;;  %4942 = vmatprep.subr.bf16.mxu0 %v4941_v55 }
 0x1a8   : > { %4944 = vmatpush3.bf16.msra.mxu0 %v4941_v55  ;;  %v6512_v55 = vadd.f32 %v6366_v49, %v6347_v36 }
 0x1a9   : > { %v4333_v59 = vpop.f32.mrb[20].mxu0  ;;  %v4945_v62 = vpack.c.bf16 %v6454_v56, %v6456_v58 }
 0x1aa   : > { %v6464_v63 = vadd.f32 %v4333_v59, %v3693_v44  ;;  %v802_v0 = vpop.f32.mrb[21].mxu0 }
 0x1ab   : > { %v6466_v1 = vadd.f32 %v3693_v44, %v802_v0  ;;  %4946 = vmatprep.subr.bf16.mxu0 %v4945_v62 }
 0x1ac   : > { %4948 = vmatpush3.bf16.msra.mxu0 %v4945_v62 }
 0x1ad   : > { %4928 = vmatpush3.bf16.xpose.msk.msra.mxu1 %vm6330_vm1, %v4923_v10  ;;  %v4336_v3 = vpop.f32.mrb[22].mxu0  ;;  %v4949_v4 = vpack.c.bf16 %v6464_v63, %v6466_v1 }
 0x1ae   : > { %4931 = vmatprep.subr.msk.bf16.mxu1 %vm6330_vm1, %v4929_v20  ;;  %v6470_v6 = vadd.f32 %v4336_v3, %v3693_v44  ;;  %v812_v7 = vpop.f32.mrb[23].mxu0 }
 0x1af   : > { %v6472_v10 = vadd.f32 %v3693_v44, %v812_v7  ;;  %4950 = vmatprep.subr.bf16.mxu0 %v4949_v4 }
 0x1b0   : > { %4952 = vmatpush3.bf16.msra.mxu0 %v4949_v4 }
 0x1b1   : > { %v4339_v11 = vpop.f32.mrb[24].mxu0  ;;  %v4953_v12 = vpack.c.bf16 %v6470_v6, %v6472_v10 }
 0x1b2   : > { %v6480_v14 = vadd.f32 %v4339_v11, %v3693_v44  ;;  %v822_v15 = vpop.f32.mrb[25].mxu0 }
 0x1b3   : > { %v6482_v17 = vadd.f32 %v3693_v44, %v822_v15  ;;  %4954 = vmatprep.subr.bf16.mxu0 %v4953_v12 }
 0x1b4   : > { %4956 = vmatpush3.bf16.msra.mxu0 %v4953_v12 }
 0x1b5   : > { %4934 = vmatpush3.bf16.xpose.msk.msra.mxu1 %vm6330_vm1, %v4929_v20  ;;  %v4342_v18 = vpop.f32.mrb[26].mxu0  ;;  %v4957_v21 = vpack.c.bf16 %v6480_v14, %v6482_v17 }
 0x1b6   : > { %4937 = vmatprep.subr.msk.bf16.mxu1 %vm6330_vm1, %v4935_v32  ;;  %v6486_v20 = vadd.f32 %v4342_v18, %v3693_v44  ;;  %v832_v22 = vpop.f32.mrb[27].mxu0 }
 0x1b7   : > { %v6488_v24 = vadd.f32 %v3693_v44, %v832_v22  ;;  %4958 = vmatprep.subr.bf16.mxu0 %v4957_v21 }
 0x1b8   : > { %4960 = vmatpush3.bf16.msra.mxu0 %v4957_v21 }
 0x1b9   : > { %v4345_v25 = vpop.f32.mrb[28].mxu0  ;;  %v4961_v27 = vpack.c.bf16 %v6486_v20, %v6488_v24 }
 0x1ba   : > { %v6494_v28 = vadd.f32 %v4345_v25, %v3693_v44  ;;  %v842_v33 = vpop.f32.mrb[29].mxu0 }
 0x1bb   : > { %v6496_v38 = vadd.f32 %v3693_v44, %v842_v33  ;;  %4962 = vmatprep.subr.bf16.mxu0 %v4961_v27 }
 0x1bc   : > { %4964 = vmatpush3.bf16.msra.mxu0 %v4961_v27 }
 0x1bd   : > { %4940 = vmatpush3.bf16.xpose.msk.msra.mxu1 %vm6330_vm1, %v4935_v32  ;;  %v4348_v32 = vpop.f32.mrb[30].mxu0  ;;  %v4965_v47 = vpack.c.bf16 %v6494_v28, %v6496_v38 }
 0x1be   : > { %v6508_v50 = vadd.f32 %v4348_v32, %v3693_v44  ;;  %v852_v53 = vpop.f32.mrb[31].mxu0 }
 0x1bf   : > { %v6516_v52 = vadd.f32 %v3693_v44, %v852_v53  ;;  %4966 = vmatprep.subr.bf16.mxu0 %v4965_v47 }
 0x1c0   : > { %7817 = vst [vmem:[#allocation24_spill] sm:$0xff] %v6508_v50  ;;  %4968 = vmatpush3.bf16.msra.mxu0 %v4965_v47 }
 0x1c1   : > { %7818 = vst [vmem:[#allocation25_spill] sm:$0xff] %v6516_v52  ;;  %v4969_v57 = vpack.c.bf16 %v6508_v50, %v6516_v52 }
 0x1c3   : > { %4970 = vmatprep.subr.bf16.mxu0 %v4969_v57 }
 0x1c4   : > { %4382 = vmatmul.mubr.msk.f32.vlgmr.msra.gmra.mrb[16].mxu1 %vm861_vm0, %v6504_v42  ;;  %4972 = vmatpush3.bf16.msra.mxu0 %v4969_v57 }
 0x1c5   : > { %4384 = vmatprep.mubr.msk.f32.mxu1 %vm861_vm0, %v6500_v9 }
 0x1c8   : > { %4385 = vmatmul.mubr.msk.f32.gmra.mrb[18].mxu1 %vm861_vm0, %v6512_v55 }
 0x1c9   : > { %4387 = vmatprep.mubr.msk.f32.mxu1 %vm861_vm0, %v6522_v40 }
 0x1cc   : > { %4388 = vmatmul.mubr.msk.f32.gmra.mrb[20].mxu1 %vm861_vm0, %v6382_v60 }
 0x1cd   : > { %4390 = vmatprep.mubr.msk.f32.mxu1 %vm861_vm0, %v6397_v8 }
 0x1d0   : > { %4391 = vmatmul.mubr.msk.f32.gmra.mrb[22].mxu1 %vm861_vm0, %v6393_v5 }
 0x1d1   : > { %4393 = vmatprep.mubr.msk.f32.mxu1 %vm861_vm0, %v6411_v19 }
 0x1d4   : > { %4394 = vmatmul.mubr.msk.f32.gmra.mrb[24].mxu1 %vm861_vm0, %v6407_v16 }
 0x1d5   : > { %4396 = vmatprep.mubr.msk.f32.mxu1 %vm861_vm0, %v6421_v31 }
 0x1d8   : > { %4397 = vmatmul.mubr.msk.f32.gmra.mrb[26].mxu1 %vm861_vm0, %v6417_v26 }
 0x1d9   : > { %4399 = vmatprep.mubr.msk.f32.mxu1 %vm861_vm0, %v6433_v39 }
 0x1dc   : > { %4400 = vmatmul.mubr.msk.f32.gmra.mrb[28].mxu1 %vm861_vm0, %v6430_v35 }
 0x1dd   : > { %4402 = vmatprep.mubr.msk.f32.mxu1 %vm861_vm0, %v6439_v43 }
 0x1e0   : > { %4403 = vmatmul.mubr.msk.f32.gmra.mrb[30].mxu1 %vm861_vm0, %v6436_v41 }
 0x1f6   : > { %v5299_v36 = vpop.permute.xlu0 %5298 }
 0x1f7   : > { %v5301_v49 = vunpack.i.h.bf16 %v5299_v36  ;;  %v5300_v61 = vunpack.i.l.bf16 %v5299_v36 }
 0x1f9   : > { %v6552_v44 = vpack.c.bf16 %v5301_v49, %v5300_v61 }
 0x1fa   : > { %v6608_v37 = vpop.permute.xlu1 %5303 }
 0x1fb   : > { %7819 = vst [vmem:[#allocation26_spill] sm:$0xff] %v6552_v44  ;;  %4975 = vmatprep.subr.msk.bf16.mxu0 %vm6330_vm1, %v6552_v44  ;;  %7823 = vst [vmem:[#allocation30_spill] sm:$0xff] %v6608_v37 }
 0x297   : > { %v4383_v59 = vpop.f32.mrb[16].mxu1 }
 0x298   : > { %v1104_v62 = vmul.f32 0.17677669, %v4383_v59  ;;  %v1024_v0 = vpop.f32.mrb[17].mxu1 }
 0x299   : > { %v1103_v4 = vmul.f32 0.17677669, %v1024_v0 }
 0x29a   : > { %1121 = vmax.xlane.f32.xlu0 %v1104_v62 }
 0x29b   : > { %v4386_v3 = vpop.f32.mrb[18].mxu1 }
 0x29c   : > { %v6557_v7 = vmul.f32 0.17677669, %v4386_v3  ;;  %v1034_v11 = vpop.f32.mrb[19].mxu1 }
 0x29d   : > { %v6560_v12 = vmul.f32 0.17677669, %v1034_v11 }
 0x29e   : > { %1119 = vmax.xlane.f32.xlu0 %v1103_v4  ;;  %1125 = vmax.xlane.f32.xlu1 %v6557_v7 }
 0x29f   : > { %v4389_v15 = vpop.f32.mrb[20].mxu1 }
 0x2a0   : > { %v1044_v18 = vpop.f32.mrb[21].mxu1  ;;  %v6564_v22 = vmul.f32 0.17677669, %v4389_v15 }
 0x2a1   : > { %v6562_v21 = vmul.f32 0.17677669, %v1044_v18 }
 0x2a2   : > { %1123 = vmax.xlane.f32.xlu1 %v6560_v12 }
 0x2a3   : > { %1127 = vmax.xlane.f32.xlu0 %v6562_v21  ;;  %v4392_v25 = vpop.f32.mrb[22].mxu1 }
 0x2a4   : > { %v1054_v27 = vpop.f32.mrb[23].mxu1  ;;  %v6570_v32 = vmul.f32 0.17677669, %v4392_v25 }
 0x2a5   : > { %v6568_v33 = vmul.f32 0.17677669, %v1054_v27 }
 0x2a6   : > { %1129 = vmax.xlane.f32.xlu1 %v6564_v22 }
 0x2a7   : > { %1131 = vmax.xlane.f32.xlu0 %v6568_v33  ;;  %v4395_v47 = vpop.f32.mrb[24].mxu1 }
 0x2a8   : > { %v1064_v53 = vpop.f32.mrb[25].mxu1  ;;  %v6576_v36 = vmul.f32 0.17677669, %v4395_v47 }
 0x2a9   : > { %v6574_v57 = vmul.f32 0.17677669, %v1064_v53 }
 0x2aa   : > { %1133 = vmax.xlane.f32.xlu1 %v6570_v32 }
 0x2ab   : > { %1135 = vmax.xlane.f32.xlu0 %v6574_v57  ;;  %v4398_v49 = vpop.f32.mrb[26].mxu1 }
 0x2ac   : > { %v1074_v61 = vpop.f32.mrb[27].mxu1  ;;  %v6582_v0 = vmul.f32 0.17677669, %v4398_v49  ;;  %v6601_v49 = vpop.permute.xlu0 %5308 }
 0x2ad   : > { %v6580_v59 = vmul.f32 0.17677669, %v1074_v61  ;;  %7820 = vst [vmem:[#allocation27_spill] sm:$0xff] %v6601_v49 }
 0x2ae   : > { %1137 = vmax.xlane.f32.xlu1 %v6576_v36 }
 0x2af   : > { %1139 = vmax.xlane.f32.xlu0 %v6580_v59  ;;  %v4401_v3 = vpop.f32.mrb[28].mxu1 }
 0x2b0   : > { %v1084_v11 = vpop.f32.mrb[29].mxu1  ;;  %v6588_v18 = vmul.f32 0.17677669, %v4401_v3 }
 0x2b1   : > { %v6586_v15 = vmul.f32 0.17677669, %v1084_v11 }
 0x2b2   : > { %1141 = vmax.xlane.f32.xlu1 %v6582_v0 }
 0x2b3   : > { %1143 = vmax.xlane.f32.xlu0 %v6586_v15  ;;  %v4404_v25 = vpop.f32.mrb[30].mxu1 }
 0x2b4   : > { %v1094_v27 = vpop.f32.mrb[31].mxu1  ;;  %v6594_v53 = vmul.f32 0.17677669, %v4404_v25 }
 0x2b5   : > { %v6592_v47 = vmul.f32 0.17677669, %v1094_v27 }
 0x2b6   : > { %1145 = vmax.xlane.f32.xlu1 %v6588_v18 }
 0x2b7   : > { %1147 = vmax.xlane.f32.xlu0 %v6592_v47 }
 0x2ba   : > { %1149 = vmax.xlane.f32.xlu1 %v6594_v53 }
 0x2cd   : > { %5318 = vrot.lane.b32.xlu0 %v6389_v2, %s5989_s13  ;;  %v6611_v2 = vpop.permute.xlu1 %5313 }
 0x2ce   : > { %7824 = vst [vmem:[#allocation31_spill] sm:$0xff] %v6611_v2 }
 0x327   : > { %v1122_v61 = vpop.xlane.xlu0 %1121 }
 0x328   : > { %v1152_v3 = vsub.f32 %v1104_v62, %v1122_v61 }
 0x32a   : > { %v1169_v11 = vmul.f32 1.442695, %v1152_v3 }
 0x32b   : > { %v1120_v54 = vpop.xlane.xlu0 %1119  ;;  %v1126_v49 = vpop.xlane.xlu1 %1125 }
 0x32c   : > { %5537 = vpow2.f32 %v1169_v11  ;;  %v1151_v27 = vsub.f32 %v1103_v4, %v1120_v54 }
 0x32e   : > { %v1167_v29 = vmul.f32 1.442695, %v1151_v27  ;;  %v1154_v27 = vsub.f32 %v6557_v7, %v1126_v49 }
 0x32f   : > { %v1124_v62 = vpop.xlane.xlu1 %1123 }
 0x330   : > { %5539 = vpow2.f32 %v1167_v29  ;;  %v1128_v4 = vpop.xlane.xlu0 %1127  ;;  %v1153_v3 = vsub.f32 %v6560_v12, %v1124_v62  ;;  %v1173_v37 = vmul.f32 1.442695, %v1154_v27 }
 0x331   : > { %v1155_v46 = vsub.f32 %v6562_v21, %v1128_v4 }
 0x333   : > { %v1130_v54 = vpop.xlane.xlu1 %1129  ;;  %v1175_v30 = vmul.f32 1.442695, %v1155_v46 }
 0x334   : > { %v1132_v61 = vpop.xlane.xlu0 %1131  ;;  %v1156_v2 = vsub.f32 %v6564_v22, %v1130_v54 }
 0x335   : > { %v1157_v12 = vsub.f32 %v6568_v33, %v1132_v61 }
 0x336   : > { %v6603_v25 = vpop.eup %5537  ;;  %v1177_v50 = vmul.f32 1.442695, %v1156_v2 }
 0x337   : > { %7821 = vst [vmem:[#allocation28_spill] sm:$0xff] %v6603_v25  ;;  %1201 = vadd.xlane.f32.xlu1 %v6603_v25  ;;  %v1134_v29 = vpop.xlane.xlu1 %1133  ;;  %v1179_v22 = vmul.f32 1.442695, %v1157_v12 }
 0x338   : > { %v1136_v25 = vpop.xlane.xlu0 %1135  ;;  %v1158_v52 = vsub.f32 %v6570_v32, %v1134_v29 }
 0x33a   : > { %v6606_v44 = vpop.eup %5539  ;;  %v1181_v62 = vmul.f32 1.442695, %v1158_v52 }
 0x33b   : > { %7822 = vst [vmem:[#allocation29_spill] sm:$0xff] %v6606_v44  ;;  %1199 = vadd.xlane.f32.xlu0 %v6606_v44  ;;  %v1138_v11 = vpop.xlane.xlu1 %1137  ;;  %v1171_v44 = vmul.f32 1.442695, %v1153_v3 }
 0x33c   : > { %v1160_v54 = vsub.f32 %v6576_v36, %v1138_v11 }
 0x33d   : > { %5541 = vpow2.f32 %v1171_v44 }
 0x33e   : > { %5543 = vpow2.f32 %v1173_v37  ;;  %v1159_v37 = vsub.f32 %v6574_v57, %v1136_v25  ;;  %v1185_v46 = vmul.f32 1.442695, %v1160_v54  ;;  %v6713_v54 = vpack.i.bf16 %v6454_v56, %v6456_v58 }
 0x33f   : > { %5545 = vpow2.f32 %v1177_v50  ;;  %v6737_v56 = vpack.i.bf16 %v6486_v20, %v6488_v24  ;;  %v7828_v24 = vld [vmem:[#allocation19_spill] sm:$0xff] }
 0x340   : > { %5547 = vpow2.f32 %v1175_v30  ;;  %v1183_v33 = vmul.f32 1.442695, %v1159_v37 }
 0x341   : > { %5549 = vpow2.f32 %v1181_v62 }
 0x342   : > { %5551 = vpow2.f32 %v1179_v22  ;;  %v6707_v22 = vpack.i.bf16 %v6448_v48, %v6450_v51  ;;  %v6725_v48 = vpack.i.bf16 %v6464_v63, %v6466_v1  ;;  %v6731_v51 = vpack.i.bf16 %v6480_v14, %v6482_v17  ;;  %v7826_v14 = vld [vmem:[#allocation25_spill] sm:$0xff]  ;;  %v7827_v17 = vld [vmem:[#allocation24_spill] sm:$0xff] }
 0x343   : > { %v6745_v1 = vpack.i.bf16 %v6494_v28, %v6496_v38  ;;  %v6753_v20 = vpack.i.bf16 %v7827_v17, %v7826_v14  ;;  %v7829_v28 = vld [vmem:[#allocation18_spill] sm:$0xff] }
 0x347   : > { %v6626_v32 = vpop.eup %5541 }
 0x348   : > { %5323 = vrot.lane.b32.xlu1 %v6403_v13, %s5989_s13  ;;  %v1142_v13 = vpop.xlane.xlu1 %1141  ;;  %v6631_v50 = vpop.eup %5543 }
 0x349   : > { %v6633_v52 = vpop.eup %5545  ;;  %v1162_v36 = vsub.f32 %v6582_v0, %v1142_v13 }
 0x34c   : > { %v1146_v49 = vpop.xlane.xlu1 %1145 }
 0x34d   : > { %v1164_v2 = vsub.f32 %v6588_v18, %v1146_v49 }
 0x34f   : > { %v1193_v30 = vmul.f32 1.442695, %v1164_v2 }
 0x350   : > { %v1150_v18 = vpop.xlane.xlu1 %1149 }
 0x351   : > { %5328 = vrot.lane.b32.xlu0 %v6413_v23, %s5989_s13  ;;  %v1140_v23 = vpop.xlane.xlu0 %1139  ;;  %v1166_v4 = vsub.f32 %v6594_v53, %v1150_v18  ;;  %v7833_v18 = vld [vmem:[#allocation26_spill] sm:$0xff] }
 0x352   : > { %v1161_v7 = vsub.f32 %v6580_v59, %v1140_v23  ;;  %v6638_v59 = vpop.eup %5547 }
 0x353   : > { %v6640_v25 = vpop.eup %5549  ;;  %v1197_v3 = vmul.f32 1.442695, %v1166_v4  ;;  %v7835_v4 = vld [vmem:[#allocation27_spill] sm:$0xff] }
 0x354   : > { %v1187_v21 = vmul.f32 1.442695, %v1161_v7  ;;  %v6645_v29 = vpop.eup %5551 }
 0x355   : > { %v1144_v44 = vpop.xlane.xlu0 %1143 }
 0x356   : > { %5553 = vpow2.f32 %v1187_v21  ;;  %v1163_v23 = vsub.f32 %v6586_v15, %v1144_v44  ;;  %v1189_v15 = vmul.f32 1.442695, %v1162_v36  ;;  %v6719_v21 = vpack.i.bf16 %v6470_v6, %v6472_v10  ;;  %v7825_v6 = vld [vmem:[#allocation17_spill] sm:$0xff]  ;;  %v7830_v44 = vld [vmem:[#allocation30_spill] sm:$0xff] }
 0x357   : > { %5555 = vpow2.f32 %v1185_v46  ;;  %v5306_v37 = vunpack.i.h.bf16 %v7830_v44  ;;  %v5305_v46 = vunpack.i.l.bf16 %v7830_v44 }
 0x358   : > { %v1191_v57 = vmul.f32 1.442695, %v1163_v23  ;;  %5557 = vpow2.f32 %v1193_v30  ;;  %v7831_v23 = vld [vmem:[#allocation29_spill] sm:$0xff] }
 0x359   : > { %5559 = vpow2.f32 %v1183_v33  ;;  %v1148_v61 = vpop.xlane.xlu0 %1147  ;;  %v7832_v33 = vld [vmem:[#allocation28_spill] sm:$0xff] }
 0x35a   : > { %5561 = vpow2.f32 %v1191_v57  ;;  %v1165_v0 = vsub.f32 %v6592_v47, %v1148_v61  ;;  %v4979_v57 = vpack.c.bf16 %v5306_v37, %v5305_v46  ;;  %v5311_v61 = vunpack.i.h.bf16 %v7835_v4 }
 0x35b   : > { %5563 = vpow2.f32 %v1189_v15 }
 0x35c   : > { %v1195_v53 = vmul.f32 1.442695, %v1165_v0  ;;  %5565 = vpow2.f32 %v1197_v3  ;;  %v5310_v0 = vunpack.i.l.bf16 %v7835_v4 }
 0x35d   : > { %v5319_v58 = vpop.permute.xlu0 %5318 }
 0x35e   : > { %5567 = vpow2.f32 %v1195_v53  ;;  %v4985_v3 = vpack.c.bf16 %v5311_v61, %v5310_v0  ;;  %v7836_v53 = vld [vmem:[#allocation31_spill] sm:$0xff]  ;;  %v5321_v17 = vunpack.i.h.bf16 %v5319_v58 }
 0x360   : > { %v6647_v13 = vpop.eup %5553 }
 0x361   : > { %v6652_v11 = vpop.eup %5555 }
 0x362   : > { %v6654_v27 = vpop.eup %5557 }
 0x363   : > { %v6658_v12 = vpop.eup %5559 }
 0x364   : > { %v6660_v62 = vpop.eup %5561 }
 0x365   : > { %v6664_v47 = vpop.eup %5563 }
 0x366   : > { %v6667_v7 = vpop.eup %5565 }
 0x368   : > { %v6670_v49 = vpop.eup %5567 }
 0x36c   : > { %1203 = vadd.xlane.f32.xlu1 %v6626_v32 }
 0x370   : > { %1209 = vadd.xlane.f32.xlu1 %v6633_v52  ;;  %1205 = vadd.xlane.f32.xlu0 %v6631_v50 }
 0x374   : > { %1213 = vadd.xlane.f32.xlu1 %v6640_v25  ;;  %1207 = vadd.xlane.f32.xlu0 %v6638_v59 }
 0x378   : > { %1211 = vadd.xlane.f32.xlu1 %v6645_v29  ;;  %1219 = vadd.xlane.f32.xlu0 %v6647_v13 }
 0x37c   : > { %1217 = vadd.xlane.f32.xlu1 %v6652_v11  ;;  %1225 = vadd.xlane.f32.xlu0 %v6654_v27 }
 0x380   : > { %1215 = vadd.xlane.f32.xlu1 %v6658_v12  ;;  %1223 = vadd.xlane.f32.xlu0 %v6660_v62 }
 0x384   : > { %1221 = vadd.xlane.f32.xlu1 %v6664_v47 }
 0x388   : > { %1229 = vadd.xlane.f32.xlu1 %v6667_v7 }
 0x38c   : > { %1227 = vadd.xlane.f32.xlu1 %v6670_v49 }
 0x396   : > { %5333 = vrot.lane.b32.xlu0 %v6427_v34, %s5989_s13 }
 0x39a   : > { %1408 = vrot.lane.b32.xlu0 %v6360_v45, %s5989_s13 }
 0x39d   : > { %1410 = vrot.lane.b32.xlu1 %v6504_v42, %s5989_s13 }
 0x39e   : > { %1412 = vrot.lane.b32.xlu0 %v6500_v9, %s5989_s13 }
 0x3a1   : > { %1414 = vrot.lane.b32.xlu1 %v6512_v55, %s5989_s13 }
 0x3a2   : > { %1416 = vrot.lane.b32.xlu0 %v6522_v40, %s5989_s13 }
 0x3a5   : > { %1418 = vrot.lane.b32.xlu1 %v6382_v60, %s5989_s13 }
 0x3a6   : > { %1420 = vrot.lane.b32.xlu0 %v6397_v8, %s5989_s13 }
 0x3a9   : > { %1422 = vrot.lane.b32.xlu1 %v6393_v5, %s5989_s13 }
 0x3aa   : > { %1424 = vrot.lane.b32.xlu0 %v6411_v19, %s5989_s13 }
 0x3ad   : > { %1426 = vrot.lane.b32.xlu1 %v6407_v16, %s5989_s13 }
 0x3ae   : > { %1428 = vrot.lane.b32.xlu0 %v6421_v31, %s5989_s13 }
 0x3b1   : > { %1430 = vrot.lane.b32.xlu1 %v6417_v26, %s5989_s13 }
 0x3b2   : > { %1432 = vrot.lane.b32.xlu0 %v6433_v39, %s5989_s13 }
 0x3b5   : > { %1434 = vrot.lane.b32.xlu1 %v6430_v35, %s5989_s13 }
 0x3b6   : > { %1436 = vrot.lane.b32.xlu0 %v6439_v43, %s5989_s13 }
 0x3b9   : > { %1438 = vrot.lane.b32.xlu1 %v6436_v41, %s5989_s13 }
 0x3ba   : > { %5338 = vrot.lane.b32.xlu0 %v6707_v22, %s5989_s13 }
 0x3bd   : > { %5343 = vrot.lane.b32.xlu1 %v6713_v54, %s5989_s13 }
 0x3be   : > { %5353 = vrot.lane.b32.xlu0 %v6719_v21, %s5989_s13 }
 0x3c1   : > { %5348 = vrot.lane.b32.xlu1 %v6725_v48, %s5989_s13 }
 0x3c2   : > { %5358 = vrot.lane.b32.xlu0 %v6731_v51, %s5989_s13 }
 0x3c4   : > { %v1202_v63 = vpop.xlane.xlu1 %1201 }
 0x3c5   : > { %5363 = vrot.lane.b32.xlu1 %v6737_v56, %s5989_s13  ;;  %5569 = vrcp.f32 %v1202_v63  ;;  %v5316_v63 = vunpack.i.h.bf16 %v7836_v53 }
 0x3c6   : > { %5378 = vrot.lane.b32.xlu0 %v7825_v6, %s5990_s20 }
 0x3c8   : > { %v1200_v10 = vpop.xlane.xlu0 %1199  ;;  %v5324_v44 = vpop.permute.xlu1 %5323 }
 0x3c9   : > { %5571 = vrcp.f32 %v1200_v10  ;;  %5368 = vrot.lane.b32.xlu1 %v6745_v1, %s5989_s13  ;;  %v5315_v10 = vunpack.i.l.bf16 %v7836_v53  ;;  %v5326_v37 = vunpack.i.h.bf16 %v5324_v44  ;;  %v5325_v46 = vunpack.i.l.bf16 %v5324_v44 }
 0x3ca   : > { %5388 = vrot.lane.b32.xlu0 %v7828_v24, %s5990_s20 }
 0x3cb   : > { %v4991_v14 = vpack.c.bf16 %v5316_v63, %v5315_v10 }
 0x3cd   : > { %5373 = vrot.lane.b32.xlu1 %v6753_v20, %s5989_s13 }
 0x3cf   : > { %v5570_v38 = vpop.eup %5569 }
 0x3d0   : > { %v1234_v36 = vmul.f32 %v5570_v38, %v7832_v33  ;;  %v5320_v38 = vunpack.i.l.bf16 %v5319_v58 }
 0x3d1   : > { %5383 = vrot.lane.b32.xlu1 %v7829_v28, %s5990_s20 }
 0x3d3   : > { %v5572_v2 = vpop.eup %5571 }
 0x3d4   : > { %v1232_v30 = vmul.f32 %v5572_v2, %v7831_v23  ;;  %v4997_v2 = vpack.c.bf16 %v5321_v17, %v5320_v38  ;;  %v5003_v23 = vpack.c.bf16 %v5326_v37, %v5325_v46 }
 0x3d6   : > { %4437 = vmatprep.mubr.f32.mxu0 %v1232_v30  ;;  %v5329_v30 = vpop.permute.xlu0 %5328 }
 0x3d7   : > { %4438 = vmatmul.mubr.f32.vlgmr.msra.gmra.mrb[32].mxu0 %v1234_v36  ;;  %v5331_v58 = vunpack.i.h.bf16 %v5329_v30  ;;  %v5330_v36 = vunpack.i.l.bf16 %v5329_v30 }
 0x3d8   : > { %4978 = vmatpush3.bf16.xpose.msk.msra.mxu0 %vm6330_vm1, %v7833_v18 }
 0x3d9   : > { %4981 = vmatprep.subr.msk.bf16.mxu0 %vm6330_vm1, %v4979_v57  ;;  %v5009_v4 = vpack.c.bf16 %v5331_v58, %v5330_v36 }
 0x3e0   : > { %4984 = vmatpush3.bf16.xpose.msk.msra.mxu0 %vm6330_vm1, %v4979_v57 }
 0x3e1   : > { %4987 = vmatprep.subr.msk.bf16.mxu0 %vm6330_vm1, %v4985_v3 }
 0x3e8   : > { %4990 = vmatpush3.bf16.xpose.msk.msra.mxu0 %vm6330_vm1, %v4985_v3 }
 0x3e9   : > { %4993 = vmatprep.subr.msk.bf16.mxu0 %vm6330_vm1, %v4991_v14 }
 0x3f0   : > { %4996 = vmatpush3.bf16.xpose.msk.msra.mxu0 %vm6330_vm1, %v4991_v14 }
 0x3f1   : > { %4999 = vmatprep.subr.msk.bf16.mxu0 %vm6330_vm1, %v4997_v2 }
 0x3f8   : > { %5002 = vmatpush3.bf16.xpose.msk.msra.mxu0 %vm6330_vm1, %v4997_v2 }
 0x3f9   : > { %5005 = vmatprep.subr.msk.bf16.mxu0 %vm6330_vm1, %v5003_v23  ;;  %v1204_v33 = vpop.xlane.xlu1 %1203 }
 0x3fa   : > { %5573 = vrcp.f32 %v1204_v33 }
 0x3fd   : > { %v1210_v57 = vpop.xlane.xlu1 %1209  ;;  %v1206_v18 = vpop.xlane.xlu0 %1205 }
 0x3fe   : > { %5575 = vrcp.f32 %v1206_v18 }
 0x3ff   : > { %5577 = vrcp.f32 %v1210_v57 }
 0x400   : > { %5008 = vmatpush3.bf16.xpose.msk.msra.mxu0 %vm6330_vm1, %v5003_v23 }
 0x401   : > { %5011 = vmatprep.subr.msk.bf16.mxu0 %vm6330_vm1, %v5009_v4  ;;  %v1214_v61 = vpop.xlane.xlu1 %1213  ;;  %v1208_v0 = vpop.xlane.xlu0 %1207 }
 0x402   : > { %5579 = vrcp.f32 %v1208_v0 }
 0x403   : > { %5581 = vrcp.f32 %v1214_v61 }
 0x404   : > { %v5574_v3 = vpop.eup %5573 }
 0x405   : > { %v1212_v53 = vpop.xlane.xlu1 %1211  ;;  %v1220_v63 = vpop.xlane.xlu0 %1219  ;;  %v1236_v10 = vmul.f32 %v5574_v3, %v6626_v32 }
 0x406   : > { %5583 = vrcp.f32 %v1212_v53 }
 0x407   : > { %4440 = vmatprep.mubr.f32.mxu0 %v1236_v10  ;;  %5585 = vrcp.f32 %v1220_v63 }
 0x408   : > { %5014 = vmatpush3.bf16.xpose.msk.msra.mxu0 %vm6330_vm1, %v5009_v4  ;;  %v5576_v14 = vpop.eup %5575 }
 0x409   : > { %v1218_v17 = vpop.xlane.xlu1 %1217  ;;  %v1226_v38 = vpop.xlane.xlu0 %1225  ;;  %v1238_v2 = vmul.f32 %v5576_v14, %v6631_v50 }
 0x40a   : > { %v5578_v44 = vpop.eup %5577  ;;  %5587 = vrcp.f32 %v1218_v17 }
 0x40b   : > { %4441 = vmatmul.mubr.f32.gmra.mrb[34].mxu0 %v1238_v2  ;;  %v1242_v33 = vmul.f32 %v5578_v44, %v6633_v52 }
 0x40c   : > { %v5580_v37 = vpop.eup %5579 }
 0x40d   : > { %v1216_v46 = vpop.xlane.xlu1 %1215  ;;  %v1224_v23 = vpop.xlane.xlu0 %1223  ;;  %v1240_v32 = vmul.f32 %v5580_v37, %v6638_v59 }
 0x40e   : > { %5589 = vrcp.f32 %v1216_v46  ;;  %v5582_v30 = vpop.eup %5581 }
 0x40f   : > { %4443 = vmatprep.mubr.f32.mxu0 %v1240_v32  ;;  %5591 = vrcp.f32 %v1224_v23  ;;  %v1246_v61 = vmul.f32 %v5582_v30, %v6640_v25 }
 0x410   : > { %v5584_v58 = vpop.eup %5583  ;;  %4444 = vmatmul.mubr.f32.gmra.mrb[36].mxu0 %v1242_v33 }
 0x411   : > { %v1222_v36 = vpop.xlane.xlu1 %1221  ;;  %v5334_v57 = vpop.permute.xlu0 %5333  ;;  %v1244_v50 = vmul.f32 %v5584_v58, %v6645_v29 }
 0x412   : > { %5593 = vrcp.f32 %v1222_v36  ;;  %v5336_v18 = vunpack.i.h.bf16 %v5334_v57  ;;  %v5335_v4 = vunpack.i.l.bf16 %v5334_v57  ;;  %v5586_v52 = vpop.eup %5585 }
 0x413   : > { %4446 = vmatprep.mubr.f32.mxu0 %v1244_v50  ;;  %5595 = vrcp.f32 %v1226_v38  ;;  %v1252_v38 = vmul.f32 %v5586_v52, %v6647_v13 }
 0x414   : > { %v5015_v0 = vpack.c.bf16 %v5336_v18, %v5335_v4  ;;  %4447 = vmatmul.mubr.f32.gmra.mrb[38].mxu0 %v1246_v61  ;;  %v5588_v53 = vpop.eup %5587 }
 0x415   : > { %v1230_v59 = vpop.xlane.xlu1 %1229  ;;  %v1409_v3 = vpop.permute.xlu0 %1408  ;;  %v1250_v25 = vmul.f32 %v5588_v53, %v6652_v11 }
 0x416   : > { %5017 = vmatprep.subr.msk.bf16.mxu0 %vm6330_vm1, %v5015_v0  ;;  %5597 = vrcp.f32 %v1230_v59 }
 0x417   : > { %5020 = vmatpush3.bf16.xpose.msk.msra.mxu0 %vm6330_vm1, %v5015_v0 }
 0x418   : > { %v5590_v29 = vpop.eup %5589 }
 0x419   : > { %v1228_v63 = vpop.xlane.xlu1 %1227  ;;  %v1413_v10 = vpop.permute.xlu0 %1412  ;;  %v1248_v14 = vmul.f32 %v5590_v29, %v6658_v12 }
 0x41a   : > { %5599 = vrcp.f32 %v1228_v63  ;;  %v5592_v17 = vpop.eup %5591 }
 0x41b   : > { %4449 = vmatprep.mubr.f32.mxu0 %v1248_v14  ;;  %v1256_v32 = vmul.f32 %v5592_v17, %v6660_v62 }
 0x41c   : > { %v5594_v2 = vpop.eup %5593  ;;  %4450 = vmatmul.mubr.f32.gmra.mrb[40].mxu0 %v1250_v25 }
 0x41d   : > { %v1411_v44 = vpop.permute.xlu1 %1410  ;;  %4452 = vmatprep.mubr.f32.mxu0 %v1252_v38  ;;  %v1417_v37 = vpop.permute.xlu0 %1416  ;;  %v1254_v46 = vmul.f32 %v5594_v2, %v6664_v47 }
 0x41e   : > { %v5596_v23 = vpop.eup %5595 }
 0x41f   : > { %v1258_v11 = vmul.f32 %v5596_v23, %v6654_v27 }
 0x420   : > { %4453 = vmatmul.mubr.f32.gmra.mrb[42].mxu0 %v1254_v46  ;;  %v5598_v33 = vpop.eup %5597 }
 0x421   : > { %v1415_v30 = vpop.permute.xlu1 %1414  ;;  %4455 = vmatprep.mubr.f32.mxu0 %v1256_v32  ;;  %v1421_v12 = vpop.permute.xlu0 %1420  ;;  %v1262_v50 = vmul.f32 %v5598_v33, %v6667_v7 }
 0x424   : > { %v5600_v58 = vpop.eup %5599  ;;  %4456 = vmatmul.mubr.f32.gmra.mrb[44].mxu0 %v1258_v11 }
 0x425   : > { %v1419_v13 = vpop.permute.xlu1 %1418  ;;  %v1425_v36 = vpop.permute.xlu0 %1424  ;;  %v1260_v57 = vmul.f32 %v5600_v58, %v6670_v49 }
 0x427   : > { %4458 = vmatprep.mubr.f32.mxu0 %v1260_v57 }
 0x428   : > { %4459 = vmatmul.mubr.f32.gmra.mrb[46].mxu0 %v1262_v50 }
 0x429   : > { %v1423_v47 = vpop.permute.xlu1 %1422  ;;  %4493 = vmatprep.mubr.msk.f32.mxu0 %vm861_vm0, %v1409_v3  ;;  %v1429_v62 = vpop.permute.xlu0 %1428 }
 0x42c   : > { %4494 = vmatmul.mubr.msk.f32.vlgmr.msra.gmra.mrb[48].mxu0 %vm861_vm0, %v1411_v44 }
 0x42d   : > { %v1427_v18 = vpop.permute.xlu1 %1426  ;;  %v1433_v4 = vpop.permute.xlu0 %1432  ;;  %4496 = vmatprep.mubr.msk.f32.mxu0 %vm861_vm0, %v1413_v10 }
 0x430   : > { %4497 = vmatmul.mubr.msk.f32.gmra.mrb[50].mxu0 %vm861_vm0, %v1415_v30 }
 0x431   : > { %v1431_v27 = vpop.permute.xlu1 %1430  ;;  %v1437_v61 = vpop.permute.xlu0 %1436  ;;  %4499 = vmatprep.mubr.msk.f32.mxu0 %vm861_vm0, %v1417_v37 }
 0x434   : > { %4500 = vmatmul.mubr.msk.f32.gmra.mrb[52].mxu0 %vm861_vm0, %v1419_v13 }
 0x435   : > { %v1435_v7 = vpop.permute.xlu1 %1434  ;;  %v5339_v49 = vpop.permute.xlu0 %5338  ;;  %4502 = vmatprep.mubr.msk.f32.mxu0 %vm861_vm0, %v1421_v12 }
 0x436   : > { %v5341_v0 = vunpack.i.h.bf16 %v5339_v49  ;;  %v5340_v59 = vunpack.i.l.bf16 %v5339_v49 }
 0x438   : > { %4503 = vmatmul.mubr.msk.f32.gmra.mrb[54].mxu0 %vm861_vm0, %v1423_v47  ;;  %v5021_v3 = vpack.c.bf16 %v5341_v0, %v5340_v59 }
 0x439   : > { %v1439_v52 = vpop.permute.xlu1 %1438  ;;  %4505 = vmatprep.mubr.msk.f32.mxu0 %vm861_vm0, %v1425_v36  ;;  %v5354_v53 = vpop.permute.xlu0 %5353 }
 0x43a   : > { %5022 = vmatprep.subr.bf16.mxu1 %v5021_v3  ;;  %v5356_v14 = vunpack.i.h.bf16 %v5354_v53  ;;  %v5355_v25 = vunpack.i.l.bf16 %v5354_v53 }
 0x43b   : > { %5024 = vmatpush3.bf16.msra.mxu1 %v5021_v3 }
 0x43c   : > { %4506 = vmatmul.mubr.msk.f32.gmra.mrb[56].mxu0 %vm861_vm0, %v1427_v18  ;;  %v5033_v30 = vpack.c.bf16 %v5356_v14, %v5355_v25 }
 0x43d   : > { %v5344_v29 = vpop.permute.xlu1 %5343  ;;  %4508 = vmatprep.mubr.msk.f32.mxu0 %vm861_vm0, %v1429_v62  ;;  %v5359_v37 = vpop.permute.xlu0 %5358 }
 0x43e   : > { %v5346_v63 = vunpack.i.h.bf16 %v5344_v29  ;;  %v5345_v10 = vunpack.i.l.bf16 %v5344_v29  ;;  %v5361_v46 = vunpack.i.h.bf16 %v5359_v37  ;;  %v5360_v23 = vunpack.i.l.bf16 %v5359_v37 }
 0x440   : > { %4509 = vmatmul.mubr.msk.f32.gmra.mrb[58].mxu0 %vm861_vm0, %v1431_v27  ;;  %v5025_v17 = vpack.c.bf16 %v5346_v63, %v5345_v10  ;;  %v5037_v58 = vpack.c.bf16 %v5361_v46, %v5360_v23 }
 0x441   : > { %v5349_v38 = vpop.permute.xlu1 %5348  ;;  %4511 = vmatprep.mubr.msk.f32.mxu0 %vm861_vm0, %v1433_v4  ;;  %v5379_v27 = vpop.permute.xlu0 %5378 }
 0x442   : > { %v5351_v2 = vunpack.i.h.bf16 %v5349_v38  ;;  %v5350_v44 = vunpack.i.l.bf16 %v5349_v38  ;;  %5026 = vmatprep.subr.bf16.mxu1 %v5025_v17  ;;  %v5380_v49 = vunpack.i.l.bf16 %v5379_v27 }
 0x443   : > { %5028 = vmatpush3.bf16.msra.mxu1 %v5025_v17 }
 0x444   : > { %4512 = vmatmul.mubr.msk.f32.gmra.mrb[60].mxu0 %vm861_vm0, %v1435_v7  ;;  %v5029_v32 = vpack.c.bf16 %v5351_v2, %v5350_v44  ;;  %v5381_v7 = vunpack.i.h.bf16 %v5379_v27 }
 0x445   : > { %v5364_v12 = vpop.permute.xlu1 %5363  ;;  %4514 = vmatprep.mubr.msk.f32.mxu0 %vm861_vm0, %v1437_v61 }
 0x446   : > { %5030 = vmatprep.subr.bf16.mxu1 %v5029_v32  ;;  %v5366_v11 = vunpack.i.h.bf16 %v5364_v12  ;;  %v5365_v33 = vunpack.i.l.bf16 %v5364_v12  ;;  %v6830_v0 = vpack.c.bf16 %v5381_v7, %v5380_v49  ;;  %v7854_v7 = vld [vmem:[#allocation20_spill] sm:$0xff] }
 0x447   : > { %5032 = vmatpush3.bf16.msra.mxu1 %v5029_v32 }
 0x448   : > { %4515 = vmatmul.mubr.msk.f32.gmra.mrb[62].mxu0 %vm861_vm0, %v1439_v52  ;;  %5034 = vmatprep.subr.bf16.mxu1 %v5033_v30  ;;  %v5041_v50 = vpack.c.bf16 %v5366_v11, %v5365_v33  ;;  %7837 = vst [vmem:[#allocation17_spill] sm:$0xff] %v6830_v0 }
 0x449   : > { %v5369_v13 = vpop.permute.xlu1 %5368 }
 0x44a   : > { %v5371_v36 = vunpack.i.h.bf16 %v5369_v13  ;;  %v5370_v57 = vunpack.i.l.bf16 %v5369_v13 }
 0x44b   : > { %5036 = vmatpush3.bf16.msra.mxu1 %v5033_v30 }
 0x44c   : > { %5038 = vmatprep.subr.bf16.mxu1 %v5037_v58  ;;  %v5045_v4 = vpack.c.bf16 %v5371_v36, %v5370_v57 }
 0x44d   : > { %v5374_v47 = vpop.permute.xlu1 %5373 }
 0x44e   : > { %v5376_v62 = vunpack.i.h.bf16 %v5374_v47  ;;  %v5375_v18 = vunpack.i.l.bf16 %v5374_v47 }
 0x44f   : > { %5040 = vmatpush3.bf16.msra.mxu1 %v5037_v58 }
 0x450   : > { %5042 = vmatprep.subr.bf16.mxu1 %v5041_v50  ;;  %v5049_v61 = vpack.c.bf16 %v5376_v62, %v5375_v18 }
 0x453   : > { %5044 = vmatpush3.bf16.msra.mxu1 %v5041_v50 }
 0x454   : > { %5046 = vmatprep.subr.bf16.mxu1 %v5045_v4 }
 0x457   : > { %5048 = vmatpush3.bf16.msra.mxu1 %v5045_v4 }
 0x458   : > { %5050 = vmatprep.subr.bf16.mxu1 %v5049_v61 }
 0x45b   : > { %5052 = vmatpush3.bf16.msra.mxu1 %v5049_v61 }
 0x45c   : > { %5055 = vmatprep.subr.msk.bf16.mxu1 %vm6330_vm1, %v6830_v0 }
 0x4aa   : > { %v6835_v59 = vpop.f32.mrb[32].mxu0 }
 0x4ab   : > { %7838 = vst [vmem:[#allocation25_spill] sm:$0xff] %v6835_v59  ;;  %v6837_v3 = vpop.f32.mrb[33].mxu0 }
 0x4ac   : > { %7839 = vst [vmem:[#allocation24_spill] sm:$0xff] %v6837_v3 }
 0x4de   : > { %v6839_v52 = vpop.f32.mrb[34].mxu0 }
 0x4df   : > { %7840 = vst [vmem:[#allocation19_spill] sm:$0xff] %v6839_v52  ;;  %v6841_v53 = vpop.f32.mrb[35].mxu0 }
 0x4e0   : > { %7841 = vst [vmem:[#allocation18_spill] sm:$0xff] %v6841_v53 }
 0x4e3   : > { %v6843_v29 = vpop.f32.mrb[36].mxu0 }
 0x4e4   : > { %7842 = vst [vmem:[#allocation30_spill] sm:$0xff] %v6843_v29  ;;  %v6845_v63 = vpop.f32.mrb[37].mxu0  ;;  %v7857_v29 = vld [vmem:[#allocation22_spill] sm:$0xff] }
 0x4e5   : > { %7843 = vst [vmem:[#allocation29_spill] sm:$0xff] %v6845_v63 }
 0x4e7   : > { %v6847_v10 = vpop.f32.mrb[38].mxu0 }
 0x4e8   : > { %7844 = vst [vmem:[#allocation28_spill] sm:$0xff] %v6847_v10  ;;  %v6849_v14 = vpop.f32.mrb[39].mxu0  ;;  %v7855_v10 = vld [vmem:[#allocation21_spill] sm:$0xff] }
 0x4e9   : > { %7845 = vst [vmem:[#allocation26_spill] sm:$0xff] %v6849_v14 }
 0x4ef   : > { %v6851_v25 = vpop.f32.mrb[40].mxu0 }
 0x4f0   : > { %7846 = vst [vmem:[#allocation27_spill] sm:$0xff] %v6851_v25  ;;  %v6853_v17 = vpop.f32.mrb[41].mxu0 }
 0x4f1   : > { %7847 = vst [vmem:[#allocation31_spill] sm:$0xff] %v6853_v17 }
 0x4f3   : > { %v6855_v38 = vpop.f32.mrb[42].mxu0 }
 0x4f4   : > { %7848 = vst [vmem:[#allocation32_spill] sm:$0xff] %v6855_v38  ;;  %v6857_v2 = vpop.f32.mrb[43].mxu0 }
 0x4f5   : > { %7849 = vst [vmem:[#allocation33_spill] sm:$0xff] %v6857_v2 }
 0x4f7   : > { %v6859_v44 = vpop.f32.mrb[44].mxu0 }
 0x4f8   : > { %7850 = vst [vmem:[#allocation34_spill] sm:$0xff] %v6859_v44  ;;  %v6861_v37 = vpop.f32.mrb[45].mxu0 }
 0x4f9   : > { %7851 = vst [vmem:[#allocation35_spill] sm:$0xff] %v6861_v37 }
 0x4fb   : > { %v6863_v46 = vpop.f32.mrb[46].mxu0 }
 0x4fc   : > { %7852 = vst [vmem:[#allocation36_spill] sm:$0xff] %v6863_v46  ;;  %v6865_v23 = vpop.f32.mrb[47].mxu0 }
 0x4fd   : > { %7853 = vst [vmem:[#allocation37_spill] sm:$0xff] %v6865_v23 }
 0x4ff   : > { %v4495_v32 = vpop.f32.mrb[48].mxu0 }
 0x500   : > { %v1682_v30 = vmul.f32 0.17677669, %v4495_v32  ;;  %v1602_v12 = vpop.f32.mrb[49].mxu0 }
 0x501   : > { %v1681_v11 = vmul.f32 0.17677669, %v1602_v12 }
 0x502   : > { %1699 = vmax.xlane.f32.xlu1 %v1682_v30 }
 0x503   : > { %1697 = vmax.xlane.f32.xlu0 %v1681_v11  ;;  %v4498_v33 = vpop.f32.mrb[50].mxu0 }
 0x504   : > { %v6867_v58 = vmul.f32 0.17677669, %v4498_v33  ;;  %v1612_v13 = vpop.f32.mrb[51].mxu0 }
 0x505   : > { %v6870_v50 = vmul.f32 0.17677669, %v1612_v13 }
 0x507   : > { %1703 = vmax.xlane.f32.xlu0 %v6867_v58  ;;  %v4501_v36 = vpop.f32.mrb[52].mxu0 }
 0x508   : > { %v1622_v57 = vpop.f32.mrb[53].mxu0 }
 0x509   : > { %v6873_v18 = vmul.f32 0.17677669, %v1622_v57 }
 0x50b   : > { %1701 = vmax.xlane.f32.xlu0 %v6870_v50  ;;  %v4504_v47 = vpop.f32.mrb[54].mxu0 }
 0x50c   : > { %v1632_v62 = vpop.f32.mrb[55].mxu0  ;;  %v1688_v25 = vmul.f32 0.17677669, %v4504_v47  ;;  %v6906_v47 = vpop.permute.xlu0 %5388 }
 0x50d   : > { %v6876_v61 = vmul.f32 0.17677669, %v1632_v62  ;;  %7856 = vst [vmem:[#allocation20_spill] sm:$0xff] %v6906_v47 }
 0x50f   : > { %1705 = vmax.xlane.f32.xlu0 %v6873_v18  ;;  %v4507_v4 = vpop.f32.mrb[56].mxu0 }
 0x510   : > { %v1642_v27 = vpop.f32.mrb[57].mxu0 }
 0x511   : > { %v6881_v12 = vmul.f32 0.17677669, %v1642_v27  ;;  %v1686_v27 = vmul.f32 0.17677669, %v4501_v36  ;;  %v6904_v36 = vpop.permute.xlu1 %5383 }
 0x513   : > { %5393 = vrot.lane.b32.xlu1 %v7854_v7, %s5990_s20  ;;  %1709 = vmax.xlane.f32.xlu0 %v6876_v61  ;;  %v4510_v49 = vpop.f32.mrb[58].mxu0 }
 0x514   : > { %v1652_v32 = vpop.f32.mrb[59].mxu0  ;;  %v6895_v53 = vmul.f32 0.17677669, %v4510_v49 }
 0x515   : > { %v6884_v57 = vmul.f32 0.17677669, %v1652_v32  ;;  %v1690_v32 = vmul.f32 0.17677669, %v4507_v4 }
 0x517   : > { %1713 = vmax.xlane.f32.xlu0 %v6881_v12  ;;  %v4513_v33 = vpop.f32.mrb[60].mxu0 }
 0x518   : > { %v1662_v13 = vpop.f32.mrb[61].mxu0 }
 0x519   : > { %v6887_v38 = vmul.f32 0.17677669, %v1662_v13  ;;  %v6898_v13 = vmul.f32 0.17677669, %v4513_v33 }
 0x51b   : > { %1717 = vmax.xlane.f32.xlu0 %v6884_v57  ;;  %v4516_v2 = vpop.f32.mrb[62].mxu0 }
 0x51c   : > { %v1672_v62 = vpop.f32.mrb[63].mxu0 }
 0x51d   : > { %v6890_v17 = vmul.f32 0.17677669, %v1672_v62  ;;  %v6901_v62 = vmul.f32 0.17677669, %v4516_v2 }
 0x51f   : > { %1721 = vmax.xlane.f32.xlu0 %v6887_v38 }
 0x523   : > { %1725 = vmax.xlane.f32.xlu0 %v6890_v17 }
 0x537   : > { %1707 = vmax.xlane.f32.xlu1 %v1686_v27 }
 0x539   : > { %5398 = vrot.lane.b32.xlu0 %v7855_v10, %s5990_s20 }
 0x53b   : > { %1711 = vmax.xlane.f32.xlu1 %v1688_v25 }
 0x53f   : > { %1715 = vmax.xlane.f32.xlu1 %v1690_v32 }
 0x543   : > { %1719 = vmax.xlane.f32.xlu1 %v6895_v53 }
 0x547   : > { %1723 = vmax.xlane.f32.xlu1 %v6898_v13 }
 0x54b   : > { %1727 = vmax.xlane.f32.xlu1 %v6901_v62 }
 0x58f   : > { %v1700_v46 = vpop.xlane.xlu1 %1699 }
 0x590   : > { %v1730_v44 = vsub.f32 %v1682_v30, %v1700_v46  ;;  %v1698_v4 = vpop.xlane.xlu0 %1697  ;;  %v7858_v46 = vld [vmem:[#allocation23_spill] sm:$0xff] }
 0x591   : > { %v1729_v23 = vsub.f32 %v1681_v11, %v1698_v4 }
 0x592   : > { %v1747_v49 = vmul.f32 1.442695, %v1730_v44 }
 0x593   : > { %v1745_v37 = vmul.f32 1.442695, %v1729_v23  ;;  %v6918_v30 = vpop.permute.xlu1 %5393 }
 0x594   : > { %5601 = vpow2.f32 %v1747_v49  ;;  %v1704_v2 = vpop.xlane.xlu0 %1703  ;;  %7859 = vst [vmem:[#allocation38_spill] sm:$0xff] %v6918_v30 }
 0x595   : > { %5603 = vpow2.f32 %v1745_v37  ;;  %v1732_v11 = vsub.f32 %v6867_v58, %v1704_v2 }
 0x597   : > { %v1751_v3 = vmul.f32 1.442695, %v1732_v11 }
 0x598   : > { %v1702_v63 = vpop.xlane.xlu0 %1701 }
 0x599   : > { %v1731_v37 = vsub.f32 %v6870_v50, %v1702_v63 }
 0x59b   : > { %v1749_v52 = vmul.f32 1.442695, %v1731_v37 }
 0x59c   : > { %v1706_v44 = vpop.xlane.xlu0 %1705 }
 0x59d   : > { %5605 = vpow2.f32 %v1749_v52 }
 0x59e   : > { %v6908_v33 = vpop.eup %5601  ;;  %5607 = vpow2.f32 %v1751_v3 }
 0x59f   : > { %v6910_v14 = vpop.eup %5603  ;;  %1779 = vadd.xlane.f32.xlu0 %v6908_v33 }
 0x5a0   : > { %1777 = vadd.xlane.f32.xlu1 %v6910_v14  ;;  %v1710_v23 = vpop.xlane.xlu0 %1709 }
 0x5a4   : > { %v1714_v4 = vpop.xlane.xlu0 %1713 }
 0x5a5   : > { %v1737_v52 = vsub.f32 %v6881_v12, %v1714_v4 }
 0x5a8   : > { %v1718_v0 = vpop.xlane.xlu0 %1717 }
 0x5a9   : > { %v1739_v58 = vsub.f32 %v6884_v57, %v1718_v0  ;;  %v1761_v57 = vmul.f32 1.442695, %v1737_v52 }
 0x5b1   : > { %5403 = vrot.lane.b32.xlu1 %v7857_v29, %s5990_s20  ;;  %v1733_v29 = vsub.f32 %v6873_v18, %v1706_v44  ;;  %v6926_v18 = vpop.eup %5605 }
 0x5b3   : > { %v1753_v50 = vmul.f32 1.442695, %v1733_v29 }
 0x5b5   : > { %5408 = vrot.lane.b32.xlu0 %v7858_v46, %s5990_s20  ;;  %v1735_v46 = vsub.f32 %v6876_v61, %v1710_v23  ;;  %v6928_v61 = vpop.eup %5607 }
 0x5b7   : > { %v1757_v2 = vmul.f32 1.442695, %v1735_v46 }
 0x5c4   : > { %v1708_v49 = vpop.xlane.xlu1 %1707 }
 0x5c5   : > { %v1734_v59 = vsub.f32 %v1686_v27, %v1708_v49 }
 0x5c7   : > { %v1755_v10 = vmul.f32 1.442695, %v1734_v59  ;;  %v1765_v59 = vmul.f32 1.442695, %v1739_v58 }
 0x5c8   : > { %v1712_v47 = vpop.xlane.xlu1 %1711 }
 0x5c9   : > { %v1736_v15 = vsub.f32 %v1688_v25, %v1712_v47  ;;  %5609 = vpow2.f32 %v1755_v10  ;;  %v1722_v25 = vpop.xlane.xlu0 %1721 }
 0x5ca   : > { %v1741_v0 = vsub.f32 %v6887_v38, %v1722_v25 }
 0x5cb   : > { %v1759_v30 = vmul.f32 1.442695, %v1736_v15 }
 0x5cc   : > { %v1716_v63 = vpop.xlane.xlu1 %1715  ;;  %v1769_v44 = vmul.f32 1.442695, %v1741_v0  ;;  %v5386_v0 = vunpack.i.h.bf16 %v6904_v36 }
 0x5cd   : > { %5611 = vpow2.f32 %v1759_v30  ;;  %v1738_v27 = vsub.f32 %v1690_v32, %v1716_v63  ;;  %v1726_v30 = vpop.xlane.xlu0 %1725 }
 0x5ce   : > { %5613 = vpow2.f32 %v1753_v50 }
 0x5cf   : > { %5615 = vpow2.f32 %v1757_v2  ;;  %v1763_v3 = vmul.f32 1.442695, %v1738_v27 }
 0x5d0   : > { %v1720_v37 = vpop.xlane.xlu1 %1719  ;;  %5617 = vpow2.f32 %v1765_v59 }
 0x5d1   : > { %5619 = vpow2.f32 %v1763_v3  ;;  %v1740_v12 = vsub.f32 %v6895_v53, %v1720_v37  ;;  %v1743_v53 = vsub.f32 %v6890_v17, %v1726_v30  ;;  %v5399_v59 = vpop.permute.xlu0 %5398 }
 0x5d2   : > { %v5400_v30 = vunpack.i.l.bf16 %v5399_v59 }
 0x5d3   : > { %v6934_v10 = vpop.eup %5609  ;;  %v1767_v38 = vmul.f32 1.442695, %v1740_v12  ;;  %v7860_v12 = vld [vmem:[#allocation17_spill] sm:$0xff] }
 0x5d4   : > { %v1724_v15 = vpop.xlane.xlu1 %1723  ;;  %1781 = vadd.xlane.f32.xlu0 %v6926_v18 }
 0x5d5   : > { %v1742_v29 = vsub.f32 %v6898_v13, %v1724_v15  ;;  %1783 = vadd.xlane.f32.xlu1 %v6928_v61 }
 0x5d7   : > { %v6937_v32 = vpop.eup %5611  ;;  %v1771_v47 = vmul.f32 1.442695, %v1742_v29  ;;  %v5385_v29 = vunpack.i.l.bf16 %v6904_v36 }
 0x5d8   : > { %v1728_v46 = vpop.xlane.xlu1 %1727  ;;  %1787 = vadd.xlane.f32.xlu0 %v6934_v10  ;;  %v6942_v23 = vpop.eup %5613 }
 0x5d9   : > { %5621 = vpow2.f32 %v1771_v47  ;;  %1791 = vadd.xlane.f32.xlu1 %v6937_v32  ;;  %v1744_v13 = vsub.f32 %v6901_v62, %v1728_v46  ;;  %v6944_v11 = vpop.eup %5615  ;;  %v1773_v62 = vmul.f32 1.442695, %v1743_v53 }
 0x5da   : > { %5623 = vpow2.f32 %v1761_v57  ;;  %v6949_v49 = vpop.eup %5617 }
 0x5db   : > { %5625 = vpow2.f32 %v1769_v44  ;;  %v1775_v4 = vmul.f32 1.442695, %v1744_v13  ;;  %v6951_v63 = vpop.eup %5619  ;;  %v5401_v13 = vunpack.i.h.bf16 %v5399_v59 }
 0x5dc   : > { %1785 = vadd.xlane.f32.xlu0 %v6942_v23  ;;  %5627 = vpow2.f32 %v1767_v38 }
 0x5dd   : > { %1789 = vadd.xlane.f32.xlu1 %v6944_v11  ;;  %5629 = vpow2.f32 %v1775_v4  ;;  %v5077_v53 = vpack.c.bf16 %v5401_v13, %v5400_v30 }
 0x5de   : > { %5631 = vpow2.f32 %v1773_v62 }
 0x5e0   : > { %1797 = vadd.xlane.f32.xlu0 %v6949_v49 }
 0x5e1   : > { %1795 = vadd.xlane.f32.xlu1 %v6951_v63 }
 0x5e3   : > { %v6955_v50 = vpop.eup %5621 }
 0x5e4   : > { %v6957_v58 = vpop.eup %5623  ;;  %1803 = vadd.xlane.f32.xlu0 %v6955_v50 }
 0x5e5   : > { %1793 = vadd.xlane.f32.xlu1 %v6957_v58  ;;  %v6961_v17 = vpop.eup %5625 }
 0x5e6   : > { %v6963_v2 = vpop.eup %5627 }
 0x5e7   : > { %v6967_v27 = vpop.eup %5629 }
 0x5e8   : > { %1801 = vadd.xlane.f32.xlu0 %v6961_v17  ;;  %v6970_v37 = vpop.eup %5631 }
 0x5e9   : > { %1799 = vadd.xlane.f32.xlu1 %v6963_v2 }
 0x5ed   : > { %1807 = vadd.xlane.f32.xlu1 %v6967_v27 }
 0x5f1   : > { %1805 = vadd.xlane.f32.xlu1 %v6970_v37 }
 0x5fe   : > { %5413 = vrot.lane.b32.xlu0 %v6427_v34, %s5990_s20 }
 0x602   : > { %2050 = vrot.lane.b32.xlu0 %v6360_v45, %s5990_s20  ;;  %2052 = vrot.lane.b32.xlu1 %v6504_v42, %s5990_s20 }
 0x606   : > { %2054 = vrot.lane.b32.xlu0 %v6500_v9, %s5990_s20  ;;  %2056 = vrot.lane.b32.xlu1 %v6512_v55, %s5990_s20 }
 0x60a   : > { %2058 = vrot.lane.b32.xlu0 %v6522_v40, %s5990_s20  ;;  %2060 = vrot.lane.b32.xlu1 %v6382_v60, %s5990_s20 }
 0x60e   : > { %2062 = vrot.lane.b32.xlu0 %v6397_v8, %s5990_s20  ;;  %2064 = vrot.lane.b32.xlu1 %v6393_v5, %s5990_s20 }
 0x612   : > { %2066 = vrot.lane.b32.xlu0 %v6411_v19, %s5990_s20  ;;  %2068 = vrot.lane.b32.xlu1 %v6407_v16, %s5990_s20 }
 0x616   : > { %2070 = vrot.lane.b32.xlu0 %v6421_v31, %s5990_s20  ;;  %2072 = vrot.lane.b32.xlu1 %v6417_v26, %s5990_s20 }
 0x61a   : > { %2074 = vrot.lane.b32.xlu0 %v6433_v39, %s5990_s20  ;;  %2076 = vrot.lane.b32.xlu1 %v6430_v35, %s5990_s20 }
 0x61e   : > { %2078 = vrot.lane.b32.xlu0 %v6439_v43, %s5990_s20  ;;  %2080 = vrot.lane.b32.xlu1 %v6436_v41, %s5990_s20 }
 0x622   : > { %5418 = vrot.lane.b32.xlu0 %v6707_v22, %s5990_s20  ;;  %5423 = vrot.lane.b32.xlu1 %v6713_v54, %s5990_s20 }
 0x626   : > { %5433 = vrot.lane.b32.xlu0 %v6719_v21, %s5990_s20  ;;  %5428 = vrot.lane.b32.xlu1 %v6725_v48, %s5990_s20 }
 0x62a   : > { %5438 = vrot.lane.b32.xlu0 %v6731_v51, %s5990_s20  ;;  %5443 = vrot.lane.b32.xlu1 %v6737_v56, %s5990_s20 }
 0x62c   : > { %v1780_v52 = vpop.xlane.xlu0 %1779 }
 0x62d   : > { %5633 = vrcp.f32 %v1780_v52  ;;  %v1778_v25 = vpop.xlane.xlu1 %1777 }
 0x62e   : > { %5635 = vrcp.f32 %v1778_v25  ;;  %5458 = vrot.lane.b32.xlu0 %v7825_v6, %s5991_s21  ;;  %5448 = vrot.lane.b32.xlu1 %v6745_v1, %s5990_s20 }
 0x631   : > { %v5404_v4 = vpop.permute.xlu1 %5403 }
 0x632   : > { %5468 = vrot.lane.b32.xlu0 %v7828_v24, %s5991_s21  ;;  %5453 = vrot.lane.b32.xlu1 %v6753_v20, %s5990_s20  ;;  %v5059_v24 = vpack.c.bf16 %v5386_v0, %v5385_v29  ;;  %v5406_v62 = vunpack.i.h.bf16 %v5404_v4  ;;  %v5405_v52 = vunpack.i.l.bf16 %v5404_v4 }
 0x634   : > { %v5083_v25 = vpack.c.bf16 %v5406_v62, %v5405_v52 }
 0x636   : > { %5463 = vrot.lane.b32.xlu1 %v7829_v28, %s5991_s21  ;;  %v7862_v28 = vld [vmem:[#allocation20_spill] sm:$0xff] }
 0x637   : > { %v5634_v3 = vpop.eup %5633  ;;  %v5391_v46 = vunpack.i.h.bf16 %v7862_v28  ;;  %v5390_v36 = vunpack.i.l.bf16 %v7862_v28 }
 0x638   : > { %v5636_v15 = vpop.eup %5635  ;;  %v1812_v57 = vmul.f32 %v5634_v3, %v6908_v33  ;;  %v5409_v3 = vpop.permute.xlu0 %5408 }
 0x639   : > { %v1810_v6 = vmul.f32 %v5636_v15, %v6910_v14  ;;  %v5065_v14 = vpack.c.bf16 %v5391_v46, %v5390_v36  ;;  %v5411_v15 = vunpack.i.h.bf16 %v5409_v3  ;;  %v5410_v59 = vunpack.i.l.bf16 %v5409_v3 }
 0x63a   : > { %5473 = vrot.lane.b32.xlu1 %v7854_v7, %s5991_s21  ;;  %v7863_v7 = vld [vmem:[#allocation38_spill] sm:$0xff] }
 0x63b   : > { %4549 = vmatprep.mubr.f32.mxu1 %v1810_v6  ;;  %v5396_v33 = vunpack.i.h.bf16 %v7863_v7  ;;  %v5395_v44 = vunpack.i.l.bf16 %v7863_v7  ;;  %v5089_v6 = vpack.c.bf16 %v5411_v15, %v5410_v59 }
 0x63c   : > { %4550 = vmatmul.mubr.f32.vlgmr.msra.gmra.mrb[32].mxu1 %v1812_v57 }
 0x63d   : > { %5058 = vmatpush3.bf16.xpose.msk.msra.mxu1 %vm6330_vm1, %v7860_v12  ;;  %v5071_v38 = vpack.c.bf16 %v5396_v33, %v5395_v44 }
 0x63e   : > { %5061 = vmatprep.subr.msk.bf16.mxu1 %vm6330_vm1, %v5059_v24 }
 0x645   : > { %5064 = vmatpush3.bf16.xpose.msk.msra.mxu1 %vm6330_vm1, %v5059_v24 }
 0x646   : > { %5067 = vmatprep.subr.msk.bf16.mxu1 %vm6330_vm1, %v5065_v14 }
 0x64d   : > { %5070 = vmatpush3.bf16.xpose.msk.msra.mxu1 %vm6330_vm1, %v5065_v14 }
 0x64e   : > { %5073 = vmatprep.subr.msk.bf16.mxu1 %vm6330_vm1, %v5071_v38 }
 0x655   : > { %5076 = vmatpush3.bf16.xpose.msk.msra.mxu1 %vm6330_vm1, %v5071_v38 }
 0x656   : > { %5079 = vmatprep.subr.msk.bf16.mxu1 %vm6330_vm1, %v5077_v53 }
 0x65d   : > { %5082 = vmatpush3.bf16.xpose.msk.msra.mxu1 %vm6330_vm1, %v5077_v53 }
 0x65e   : > { %5085 = vmatprep.subr.msk.bf16.mxu1 %vm6330_vm1, %v5083_v25 }
 0x661   : > { %v1782_v0 = vpop.xlane.xlu0 %1781 }
 0x662   : > { %5637 = vrcp.f32 %v1782_v0  ;;  %v1784_v29 = vpop.xlane.xlu1 %1783 }
 0x663   : > { %5639 = vrcp.f32 %v1784_v29 }
 0x665   : > { %5088 = vmatpush3.bf16.xpose.msk.msra.mxu1 %vm6330_vm1, %v5083_v25  ;;  %v1788_v57 = vpop.xlane.xlu0 %1787 }
 0x666   : > { %5091 = vmatprep.subr.msk.bf16.mxu1 %vm6330_vm1, %v5089_v6  ;;  %v1792_v24 = vpop.xlane.xlu1 %1791  ;;  %5641 = vrcp.f32 %v1788_v57 }
 0x669   : > { %v1786_v12 = vpop.xlane.xlu0 %1785 }
 0x66a   : > { %5643 = vrcp.f32 %v1786_v12  ;;  %v1790_v28 = vpop.xlane.xlu1 %1789 }
 0x66b   : > { %5645 = vrcp.f32 %v1790_v28 }
 0x66c   : > { %v5638_v46 = vpop.eup %5637  ;;  %5647 = vrcp.f32 %v1792_v24 }
 0x66d   : > { %v5640_v36 = vpop.eup %5639  ;;  %5094 = vmatpush3.bf16.xpose.msk.msra.mxu1 %vm6330_vm1, %v5089_v6  ;;  %v1798_v14 = vpop.xlane.xlu0 %1797  ;;  %v1814_v7 = vmul.f32 %v5638_v46, %v6926_v18 }
 0x66e   : > { %v1796_v33 = vpop.xlane.xlu1 %1795  ;;  %v1816_v44 = vmul.f32 %v5640_v36, %v6928_v61  ;;  %5649 = vrcp.f32 %v1798_v14 }
 0x66f   : > { %4552 = vmatprep.mubr.f32.mxu1 %v1814_v7  ;;  %5651 = vrcp.f32 %v1796_v33 }
 0x670   : > { %4553 = vmatmul.mubr.f32.gmra.mrb[34].mxu1 %v1816_v44  ;;  %v5642_v30 = vpop.eup %5641 }
 0x671   : > { %v1804_v38 = vpop.xlane.xlu0 %1803  ;;  %v1820_v18 = vmul.f32 %v5642_v30, %v6934_v10 }
 0x672   : > { %v1794_v13 = vpop.xlane.xlu1 %1793 }
 0x673   : > { %5653 = vrcp.f32 %v1794_v13 }
 0x674   : > { %v5644_v53 = vpop.eup %5643 }
 0x675   : > { %v5646_v4 = vpop.eup %5645  ;;  %v1802_v62 = vpop.xlane.xlu0 %1801  ;;  %v1818_v52 = vmul.f32 %v5644_v53, %v6942_v23 }
 0x676   : > { %5655 = vrcp.f32 %v1802_v62  ;;  %v1800_v25 = vpop.xlane.xlu1 %1799  ;;  %v1822_v3 = vmul.f32 %v5646_v4, %v6944_v11  ;;  %v5648_v61 = vpop.eup %5647 }
 0x677   : > { %5657 = vrcp.f32 %v1800_v25  ;;  %4555 = vmatprep.mubr.f32.mxu1 %v1818_v52  ;;  %v1824_v6 = vmul.f32 %v5648_v61, %v6937_v32 }
 0x678   : > { %4556 = vmatmul.mubr.f32.gmra.mrb[36].mxu1 %v1820_v18  ;;  %5659 = vrcp.f32 %v1804_v38  ;;  %v5650_v57 = vpop.eup %5649 }
 0x679   : > { %4558 = vmatprep.mubr.f32.mxu1 %v1822_v3  ;;  %v5414_v15 = vpop.permute.xlu0 %5413  ;;  %v5652_v23 = vpop.eup %5651  ;;  %v1830_v36 = vmul.f32 %v5650_v57, %v6949_v49 }
 0x67a   : > { %v5416_v59 = vunpack.i.h.bf16 %v5414_v15  ;;  %v5415_v0 = vunpack.i.l.bf16 %v5414_v15  ;;  %v1808_v29 = vpop.xlane.xlu1 %1807  ;;  %v1828_v46 = vmul.f32 %v5652_v23, %v6951_v63 }
 0x67b   : > { %5661 = vrcp.f32 %v1808_v29 }
 0x67c   : > { %v5095_v24 = vpack.c.bf16 %v5416_v59, %v5415_v0  ;;  %4559 = vmatmul.mubr.f32.gmra.mrb[38].mxu1 %v1824_v6 }
 0x67d   : > { %v5654_v12 = vpop.eup %5653  ;;  %v2051_v10 = vpop.permute.xlu0 %2050 }
 0x67e   : > { %v1806_v11 = vpop.xlane.xlu1 %1805  ;;  %5097 = vmatprep.subr.msk.bf16.mxu1 %vm6330_vm1, %v5095_v24  ;;  %v1826_v28 = vmul.f32 %v5654_v12, %v6957_v58 }
 0x67f   : > { %5663 = vrcp.f32 %v1806_v11  ;;  %5100 = vmatpush3.bf16.xpose.msk.msra.mxu1 %vm6330_vm1, %v5095_v24 }
 0x680   : > { %v5656_v32 = vpop.eup %5655  ;;  %4561 = vmatprep.mubr.f32.mxu1 %v1826_v28 }
 0x681   : > { %v5658_v14 = vpop.eup %5657  ;;  %4562 = vmatmul.mubr.f32.gmra.mrb[40].mxu1 %v1828_v46  ;;  %v2055_v7 = vpop.permute.xlu0 %2054  ;;  %v1834_v58 = vmul.f32 %v5656_v32, %v6961_v17 }
 0x682   : > { %v2053_v33 = vpop.permute.xlu1 %2052  ;;  %4564 = vmatprep.mubr.f32.mxu1 %v1830_v36  ;;  %v1832_v44 = vmul.f32 %v5658_v14, %v6963_v2  ;;  %v5660_v38 = vpop.eup %5659 }
 0x683   : > { %v1836_v63 = vmul.f32 %v5660_v38, %v6955_v50 }
 0x685   : > { %4565 = vmatmul.mubr.f32.gmra.mrb[42].mxu1 %v1832_v44  ;;  %v2059_v13 = vpop.permute.xlu0 %2058  ;;  %v5662_v53 = vpop.eup %5661 }
 0x686   : > { %v2057_v30 = vpop.permute.xlu1 %2056  ;;  %4567 = vmatprep.mubr.f32.mxu1 %v1834_v58  ;;  %v1840_v25 = vmul.f32 %v5662_v53, %v6967_v27 }
 0x689   : > { %v5664_v4 = vpop.eup %5663  ;;  %4568 = vmatmul.mubr.f32.gmra.mrb[44].mxu1 %v1836_v63  ;;  %v2063_v49 = vpop.permute.xlu0 %2062 }
 0x68a   : > { %v2061_v62 = vpop.permute.xlu1 %2060  ;;  %v1838_v52 = vmul.f32 %v5664_v4, %v6970_v37 }
 0x68c   : > { %4570 = vmatprep.mubr.f32.mxu1 %v1838_v52 }
 0x68d   : > { %4571 = vmatmul.mubr.f32.gmra.mrb[46].mxu1 %v1840_v25  ;;  %v2067_v2 = vpop.permute.xlu0 %2066 }
 0x68e   : > { %v2065_v18 = vpop.permute.xlu1 %2064  ;;  %4605 = vmatprep.mubr.msk.f32.mxu1 %vm861_vm0, %v2051_v10 }
 0x691   : > { %v2071_v17 = vpop.permute.xlu0 %2070  ;;  %4606 = vmatmul.mubr.msk.f32.vlgmr.msra.gmra.mrb[48].mxu1 %vm861_vm0, %v2053_v33 }
 0x692   : > { %v2069_v3 = vpop.permute.xlu1 %2068  ;;  %4608 = vmatprep.mubr.msk.f32.mxu1 %vm861_vm0, %v2055_v7 }
 0x695   : > { %v2075_v50 = vpop.permute.xlu0 %2074  ;;  %4609 = vmatmul.mubr.msk.f32.gmra.mrb[50].mxu1 %vm861_vm0, %v2057_v30 }
 0x696   : > { %v2073_v61 = vpop.permute.xlu1 %2072  ;;  %4611 = vmatprep.mubr.msk.f32.mxu1 %vm861_vm0, %v2059_v13 }
 0x699   : > { %v2079_v37 = vpop.permute.xlu0 %2078  ;;  %4612 = vmatmul.mubr.msk.f32.gmra.mrb[52].mxu1 %vm861_vm0, %v2061_v62 }
 0x69a   : > { %v2077_v27 = vpop.permute.xlu1 %2076  ;;  %4614 = vmatprep.mubr.msk.f32.mxu1 %vm861_vm0, %v2063_v49 }
 0x69d   : > { %v5419_v15 = vpop.permute.xlu0 %5418  ;;  %4615 = vmatmul.mubr.msk.f32.gmra.mrb[54].mxu1 %vm861_vm0, %v2065_v18 }
 0x69e   : > { %v5421_v59 = vunpack.i.h.bf16 %v5419_v15  ;;  %v5420_v0 = vunpack.i.l.bf16 %v5419_v15  ;;  %v2081_v29 = vpop.permute.xlu1 %2080  ;;  %4617 = vmatprep.mubr.msk.f32.mxu1 %vm861_vm0, %v2067_v2 }
 0x6a0   : > { %v5101_v6 = vpack.c.bf16 %v5421_v59, %v5420_v0 }
 0x6a1   : > { %4618 = vmatmul.mubr.msk.f32.gmra.mrb[56].mxu1 %vm861_vm0, %v2069_v3  ;;  %v5434_v57 = vpop.permute.xlu0 %5433 }
 0x6a2   : > { %v5424_v23 = vpop.permute.xlu1 %5423  ;;  %4620 = vmatprep.mubr.msk.f32.mxu1 %vm861_vm0, %v2071_v17  ;;  %5102 = vmatprep.subr.bf16.mxu0 %v5101_v6  ;;  %v5436_v28 = vunpack.i.h.bf16 %v5434_v57  ;;  %v5435_v46 = vunpack.i.l.bf16 %v5434_v57 }
 0x6a3   : > { %v5426_v24 = vunpack.i.h.bf16 %v5424_v23  ;;  %v5425_v12 = vunpack.i.l.bf16 %v5424_v23  ;;  %5104 = vmatpush3.bf16.msra.mxu0 %v5101_v6 }
 0x6a4   : > { %v5113_v58 = vpack.c.bf16 %v5436_v28, %v5435_v46 }
 0x6a5   : > { %4621 = vmatmul.mubr.msk.f32.gmra.mrb[58].mxu1 %vm861_vm0, %v2073_v61  ;;  %v5105_v10 = vpack.c.bf16 %v5426_v24, %v5425_v12  ;;  %v5439_v14 = vpop.permute.xlu0 %5438 }
 0x6a6   : > { %v5429_v11 = vpop.permute.xlu1 %5428  ;;  %4623 = vmatprep.mubr.msk.f32.mxu1 %vm861_vm0, %v2075_v50  ;;  %v5441_v44 = vunpack.i.h.bf16 %v5439_v14  ;;  %v5440_v38 = vunpack.i.l.bf16 %v5439_v14 }
 0x6a7   : > { %v5431_v32 = vunpack.i.h.bf16 %v5429_v11  ;;  %v5430_v36 = vunpack.i.l.bf16 %v5429_v11  ;;  %5106 = vmatprep.subr.bf16.mxu0 %v5105_v10 }
 0x6a8   : > { %5108 = vmatpush3.bf16.msra.mxu0 %v5105_v10  ;;  %v5117_v53 = vpack.c.bf16 %v5441_v44, %v5440_v38 }
 0x6a9   : > { %4624 = vmatmul.mubr.msk.f32.gmra.mrb[60].mxu1 %vm861_vm0, %v2077_v27  ;;  %v5109_v7 = vpack.c.bf16 %v5431_v32, %v5430_v36  ;;  %v5459_v17 = vpop.permute.xlu0 %5458 }
 0x6aa   : > { %v5444_v33 = vpop.permute.xlu1 %5443  ;;  %4626 = vmatprep.mubr.msk.f32.mxu1 %vm861_vm0, %v2079_v37  ;;  %v5461_v3 = vunpack.i.h.bf16 %v5459_v17  ;;  %v5460_v50 = vunpack.i.l.bf16 %v5459_v17 }
 0x6ab   : > { %5110 = vmatprep.subr.bf16.mxu0 %v5109_v7  ;;  %v5446_v30 = vunpack.i.h.bf16 %v5444_v33  ;;  %v5445_v63 = vunpack.i.l.bf16 %v5444_v33 }
 0x6ac   : > { %5112 = vmatpush3.bf16.msra.mxu0 %v5109_v7  ;;  %v7100_v37 = vpack.c.bf16 %v5461_v3, %v5460_v50 }
 0x6ad   : > { %4627 = vmatmul.mubr.msk.f32.gmra.mrb[62].mxu1 %vm861_vm0, %v2081_v29  ;;  %5114 = vmatprep.subr.bf16.mxu0 %v5113_v58  ;;  %v5121_v62 = vpack.c.bf16 %v5446_v30, %v5445_v63 }
 0x6ae   : > { %v5449_v13 = vpop.permute.xlu1 %5448 }
 0x6af   : > { %v5451_v4 = vunpack.i.h.bf16 %v5449_v13  ;;  %v5450_v49 = vunpack.i.l.bf16 %v5449_v13 }
 0x6b0   : > { %5116 = vmatpush3.bf16.msra.mxu0 %v5113_v58 }
 0x6b1   : > { %5118 = vmatprep.subr.bf16.mxu0 %v5117_v53  ;;  %v5125_v18 = vpack.c.bf16 %v5451_v4, %v5450_v49 }
 0x6b2   : > { %v5454_v52 = vpop.permute.xlu1 %5453 }
 0x6b3   : > { %v5456_v25 = vunpack.i.h.bf16 %v5454_v52  ;;  %v5455_v2 = vunpack.i.l.bf16 %v5454_v52 }
 0x6b4   : > { %5120 = vmatpush3.bf16.msra.mxu0 %v5117_v53 }
 0x6b5   : > { %5122 = vmatprep.subr.bf16.mxu0 %v5121_v62  ;;  %v5129_v61 = vpack.c.bf16 %v5456_v25, %v5455_v2 }
 0x6b8   : > { %5124 = vmatpush3.bf16.msra.mxu0 %v5121_v62 }
 0x6b9   : > { %5126 = vmatprep.subr.bf16.mxu0 %v5125_v18 }
 0x6bc   : > { %5128 = vmatpush3.bf16.msra.mxu0 %v5125_v18 }
 0x6bd   : > { %5130 = vmatprep.subr.bf16.mxu0 %v5129_v61 }
 0x6c0   : > { %5132 = vmatpush3.bf16.msra.mxu0 %v5129_v61 }
 0x6c1   : > { %5135 = vmatprep.subr.msk.bf16.mxu0 %vm6330_vm1, %v7100_v37 }
 0x70f   : > { %v7105_v27 = vpop.f32.mrb[32].mxu1 }
 0x710   : > { %7864 = vst [vmem:[#allocation17_spill] sm:$0xff] %v7105_v27  ;;  %v7107_v15 = vpop.f32.mrb[33].mxu1 }
 0x743   : > { %v7109_v59 = vpop.f32.mrb[34].mxu1 }
 0x744   : > { %7865 = vst [vmem:[#allocation16_spill] sm:$0xff] %v7109_v59  ;;  %v7111_v0 = vpop.f32.mrb[35].mxu1 }
 0x745   : > { %7866 = vst [vmem:[#allocation20_spill] sm:$0xff] %v7111_v0 }
 0x74b   : > { %v7113_v29 = vpop.f32.mrb[36].mxu1 }
 0x74c   : > { %7867 = vst [vmem:[#allocation38_spill] sm:$0xff] %v7113_v29  ;;  %v7115_v6 = vpop.f32.mrb[37].mxu1 }
 0x74d   : > { %7868 = vst [vmem:[#allocation39_spill] sm:$0xff] %v7115_v6 }
 0x74f   : > { %v7117_v57 = vpop.f32.mrb[38].mxu1 }
 0x750   : > { %7869 = vst [vmem:[#allocation40_spill] sm:$0xff] %v7117_v57  ;;  %v7119_v23 = vpop.f32.mrb[39].mxu1 }
 0x751   : > { %7870 = vst [vmem:[#allocation41_spill] sm:$0xff] %v7119_v23 }
 0x754   : > { %v7121_v24 = vpop.f32.mrb[40].mxu1 }
 0x755   : > { %7871 = vst [vmem:[#allocation42_spill] sm:$0xff] %v7121_v24  ;;  %v7123_v12 = vpop.f32.mrb[41].mxu1 }
 0x756   : > { %7872 = vst [vmem:[#allocation43_spill] sm:$0xff] %v7123_v12 }
 0x758   : > { %v7125_v10 = vpop.f32.mrb[42].mxu1 }
 0x759   : > { %7873 = vst [vmem:[#allocation44_spill] sm:$0xff] %v7125_v10  ;;  %v7127_v11 = vpop.f32.mrb[43].mxu1 }
 0x75a   : > { %7874 = vst [vmem:[#allocation45_spill] sm:$0xff] %v7127_v11 }
 0x75c   : > { %v7129_v28 = vpop.f32.mrb[44].mxu1 }
 0x75d   : > { %7875 = vst [vmem:[#allocation46_spill] sm:$0xff] %v7129_v28  ;;  %v7131_v46 = vpop.f32.mrb[45].mxu1 }
 0x75e   : > { %7876 = vst [vmem:[#allocation47_spill] sm:$0xff] %v7131_v46 }
 0x760   : > { %v7133_v32 = vpop.f32.mrb[46].mxu1 }
 0x761   : > { %7877 = vst [vmem:[#allocation48_spill] sm:$0xff] %v7133_v32  ;;  %v7135_v36 = vpop.f32.mrb[47].mxu1  ;;  %v7168_v32 = vpop.permute.xlu1 %5463 }
 0x762   : > { %7878 = vst [vmem:[#allocation49_spill] sm:$0xff] %v7135_v36 }
 0x764   : > { %v4607_v14 = vpop.f32.mrb[48].mxu1 }
 0x765   : > { %v2324_v7 = vmul.f32 0.17677669, %v4607_v14  ;;  %v2244_v33 = vpop.f32.mrb[49].mxu1 }
 0x766   : > { %v2323_v44 = vmul.f32 0.17677669, %v2244_v33 }
 0x767   : > { %2341 = vmax.xlane.f32.xlu1 %v2324_v7 }
 0x768   : > { %2339 = vmax.xlane.f32.xlu0 %v2323_v44  ;;  %v4610_v38 = vpop.f32.mrb[50].mxu1 }
 0x769   : > { %v2326_v58 = vmul.f32 0.17677669, %v4610_v38  ;;  %v2254_v13 = vpop.f32.mrb[51].mxu1 }
 0x76a   : > { %v7139_v4 = vmul.f32 0.17677669, %v2254_v13 }
 0x76c   : > { %2345 = vmax.xlane.f32.xlu0 %v2326_v58  ;;  %v4613_v30 = vpop.f32.mrb[52].mxu1 }
 0x76d   : > { %v7137_v63 = vmul.f32 0.17677669, %v4613_v30  ;;  %v2264_v53 = vpop.f32.mrb[53].mxu1 }
 0x76e   : > { %v7143_v25 = vmul.f32 0.17677669, %v2264_v53 }
 0x76f   : > { %2349 = vmax.xlane.f32.xlu1 %v7137_v63 }
 0x770   : > { %2343 = vmax.xlane.f32.xlu0 %v7139_v4  ;;  %v4616_v49 = vpop.f32.mrb[54].mxu1 }
 0x771   : > { %v2330_v62 = vmul.f32 0.17677669, %v4616_v49  ;;  %v2274_v52 = vpop.f32.mrb[55].mxu1 }
 0x772   : > { %v2329_v3 = vmul.f32 0.17677669, %v2274_v52 }
 0x773   : > { %2353 = vmax.xlane.f32.xlu1 %v2330_v62 }
 0x774   : > { %2347 = vmax.xlane.f32.xlu0 %v7143_v25  ;;  %v4619_v2 = vpop.f32.mrb[56].mxu1 }
 0x775   : > { %v2332_v18 = vmul.f32 0.17677669, %v4619_v2  ;;  %v2284_v17 = vpop.f32.mrb[57].mxu1 }
 0x776   : > { %v2331_v33 = vmul.f32 0.17677669, %v2284_v17 }
 0x777   : > { %2357 = vmax.xlane.f32.xlu1 %v2332_v18 }
 0x778   : > { %2351 = vmax.xlane.f32.xlu0 %v2329_v3  ;;  %v4622_v50 = vpop.f32.mrb[58].mxu1 }
 0x779   : > { %v7146_v61 = vmul.f32 0.17677669, %v4622_v50  ;;  %v2294_v14 = vpop.f32.mrb[59].mxu1 }
 0x77a   : > { %v7151_v53 = vmul.f32 0.17677669, %v2294_v14  ;;  %v7879_v14 = vld [vmem:[#allocation22_spill] sm:$0xff] }
 0x77b   : > { %2361 = vmax.xlane.f32.xlu1 %v7146_v61 }
 0x77c   : > { %2355 = vmax.xlane.f32.xlu0 %v2331_v33  ;;  %v4625_v38 = vpop.f32.mrb[60].mxu1 }
 0x77d   : > { %v7149_v13 = vmul.f32 0.17677669, %v4625_v38  ;;  %v2304_v30 = vpop.f32.mrb[61].mxu1  ;;  %v7880_v38 = vld [vmem:[#allocation21_spill] sm:$0xff] }
 0x77e   : > { %v7157_v50 = vmul.f32 0.17677669, %v2304_v30  ;;  %v7172_v30 = vpop.permute.xlu0 %5468 }
 0x77f   : > { %2365 = vmax.xlane.f32.xlu1 %v7149_v13 }
 0x780   : > { %2359 = vmax.xlane.f32.xlu0 %v7151_v53  ;;  %v4628_v49 = vpop.f32.mrb[62].mxu1 }
 0x781   : > { %v7155_v52 = vmul.f32 0.17677669, %v4628_v49  ;;  %v2314_v2 = vpop.f32.mrb[63].mxu1  ;;  %v7170_v49 = vpop.permute.xlu1 %5473 }
 0x782   : > { %v7161_v17 = vmul.f32 0.17677669, %v2314_v2 }
 0x783   : > { %2369 = vmax.xlane.f32.xlu1 %v7155_v52 }
 0x784   : > { %2363 = vmax.xlane.f32.xlu0 %v7157_v50 }
 0x788   : > { %2367 = vmax.xlane.f32.xlu0 %v7161_v17 }
 0x794   : > { %5483 = vrot.lane.b32.xlu1 %v7879_v14, %s5991_s21 }
 0x79e   : > { %5478 = vrot.lane.b32.xlu0 %v7880_v38, %s5991_s21 }
 0x7f4   : > { %v2342_v28 = vpop.xlane.xlu1 %2341 }
 0x7f5   : > { %v2372_v10 = vsub.f32 %v2324_v7, %v2342_v28  ;;  %v2340_v36 = vpop.xlane.xlu0 %2339 }
 0x7f6   : > { %v2371_v24 = vsub.f32 %v2323_v44, %v2340_v36 }
 0x7f7   : > { %v2389_v2 = vmul.f32 1.442695, %v2372_v10 }
 0x7f8   : > { %v2387_v46 = vmul.f32 1.442695, %v2371_v24 }
 0x7f9   : > { %5665 = vpow2.f32 %v2389_v2  ;;  %v2346_v0 = vpop.xlane.xlu0 %2345 }
 0x7fa   : > { %5667 = vpow2.f32 %v2387_v46  ;;  %v2374_v11 = vsub.f32 %v2326_v58, %v2346_v0 }
 0x7fc   : > { %v2393_v14 = vmul.f32 1.442695, %v2374_v11  ;;  %v2350_v12 = vpop.xlane.xlu1 %2349 }
 0x7fd   : > { %v2344_v57 = vpop.xlane.xlu0 %2343 }
 0x7fe   : > { %5669 = vpow2.f32 %v2393_v14 }
 0x800   : > { %v2354_v38 = vpop.xlane.xlu1 %2353 }
 0x801   : > { %v2378_v23 = vsub.f32 %v2330_v62, %v2354_v38  ;;  %v2348_v29 = vpop.xlane.xlu0 %2347  ;;  %v2373_v38 = vsub.f32 %v7139_v4, %v2344_v57 }
 0x803   : > { %v7174_v6 = vpop.eup %5665  ;;  %v2401_v59 = vmul.f32 1.442695, %v2378_v23 }
 0x804   : > { %v7176_v27 = vpop.eup %5667  ;;  %v2358_v28 = vpop.xlane.xlu1 %2357  ;;  %2421 = vadd.xlane.f32.xlu0 %v7174_v6 }
 0x805   : > { %5671 = vpow2.f32 %v2401_v59  ;;  %v2352_v24 = vpop.xlane.xlu0 %2351  ;;  %2419 = vadd.xlane.f32.xlu1 %v7176_v27  ;;  %v2380_v0 = vsub.f32 %v2332_v18, %v2358_v28  ;;  %v2376_v28 = vsub.f32 %v7137_v63, %v2350_v12 }
 0x806   : > { %v2377_v10 = vsub.f32 %v2329_v3, %v2352_v24  ;;  %v2391_v24 = vmul.f32 1.442695, %v2373_v38 }
 0x807   : > { %v2405_v7 = vmul.f32 1.442695, %v2380_v0  ;;  %v2397_v0 = vmul.f32 1.442695, %v2376_v28 }
 0x808   : > { %v7180_v11 = vpop.eup %5669  ;;  %v2399_v46 = vmul.f32 1.442695, %v2377_v10  ;;  %v2362_v44 = vpop.xlane.xlu1 %2361  ;;  %v2375_v10 = vsub.f32 %v7143_v25, %v2348_v29 }
 0x809   : > { %v2356_v36 = vpop.xlane.xlu0 %2355  ;;  %2425 = vadd.xlane.f32.xlu1 %v7180_v11  ;;  %v2382_v58 = vsub.f32 %v7146_v61, %v2362_v44 }
 0x80a   : > { %5673 = vpow2.f32 %v2399_v46  ;;  %v2379_v23 = vsub.f32 %v2331_v33, %v2356_v36  ;;  %v7881_v33 = vld [vmem:[#allocation23_spill] sm:$0xff]  ;;  %v2395_v36 = vmul.f32 1.442695, %v2375_v10 }
 0x80b   : > { %5675 = vpow2.f32 %v2405_v7  ;;  %v2409_v18 = vmul.f32 1.442695, %v2382_v58 }
 0x80c   : > { %v2403_v62 = vmul.f32 1.442695, %v2379_v23  ;;  %v2366_v23 = vpop.xlane.xlu1 %2365 }
 0x80d   : > { %v2360_v46 = vpop.xlane.xlu0 %2359  ;;  %v2384_v44 = vsub.f32 %v7149_v13, %v2366_v23 }
 0x80e   : > { %5677 = vpow2.f32 %v2403_v62  ;;  %v2381_v7 = vsub.f32 %v7151_v53, %v2360_v46 }
 0x80f   : > { %v7184_v59 = vpop.eup %5671  ;;  %5679 = vpow2.f32 %v2409_v18  ;;  %v2413_v63 = vmul.f32 1.442695, %v2384_v44 }
 0x810   : > { %2433 = vadd.xlane.f32.xlu1 %v7184_v59  ;;  %5681 = vpow2.f32 %v2391_v24  ;;  %v2407_v57 = vmul.f32 1.442695, %v2381_v7  ;;  %v2370_v58 = vpop.xlane.xlu1 %2369 }
 0x811   : > { %5683 = vpow2.f32 %v2397_v0  ;;  %v2364_v4 = vpop.xlane.xlu0 %2363  ;;  %v2386_v13 = vsub.f32 %v7155_v52, %v2370_v58 }
 0x812   : > { %5685 = vpow2.f32 %v2395_v36  ;;  %v2383_v29 = vsub.f32 %v7157_v50, %v2364_v4 }
 0x813   : > { %5687 = vpow2.f32 %v2407_v57  ;;  %v2417_v50 = vmul.f32 1.442695, %v2386_v13 }
 0x814   : > { %v7187_v3 = vpop.eup %5673  ;;  %5689 = vpow2.f32 %v2413_v63 }
 0x815   : > { %2431 = vadd.xlane.f32.xlu1 %v7187_v3  ;;  %v7190_v2 = vpop.eup %5675  ;;  %v2368_v18 = vpop.xlane.xlu0 %2367 }
 0x818   : > { %v7195_v61 = vpop.eup %5677 }
 0x819   : > { %2437 = vadd.xlane.f32.xlu1 %v7190_v2  ;;  %v7198_v14 = vpop.eup %5679 }
 0x81a   : > { %5488 = vrot.lane.b32.xlu0 %v7881_v33, %s5991_s21  ;;  %v7208_v12 = vpop.eup %5681  ;;  %v2385_v33 = vsub.f32 %v7161_v17, %v2368_v18 }
 0x81b   : > { %v7212_v25 = vpop.eup %5683 }
 0x81c   : > { %v7215_v53 = vpop.eup %5685  ;;  %v2415_v28 = vmul.f32 1.442695, %v2385_v33 }
 0x81d   : > { %2435 = vadd.xlane.f32.xlu1 %v7195_v61  ;;  %v7219_v62 = vpop.eup %5687 }
 0x81e   : > { %v7223_v38 = vpop.eup %5689 }
 0x821   : > { %2441 = vadd.xlane.f32.xlu1 %v7198_v14 }
 0x832   : > { %2678 = vrot.lane.b32.xlu1 %v6504_v42, %s5991_s21  ;;  %v2411_v42 = vmul.f32 1.442695, %v2383_v29 }
 0x834   : > { %5691 = vpow2.f32 %v2411_v42 }
 0x835   : > { %5693 = vpow2.f32 %v2417_v50 }
 0x836   : > { %5695 = vpow2.f32 %v2415_v28 }
 0x839   : > { %2423 = vadd.xlane.f32.xlu0 %v7208_v12 }
 0x83d   : > { %2429 = vadd.xlane.f32.xlu0 %v7212_v25 }
 0x83e   : > { %v7226_v24 = vpop.eup %5691 }
 0x83f   : > { %v7229_v52 = vpop.eup %5693 }
 0x840   : > { %v7232_v0 = vpop.eup %5695 }
 0x841   : > { %2427 = vadd.xlane.f32.xlu0 %v7215_v53 }
 0x845   : > { %2439 = vadd.xlane.f32.xlu0 %v7219_v62 }
 0x849   : > { %2445 = vadd.xlane.f32.xlu0 %v7223_v38 }
 0x84d   : > { %2443 = vadd.xlane.f32.xlu0 %v7226_v24 }
 0x856   : > { %2449 = vadd.xlane.f32.xlu1 %v7229_v52 }
 0x85a   : > { %2447 = vadd.xlane.f32.xlu1 %v7232_v0 }
 0x863   : > { %5493 = vrot.lane.b32.xlu0 %v6427_v34, %s5991_s21 }
 0x867   : > { %2676 = vrot.lane.b32.xlu0 %v6360_v45, %s5991_s21  ;;  %v5479_v45 = vpop.permute.xlu0 %5478 }
 0x86b   : > { %2680 = vrot.lane.b32.xlu0 %v6500_v9, %s5991_s21  ;;  %2682 = vrot.lane.b32.xlu1 %v6512_v55, %s5991_s21  ;;  %v5476_v55 = vunpack.i.h.bf16 %v7170_v49 }
 0x86f   : > { %2684 = vrot.lane.b32.xlu0 %v6522_v40, %s5991_s21  ;;  %2686 = vrot.lane.b32.xlu1 %v6382_v60, %s5991_s21  ;;  %v5484_v60 = vpop.permute.xlu1 %5483  ;;  %v5475_v40 = vunpack.i.l.bf16 %v7170_v49 }
 0x873   : > { %2688 = vrot.lane.b32.xlu0 %v6397_v8, %s5991_s21  ;;  %2690 = vrot.lane.b32.xlu1 %v6393_v5, %s5991_s21 }
 0x877   : > { %2692 = vrot.lane.b32.xlu0 %v6411_v19, %s5991_s21  ;;  %2694 = vrot.lane.b32.xlu1 %v6407_v16, %s5991_s21 }
 0x87b   : > { %2696 = vrot.lane.b32.xlu0 %v6421_v31, %s5991_s21  ;;  %2698 = vrot.lane.b32.xlu1 %v6417_v26, %s5991_s21  ;;  %v5466_v26 = vunpack.i.h.bf16 %v7168_v32  ;;  %v5465_v31 = vunpack.i.l.bf16 %v7168_v32 }
 0x87f   : > { %2700 = vrot.lane.b32.xlu0 %v6433_v39, %s5991_s21  ;;  %2702 = vrot.lane.b32.xlu1 %v6430_v35, %s5991_s21  ;;  %v5139_v39 = vpack.c.bf16 %v5466_v26, %v5465_v31 }
 0x883   : > { %2704 = vrot.lane.b32.xlu0 %v6439_v43, %s5991_s21  ;;  %2706 = vrot.lane.b32.xlu1 %v6436_v41, %s5991_s21  ;;  %v5471_v41 = vunpack.i.h.bf16 %v7172_v30  ;;  %v5470_v43 = vunpack.i.l.bf16 %v7172_v30 }
 0x885   : > { %v5145_v9 = vpack.c.bf16 %v5471_v41, %v5470_v43 }
 0x887   : > { %5498 = vrot.lane.b32.xlu0 %v6707_v22, %s5991_s21  ;;  %5503 = vrot.lane.b32.xlu1 %v6713_v54, %s5991_s21  ;;  %v5151_v22 = vpack.c.bf16 %v5476_v55, %v5475_v40  ;;  %v5481_v54 = vunpack.i.h.bf16 %v5479_v45 }
 0x88b   : > { %5508 = vrot.lane.b32.xlu0 %v6725_v48, %s5991_s21  ;;  %5513 = vrot.lane.b32.xlu1 %v6719_v21, %s5991_s21  ;;  %v5480_v21 = vunpack.i.l.bf16 %v5479_v45 }
 0x88d   : > { %v5157_v48 = vpack.c.bf16 %v5481_v54, %v5480_v21 }
 0x88f   : > { %5518 = vrot.lane.b32.xlu0 %v6731_v51, %s5991_s21 }
 0x891   : > { %v2422_v5 = vpop.xlane.xlu0 %2421 }
 0x892   : > { %5697 = vrcp.f32 %v2422_v5  ;;  %v2420_v8 = vpop.xlane.xlu1 %2419 }
 0x893   : > { %5699 = vrcp.f32 %v2420_v8 }
 0x895   : > { %v5489_v17 = vpop.permute.xlu0 %5488 }
 0x896   : > { %v2426_v51 = vpop.xlane.xlu1 %2425  ;;  %v5491_v30 = vunpack.i.h.bf16 %v5489_v17  ;;  %v5490_v10 = vunpack.i.l.bf16 %v5489_v17 }
 0x897   : > { %5701 = vrcp.f32 %v2426_v51 }
 0x898   : > { %v5169_v36 = vpack.c.bf16 %v5491_v30, %v5490_v10 }
 0x89c   : > { %v5698_v16 = vpop.eup %5697 }
 0x89d   : > { %v5700_v19 = vpop.eup %5699  ;;  %v2454_v35 = vmul.f32 %v5698_v16, %v7174_v6  ;;  %v2434_v6 = vpop.xlane.xlu1 %2433 }
 0x89e   : > { %v2452_v34 = vmul.f32 %v5700_v19, %v7176_v27  ;;  %v5485_v27 = vunpack.i.l.bf16 %v5484_v60 }
 0x8a0   : > { %4661 = vmatprep.mubr.f32.mxu0 %v2452_v34 }
 0x8a1   : > { %4662 = vmatmul.mubr.f32.vlgmr.msra.gmra.mrb[64].mxu0 %v2454_v35  ;;  %v5702_v57 = vpop.eup %5701 }
 0x8a2   : > { %5138 = vmatpush3.bf16.xpose.msk.msra.mxu0 %vm6330_vm1, %v7100_v37  ;;  %v5486_v37 = vunpack.i.h.bf16 %v5484_v60  ;;  %v2432_v49 = vpop.xlane.xlu1 %2431  ;;  %v2458_v58 = vmul.f32 %v5702_v57, %v7180_v11 }
 0x8a3   : > { %5141 = vmatprep.subr.msk.bf16.mxu0 %vm6330_vm1, %v5139_v39 }
 0x8a4   : > { %v5163_v32 = vpack.c.bf16 %v5486_v37, %v5485_v27 }
 0x8a6   : > { %v2438_v7 = vpop.xlane.xlu1 %2437 }
 0x8aa   : > { %5144 = vmatpush3.bf16.xpose.msk.msra.mxu0 %vm6330_vm1, %v5139_v39  ;;  %v2436_v4 = vpop.xlane.xlu1 %2435 }
 0x8ab   : > { %5147 = vmatprep.subr.msk.bf16.mxu0 %vm6330_vm1, %v5145_v9 }
 0x8ae   : > { %v2442_v50 = vpop.xlane.xlu1 %2441 }
 0x8b2   : > { %5150 = vmatpush3.bf16.xpose.msk.msra.mxu0 %vm6330_vm1, %v5145_v9  ;;  %v2679_v19 = vpop.permute.xlu1 %2678 }
 0x8b3   : > { %5153 = vmatprep.subr.msk.bf16.mxu0 %vm6330_vm1, %v5151_v22 }
 0x8ba   : > { %5156 = vmatpush3.bf16.xpose.msk.msra.mxu0 %vm6330_vm1, %v5151_v22 }
 0x8bb   : > { %5159 = vmatprep.subr.msk.bf16.mxu0 %vm6330_vm1, %v5157_v48 }
 0x8c2   : > { %5162 = vmatpush3.bf16.xpose.msk.msra.mxu0 %vm6330_vm1, %v5157_v48 }
 0x8c3   : > { %5165 = vmatprep.subr.msk.bf16.mxu0 %vm6330_vm1, %v5163_v32 }
 0x8c6   : > { %v2424_v46 = vpop.xlane.xlu0 %2423 }
 0x8c7   : > { %5703 = vrcp.f32 %v2424_v46 }
 0x8c8   : > { %5705 = vrcp.f32 %v2432_v49 }
 0x8ca   : > { %5168 = vmatpush3.bf16.xpose.msk.msra.mxu0 %vm6330_vm1, %v5163_v32  ;;  %v2430_v23 = vpop.xlane.xlu0 %2429 }
 0x8cb   : > { %5171 = vmatprep.subr.msk.bf16.mxu0 %vm6330_vm1, %v5169_v36  ;;  %5707 = vrcp.f32 %v2430_v23 }
 0x8ce   : > { %v2428_v44 = vpop.xlane.xlu0 %2427 }
 0x8cf   : > { %5709 = vrcp.f32 %v2428_v44 }
 0x8d0   : > { %5711 = vrcp.f32 %v2434_v6 }
 0x8d1   : > { %v5704_v63 = vpop.eup %5703  ;;  %5713 = vrcp.f32 %v2436_v4 }
 0x8d2   : > { %5174 = vmatpush3.bf16.xpose.msk.msra.mxu0 %vm6330_vm1, %v5169_v36  ;;  %v2440_v29 = vpop.xlane.xlu0 %2439  ;;  %v2456_v42 = vmul.f32 %v5704_v63, %v7208_v12  ;;  %5715 = vrcp.f32 %v2438_v7  ;;  %v5706_v18 = vpop.eup %5705 }
 0x8d3   : > { %5717 = vrcp.f32 %v2440_v29  ;;  %v2464_v11 = vmul.f32 %v5706_v18, %v7187_v3 }
 0x8d4   : > { %4664 = vmatprep.mubr.f32.mxu0 %v2456_v42  ;;  %5719 = vrcp.f32 %v2442_v50 }
 0x8d5   : > { %4665 = vmatmul.mubr.f32.gmra.mrb[66].mxu0 %v2458_v58  ;;  %v5708_v33 = vpop.eup %5707 }
 0x8d6   : > { %v2446_v13 = vpop.xlane.xlu0 %2445  ;;  %v2462_v5 = vmul.f32 %v5708_v33, %v7212_v25 }
 0x8d9   : > { %v5710_v28 = vpop.eup %5709 }
 0x8da   : > { %v2444_v45 = vpop.xlane.xlu0 %2443  ;;  %v2460_v60 = vmul.f32 %v5710_v28, %v7215_v53  ;;  %v5712_v12 = vpop.eup %5711 }
 0x8db   : > { %5721 = vrcp.f32 %v2444_v45  ;;  %v5714_v8 = vpop.eup %5713  ;;  %v2466_v34 = vmul.f32 %v5712_v12, %v7184_v59 }
 0x8dc   : > { %4667 = vmatprep.mubr.f32.mxu0 %v2460_v60  ;;  %5723 = vrcp.f32 %v2446_v13  ;;  %v5716_v35 = vpop.eup %5715  ;;  %v2468_v53 = vmul.f32 %v5714_v8, %v7195_v61 }
 0x8dd   : > { %4668 = vmatmul.mubr.f32.gmra.mrb[68].mxu0 %v2462_v5  ;;  %v5718_v39 = vpop.eup %5717  ;;  %v2470_v3 = vmul.f32 %v5716_v35, %v7190_v2 }
 0x8de   : > { %4670 = vmatprep.mubr.f32.mxu0 %v2464_v11  ;;  %v5494_v16 = vpop.permute.xlu0 %5493  ;;  %v5720_v9 = vpop.eup %5719  ;;  %v2472_v59 = vmul.f32 %v5718_v39, %v7219_v62 }
 0x8df   : > { %v5496_v26 = vunpack.i.h.bf16 %v5494_v16  ;;  %v5495_v31 = vunpack.i.l.bf16 %v5494_v16  ;;  %v2474_v22 = vmul.f32 %v5720_v9, %v7198_v14 }
 0x8e1   : > { %v5175_v41 = vpack.c.bf16 %v5496_v26, %v5495_v31  ;;  %4671 = vmatmul.mubr.f32.gmra.mrb[70].mxu0 %v2466_v34 }
 0x8e2   : > { %4673 = vmatprep.mubr.f32.mxu0 %v2468_v53  ;;  %v2677_v25 = vpop.permute.xlu0 %2676 }
 0x8e3   : > { %v2450_v43 = vpop.xlane.xlu1 %2449  ;;  %5177 = vmatprep.subr.msk.bf16.mxu0 %vm6330_vm1, %v5175_v41 }
 0x8e4   : > { %5180 = vmatpush3.bf16.xpose.msk.msra.mxu0 %vm6330_vm1, %v5175_v41  ;;  %5725 = vrcp.f32 %v2450_v43 }
 0x8e5   : > { %v5722_v55 = vpop.eup %5721  ;;  %4674 = vmatmul.mubr.f32.gmra.mrb[72].mxu0 %v2470_v3 }
 0x8e6   : > { %4676 = vmatprep.mubr.f32.mxu0 %v2472_v59  ;;  %v2681_v61 = vpop.permute.xlu0 %2680  ;;  %v5724_v54 = vpop.eup %5723  ;;  %v2476_v21 = vmul.f32 %v5722_v55, %v7226_v24 }
 0x8e7   : > { %v2448_v40 = vpop.xlane.xlu1 %2447  ;;  %v2478_v47 = vmul.f32 %v5724_v54, %v7223_v38 }
 0x8e8   : > { %5727 = vrcp.f32 %v2448_v40 }
 0x8e9   : > { %4677 = vmatmul.mubr.f32.gmra.mrb[74].mxu0 %v2474_v22 }
 0x8ea   : > { %4679 = vmatprep.mubr.f32.mxu0 %v2476_v21  ;;  %v2685_v2 = vpop.permute.xlu0 %2684 }
 0x8eb   : > { %v2683_v48 = vpop.permute.xlu1 %2682 }
 0x8ed   : > { %4680 = vmatmul.mubr.f32.gmra.mrb[76].mxu0 %v2478_v47 }
 0x8ee   : > { %v2689_v62 = vpop.permute.xlu0 %2688  ;;  %v5726_v37 = vpop.eup %5725 }
 0x8ef   : > { %v2687_v51 = vpop.permute.xlu1 %2686  ;;  %v2482_v14 = vmul.f32 %v5726_v37, %v7229_v52 }
 0x8f2   : > { %v5728_v27 = vpop.eup %5727  ;;  %v2693_v6 = vpop.permute.xlu0 %2692 }
 0x8f3   : > { %v2691_v32 = vpop.permute.xlu1 %2690  ;;  %v2480_v17 = vmul.f32 %v5728_v27, %v7232_v0 }
 0x8f5   : > { %4682 = vmatprep.mubr.f32.mxu0 %v2480_v17 }
 0x8f6   : > { %4683 = vmatmul.mubr.f32.gmra.mrb[78].mxu0 %v2482_v14  ;;  %v2697_v24 = vpop.permute.xlu0 %2696 }
 0x8f7   : > { %v2695_v49 = vpop.permute.xlu1 %2694  ;;  %4717 = vmatprep.mubr.msk.f32.mxu0 %vm861_vm0, %v2677_v25 }
 0x8fa   : > { %v2701_v30 = vpop.permute.xlu0 %2700  ;;  %4718 = vmatmul.mubr.msk.f32.vlgmr.msra.gmra.mrb[80].mxu0 %vm861_vm0, %v2679_v19 }
 0x8fb   : > { %v2699_v38 = vpop.permute.xlu1 %2698  ;;  %4720 = vmatprep.mubr.msk.f32.mxu0 %vm861_vm0, %v2681_v61 }
 0x8fe   : > { %v2705_v10 = vpop.permute.xlu0 %2704  ;;  %4721 = vmatmul.mubr.msk.f32.gmra.mrb[82].mxu0 %vm861_vm0, %v2683_v48 }
 0x8ff   : > { %v2703_v46 = vpop.permute.xlu1 %2702  ;;  %4723 = vmatprep.mubr.msk.f32.mxu0 %vm861_vm0, %v2685_v2 }
 0x902   : > { %v5499_v0 = vpop.permute.xlu0 %5498  ;;  %4724 = vmatmul.mubr.msk.f32.gmra.mrb[84].mxu0 %vm861_vm0, %v2687_v51 }
 0x903   : > { %v5501_v52 = vunpack.i.h.bf16 %v5499_v0  ;;  %v5500_v36 = vunpack.i.l.bf16 %v5499_v0  ;;  %v2707_v7 = vpop.permute.xlu1 %2706  ;;  %4726 = vmatprep.mubr.msk.f32.mxu0 %vm861_vm0, %v2689_v62 }
 0x905   : > { %v5181_v23 = vpack.c.bf16 %v5501_v52, %v5500_v36 }
 0x906   : > { %v5509_v44 = vpop.permute.xlu0 %5508  ;;  %4727 = vmatmul.mubr.msk.f32.gmra.mrb[86].mxu0 %vm861_vm0, %v2691_v32 }
 0x907   : > { %v5504_v57 = vpop.permute.xlu1 %5503  ;;  %4729 = vmatprep.mubr.msk.f32.mxu0 %vm861_vm0, %v2693_v6  ;;  %5182 = vmatprep.subr.bf16.mxu1 %v5181_v23  ;;  %v5511_v4 = vunpack.i.h.bf16 %v5509_v44  ;;  %v5510_v63 = vunpack.i.l.bf16 %v5509_v44 }
 0x908   : > { %v5506_v29 = vunpack.i.h.bf16 %v5504_v57  ;;  %v5505_v42 = vunpack.i.l.bf16 %v5504_v57  ;;  %5184 = vmatpush3.bf16.msra.mxu1 %v5181_v23 }
 0x909   : > { %v5189_v18 = vpack.c.bf16 %v5511_v4, %v5510_v63 }
 0x90a   : > { %v5185_v58 = vpack.c.bf16 %v5506_v29, %v5505_v42  ;;  %4730 = vmatmul.mubr.msk.f32.gmra.mrb[88].mxu0 %vm861_vm0, %v2695_v49  ;;  %v5519_v28 = vpop.permute.xlu0 %5518 }
 0x90b   : > { %v5514_v13 = vpop.permute.xlu1 %5513  ;;  %4732 = vmatprep.mubr.msk.f32.mxu0 %vm861_vm0, %v2697_v24  ;;  %v5521_v45 = vunpack.i.h.bf16 %v5519_v28  ;;  %v5520_v60 = vunpack.i.l.bf16 %v5519_v28 }
 0x90c   : > { %v5516_v50 = vunpack.i.h.bf16 %v5514_v13  ;;  %v5515_v33 = vunpack.i.l.bf16 %v5514_v13  ;;  %5186 = vmatprep.subr.bf16.mxu1 %v5185_v58 }
 0x90d   : > { %5188 = vmatpush3.bf16.msra.mxu1 %v5185_v58  ;;  %v5197_v12 = vpack.c.bf16 %v5521_v45, %v5520_v60 }
 0x90e   : > { %4733 = vmatmul.mubr.msk.f32.gmra.mrb[90].mxu0 %vm861_vm0, %v2699_v38  ;;  %5190 = vmatprep.subr.bf16.mxu1 %v5189_v18  ;;  %v5193_v5 = vpack.c.bf16 %v5516_v50, %v5515_v33 }
 0x90f   : > { %4735 = vmatprep.mubr.msk.f32.mxu0 %vm861_vm0, %v2701_v30 }
 0x911   : > { %5192 = vmatpush3.bf16.msra.mxu1 %v5189_v18 }
 0x912   : > { %4736 = vmatmul.mubr.msk.f32.gmra.mrb[92].mxu0 %vm861_vm0, %v2703_v46  ;;  %5194 = vmatprep.subr.bf16.mxu1 %v5193_v5 }
 0x913   : > { %4738 = vmatprep.mubr.msk.f32.mxu0 %vm861_vm0, %v2705_v10 }
 0x915   : > { %5196 = vmatpush3.bf16.msra.mxu1 %v5193_v5 }
 0x916   : > { %4739 = vmatmul.mubr.msk.f32.gmra.mrb[94].mxu0 %vm861_vm0, %v2707_v7  ;;  %5198 = vmatprep.subr.bf16.mxu1 %v5197_v12 }
 0x919   : > { %5200 = vmatpush3.bf16.msra.mxu1 %v5197_v12 }
 0x974   : > { %v7346_v11 = vpop.f32.mrb[64].mxu0 }
 0x975   : > { %v7348_v8 = vpop.f32.mrb[65].mxu0 }
 0x9a8   : > { %v7350_v16 = vpop.f32.mrb[66].mxu0 }
 0x9a9   : > { %v7352_v19 = vpop.f32.mrb[67].mxu0 }
 0x9b0   : > { %v7354_v26 = vpop.f32.mrb[68].mxu0 }
 0x9b1   : > { %v7356_v31 = vpop.f32.mrb[69].mxu0 }
 0x9b4   : > { %v7358_v34 = vpop.f32.mrb[70].mxu0 }
 0x9b5   : > { %v7360_v35 = vpop.f32.mrb[71].mxu0 }
 0x9b8   : > { %v7362_v53 = vpop.f32.mrb[72].mxu0 }
 0x9b9   : > { %v7364_v39 = vpop.f32.mrb[73].mxu0 }
 0x9bc   : > { %v7366_v41 = vpop.f32.mrb[74].mxu0 }
 0x9bd   : > { %v7368_v25 = vpop.f32.mrb[75].mxu0 }
 0x9c0   : > { %v7370_v43 = vpop.f32.mrb[76].mxu0 }
 0x9c1   : > { %v7372_v3 = vpop.f32.mrb[77].mxu0 }
 0x9c9   : > { %v7374_v9 = vpop.f32.mrb[78].mxu0 }
 0x9ca   : > { %v7376_v59 = vpop.f32.mrb[79].mxu0 }
 0x9cd   : > { %v4719_v55 = vpop.f32.mrb[80].mxu0 }
 0x9ce   : > { %v2950_v61 = vmul.f32 0.17677669, %v4719_v55  ;;  %v2870_v40 = vpop.f32.mrb[81].mxu0 }
 0x9cf   : > { %v2949_v22 = vmul.f32 0.17677669, %v2870_v40 }
 0x9d0   : > { %2967 = vmax.xlane.f32.xlu1 %v2950_v61 }
 0x9d1   : > { %2965 = vmax.xlane.f32.xlu0 %v2949_v22  ;;  %v4722_v54 = vpop.f32.mrb[82].mxu0 }
 0x9d2   : > { %v2952_v21 = vmul.f32 0.17677669, %v4722_v54  ;;  %v2880_v2 = vpop.f32.mrb[83].mxu0 }
 0x9d3   : > { %v2951_v51 = vmul.f32 0.17677669, %v2880_v2 }
 0x9d5   : > { %2971 = vmax.xlane.f32.xlu0 %v2952_v21  ;;  %v4725_v48 = vpop.f32.mrb[84].mxu0 }
 0x9d6   : > { %v2954_v47 = vmul.f32 0.17677669, %v4725_v48  ;;  %v2890_v62 = vpop.f32.mrb[85].mxu0 }
 0x9d7   : > { %v2953_v32 = vmul.f32 0.17677669, %v2890_v62 }
 0x9d8   : > { %2975 = vmax.xlane.f32.xlu1 %v2954_v47 }
 0x9d9   : > { %2969 = vmax.xlane.f32.xlu0 %v2951_v51  ;;  %v4728_v37 = vpop.f32.mrb[86].mxu0 }
 0x9da   : > { %v7378_v27 = vmul.f32 0.17677669, %v4728_v37  ;;  %v2900_v6 = vpop.f32.mrb[87].mxu0 }
 0x9db   : > { %v2955_v49 = vmul.f32 0.17677669, %v2900_v6 }
 0x9dc   : > { %2979 = vmax.xlane.f32.xlu1 %v7378_v27 }
 0x9dd   : > { %2973 = vmax.xlane.f32.xlu0 %v2953_v32  ;;  %v4731_v17 = vpop.f32.mrb[88].mxu0 }
 0x9de   : > { %v7381_v14 = vmul.f32 0.17677669, %v4731_v17  ;;  %v2910_v24 = vpop.f32.mrb[89].mxu0 }
 0x9df   : > { %v2957_v46 = vmul.f32 0.17677669, %v2910_v24 }
 0x9e0   : > { %2983 = vmax.xlane.f32.xlu1 %v7381_v14 }
 0x9e1   : > { %2977 = vmax.xlane.f32.xlu0 %v2955_v49  ;;  %v4734_v30 = vpop.f32.mrb[90].mxu0 }
 0x9e2   : > { %v7384_v38 = vmul.f32 0.17677669, %v4734_v30  ;;  %v2920_v10 = vpop.f32.mrb[91].mxu0 }
 0x9e3   : > { %v7389_v7 = vmul.f32 0.17677669, %v2920_v10 }
 0x9e4   : > { %2987 = vmax.xlane.f32.xlu1 %v7384_v38 }
 0x9e5   : > { %2981 = vmax.xlane.f32.xlu0 %v2957_v46  ;;  %v4737_v0 = vpop.f32.mrb[92].mxu0 }
 0x9e6   : > { %v7387_v52 = vmul.f32 0.17677669, %v4737_v0  ;;  %v2930_v36 = vpop.f32.mrb[93].mxu0 }
 0x9e7   : > { %v7395_v4 = vmul.f32 0.17677669, %v2930_v36 }
 0x9e8   : > { %2991 = vmax.xlane.f32.xlu1 %v7387_v52 }
 0x9e9   : > { %2985 = vmax.xlane.f32.xlu0 %v7389_v7  ;;  %v4740_v23 = vpop.f32.mrb[94].mxu0 }
 0x9ea   : > { %v7393_v44 = vmul.f32 0.17677669, %v4740_v23  ;;  %v2940_v57 = vpop.f32.mrb[95].mxu0 }
 0x9eb   : > { %v7399_v63 = vmul.f32 0.17677669, %v2940_v57 }
 0x9ec   : > { %2995 = vmax.xlane.f32.xlu1 %v7393_v44 }
 0x9ed   : > { %2989 = vmax.xlane.f32.xlu0 %v7395_v4 }
 0x9f1   : > { %2993 = vmax.xlane.f32.xlu0 %v7399_v63 }
 0x9fd   : > { %5523 = vrot.lane.b32.xlu1 %v6737_v56, %s5991_s21 }
 0xa07   : > { %5528 = vrot.lane.b32.xlu0 %v6745_v1, %s5991_s21 }
 0xa5d   : > { %v2968_v29 = vpop.xlane.xlu1 %2967 }
 0xa5e   : > { %v2998_v42 = vsub.f32 %v2950_v61, %v2968_v29  ;;  %v2966_v58 = vpop.xlane.xlu0 %2965 }
 0xa5f   : > { %v2997_v13 = vsub.f32 %v2949_v22, %v2966_v58 }
 0xa60   : > { %v3015_v18 = vmul.f32 1.442695, %v2998_v42 }
 0xa61   : > { %v3013_v50 = vmul.f32 1.442695, %v2997_v13 }
 0xa62   : > { %5729 = vpow2.f32 %v3015_v18  ;;  %v2972_v33 = vpop.xlane.xlu0 %2971 }
 0xa63   : > { %5731 = vpow2.f32 %v3013_v50  ;;  %v3000_v28 = vsub.f32 %v2952_v21, %v2972_v33 }
 0xa65   : > { %v3019_v45 = vmul.f32 1.442695, %v3000_v28  ;;  %v2976_v60 = vpop.xlane.xlu1 %2975 }
 0xa66   : > { %v3002_v5 = vsub.f32 %v2954_v47, %v2976_v60  ;;  %v2970_v12 = vpop.xlane.xlu0 %2969 }
 0xa67   : > { %5733 = vpow2.f32 %v3019_v45  ;;  %v2999_v55 = vsub.f32 %v2951_v51, %v2970_v12 }
 0xa68   : > { %v3023_v54 = vmul.f32 1.442695, %v3002_v5 }
 0xa69   : > { %v3017_v56 = vmul.f32 1.442695, %v2999_v55  ;;  %v2980_v40 = vpop.xlane.xlu1 %2979 }
 0xa6a   : > { %v2974_v1 = vpop.xlane.xlu0 %2973  ;;  %v3004_v61 = vsub.f32 %v7378_v27, %v2980_v40 }
 0xa6b   : > { %5735 = vpow2.f32 %v3017_v56  ;;  %v3001_v22 = vsub.f32 %v2953_v32, %v2974_v1 }
 0xa6c   : > { %v7407_v2 = vpop.eup %5729  ;;  %5737 = vpow2.f32 %v3023_v54  ;;  %v3027_v51 = vmul.f32 1.442695, %v3004_v61 }
 0xa6d   : > { %v7409_v48 = vpop.eup %5731  ;;  %v3021_v62 = vmul.f32 1.442695, %v3001_v22  ;;  %v2984_v21 = vpop.xlane.xlu1 %2983  ;;  %3047 = vadd.xlane.f32.xlu0 %v7407_v2 }
 0xa6e   : > { %v2978_v47 = vpop.xlane.xlu0 %2977  ;;  %3045 = vadd.xlane.f32.xlu1 %v7409_v48  ;;  %v3006_v24 = vsub.f32 %v7381_v14, %v2984_v21 }
 0xa6f   : > { %5739 = vpow2.f32 %v3021_v62  ;;  %v3003_v37 = vsub.f32 %v2955_v49, %v2978_v47 }
 0xa70   : > { %5741 = vpow2.f32 %v3027_v51  ;;  %v3031_v49 = vmul.f32 1.442695, %v3006_v24  ;;  %v7883_v24 = vld [vmem:[#allocation16_spill] sm:$0xff] }
 0xa71   : > { %v7413_v6 = vpop.eup %5733  ;;  %v2988_v17 = vpop.xlane.xlu1 %2987  ;;  %v3025_v27 = vmul.f32 1.442695, %v3003_v37 }
 0xa72   : > { %v2982_v32 = vpop.xlane.xlu0 %2981  ;;  %3051 = vadd.xlane.f32.xlu1 %v7413_v6  ;;  %v3008_v57 = vsub.f32 %v7384_v38, %v2988_v17 }
 0xa73   : > { %v3005_v30 = vsub.f32 %v2957_v46, %v2982_v32  ;;  %5743 = vpow2.f32 %v3025_v27  ;;  %v7882_v32 = vld [vmem:[#allocation17_spill] sm:$0xff] }
 0xa74   : > { %v3035_v13 = vmul.f32 1.442695, %v3008_v57  ;;  %v7891_v57 = vld [vmem:[#allocation47_spill] sm:$0xff] }
 0xa75   : > { %v7417_v10 = vpop.eup %5735  ;;  %v3029_v0 = vmul.f32 1.442695, %v3005_v30  ;;  %v2992_v36 = vpop.xlane.xlu1 %2991 }
 0xa76   : > { %v2986_v23 = vpop.xlane.xlu0 %2985  ;;  %3049 = vadd.xlane.f32.xlu1 %v7417_v10  ;;  %v7421_v29 = vpop.eup %5737  ;;  %v3010_v17 = vsub.f32 %v7387_v52, %v2992_v36  ;;  %v7886_v52 = vld [vmem:[#allocation41_spill] sm:$0xff]  ;;  %v7888_v36 = vld [vmem:[#allocation43_spill] sm:$0xff] }
 0xa77   : > { %5745 = vpow2.f32 %v3029_v0  ;;  %v3007_v14 = vsub.f32 %v7389_v7, %v2986_v23  ;;  %v7884_v0 = vld [vmem:[#allocation39_spill] sm:$0xff]  ;;  %v7889_v23 = vld [vmem:[#allocation45_spill] sm:$0xff] }
 0xa78   : > { %5747 = vpow2.f32 %v3031_v49  ;;  %v3039_v27 = vmul.f32 1.442695, %v3010_v17  ;;  %v7890_v49 = vld [vmem:[#allocation20_spill] sm:$0xff] }
 0xa79   : > { %v7423_v42 = vpop.eup %5739  ;;  %v2996_v58 = vpop.xlane.xlu1 %2995  ;;  %v3033_v33 = vmul.f32 1.442695, %v3007_v14  ;;  %5749 = vpow2.f32 %v3035_v13  ;;  %v7893_v14 = vld [vmem:[#allocation49_spill] sm:$0xff]  ;;  %v7895_v13 = vld [vmem:[#allocation46_spill] sm:$0xff] }
 0xa7a   : > { %v2990_v46 = vpop.xlane.xlu0 %2989  ;;  %3055 = vadd.xlane.f32.xlu1 %v7421_v29  ;;  %3053 = vadd.xlane.f32.xlu0 %v7423_v42  ;;  %v7428_v18 = vpop.eup %5741  ;;  %v3012_v22 = vsub.f32 %v7393_v44, %v2996_v58  ;;  %v7892_v58 = vld [vmem:[#allocation42_spill] sm:$0xff] }
 0xa7b   : > { %v3009_v60 = vsub.f32 %v7395_v4, %v2990_v46  ;;  %5751 = vpow2.f32 %v3033_v33  ;;  %v7894_v46 = vld [vmem:[#allocation44_spill] sm:$0xff] }
 0xa7d   : > { %v5524_v50 = vpop.permute.xlu1 %5523  ;;  %v7432_v7 = vpop.eup %5743  ;;  %v3037_v56 = vmul.f32 1.442695, %v3009_v60 }
 0xa7e   : > { %v5526_v38 = vunpack.i.h.bf16 %v5524_v50  ;;  %v5525_v28 = vunpack.i.l.bf16 %v5524_v50  ;;  %3059 = vadd.xlane.f32.xlu1 %v7428_v18  ;;  %v2994_v45 = vpop.xlane.xlu0 %2993  ;;  %v7896_v50 = vld [vmem:[#allocation48_spill] sm:$0xff] }
 0xa7f   : > { %v3011_v40 = vsub.f32 %v7399_v63, %v2994_v45  ;;  %5753 = vpow2.f32 %v3037_v56  ;;  %v3043_v63 = vmul.f32 1.442695, %v3012_v22 }
 0xa80   : > { %v5201_v5 = vpack.c.bf16 %v5526_v38, %v5525_v28 }
 0xa81   : > { %v7434_v12 = vpop.eup %5745  ;;  %v3041_v62 = vmul.f32 1.442695, %v3011_v40 }
 0xa82   : > { %3057 = vadd.xlane.f32.xlu1 %v7432_v7  ;;  %5202 = vmatprep.subr.bf16.mxu1 %v5201_v5  ;;  %v5529_v55 = vpop.permute.xlu0 %5528  ;;  %v7439_v61 = vpop.eup %5747 }
 0xa83   : > { %3061 = vadd.xlane.f32.xlu0 %v7434_v12  ;;  %v5531_v54 = vunpack.i.h.bf16 %v5529_v55  ;;  %v5530_v1 = vunpack.i.l.bf16 %v5529_v55  ;;  %5204 = vmatpush3.bf16.msra.mxu1 %v5201_v5  ;;  %v7443_v21 = vpop.eup %5749  ;;  %5755 = vpow2.f32 %v3041_v62 }
 0xa84   : > { %5757 = vpow2.f32 %v3043_v63 }
 0xa85   : > { %v5205_v4 = vpack.c.bf16 %v5531_v54, %v5530_v1  ;;  %v7446_v47 = vpop.eup %5751  ;;  %5759 = vpow2.f32 %v3039_v27 }
 0xa86   : > { %3063 = vadd.xlane.f32.xlu1 %v7439_v61 }
 0xa87   : > { %5206 = vmatprep.subr.bf16.mxu1 %v5205_v4 }
 0xa88   : > { %5208 = vmatpush3.bf16.msra.mxu1 %v5205_v4 }
 0xa89   : > { %v7449_v51 = vpop.eup %5753 }
 0xa8a   : > { %3067 = vadd.xlane.f32.xlu1 %v7443_v21 }
 0xa8d   : > { %v7452_v44 = vpop.eup %5755 }
 0xa8e   : > { %3065 = vadd.xlane.f32.xlu1 %v7446_v47  ;;  %v7455_v37 = vpop.eup %5757 }
 0xa8f   : > { %v7467_v30 = vpop.eup %5759 }
 0xa92   : > { %3069 = vadd.xlane.f32.xlu1 %v7449_v51 }
 0xa96   : > { %3073 = vadd.xlane.f32.xlu1 %v7452_v44 }
 0xa99   : > { %5533 = vrot.lane.b32.xlu0 %v6753_v20, %s5991_s21  ;;  %v7885_v20 = vld [vmem:[#allocation38_spill] sm:$0xff] }
 0xa9a   : > { %3075 = vadd.xlane.f32.xlu1 %v7455_v37 }
 0xaab   : > { %3318 = vrot.lane.b32.xlu1 %v7107_v15, %s5991_s21  ;;  %v7887_v15 = vld [vmem:[#allocation40_spill] sm:$0xff] }
 0xaaf   : > { %3320 = vrot.lane.b32.xlu1 %v7882_v32, %s5991_s21 }
 0xab3   : > { %3324 = vrot.lane.b32.xlu1 %v7883_v24, %s5991_s21 }
 0xab7   : > { %3326 = vrot.lane.b32.xlu1 %v7884_v0, %s5991_s21 }
 0xab8   : > { %3071 = vadd.xlane.f32.xlu0 %v7467_v30 }
 0xabb   : > { %3328 = vrot.lane.b32.xlu1 %v7885_v20, %s5991_s21 }
 0xabf   : > { %3330 = vrot.lane.b32.xlu1 %v7886_v52, %s5991_s21 }
 0xac3   : > { %3332 = vrot.lane.b32.xlu1 %v7887_v15, %s5991_s21 }
 0xac7   : > { %3334 = vrot.lane.b32.xlu1 %v7888_v36, %s5991_s21 }
 0xacb   : > { %3338 = vrot.lane.b32.xlu1 %v7889_v23, %s5991_s21 }
 0xace   : > { %3322 = vrot.lane.b32.xlu0 %v7890_v49, %s5991_s21 }
 0xacf   : > { %3342 = vrot.lane.b32.xlu1 %v7891_v57, %s5991_s21  ;;  %v7899_v57 = vld [vmem:[#allocation19_spill] sm:$0xff] }
 0xad2   : > { %3336 = vrot.lane.b32.xlu0 %v7892_v58, %s5991_s21 }
 0xad3   : > { %3346 = vrot.lane.b32.xlu1 %v7893_v14, %s5991_s21  ;;  %v7900_v14 = vld [vmem:[#allocation29_spill] sm:$0xff] }
 0xad6   : > { %3340 = vrot.lane.b32.xlu0 %v7894_v46, %s5991_s21 }
 0xad7   : > { %3382 = vrot.lane.b32.xlu1 %v7348_v8, %s5990_s20 }
 0xada   : > { %3344 = vrot.lane.b32.xlu0 %v7895_v13, %s5991_s21 }
 0xadb   : > { %3386 = vrot.lane.b32.xlu1 %v7352_v19, %s5990_s20 }
 0xade   : > { %3348 = vrot.lane.b32.xlu0 %v7896_v50, %s5991_s21 }
 0xadf   : > { %3390 = vrot.lane.b32.xlu1 %v7356_v31, %s5990_s20 }
 0xae2   : > { %3384 = vrot.lane.b32.xlu0 %v7346_v11, %s5990_s20 }
 0xae3   : > { %3394 = vrot.lane.b32.xlu1 %v7360_v35, %s5990_s20 }
 0xae6   : > { %3388 = vrot.lane.b32.xlu0 %v7350_v16, %s5990_s20 }
 0xae7   : > { %3398 = vrot.lane.b32.xlu1 %v7364_v39, %s5990_s20 }
 0xaea   : > { %3392 = vrot.lane.b32.xlu0 %v7354_v26, %s5990_s20 }
 0xaeb   : > { %3402 = vrot.lane.b32.xlu1 %v7368_v25, %s5990_s20 }
 0xaee   : > { %3396 = vrot.lane.b32.xlu0 %v7358_v34, %s5990_s20 }
 0xaef   : > { %3406 = vrot.lane.b32.xlu1 %v7372_v3, %s5990_s20 }
 0xaf2   : > { %3400 = vrot.lane.b32.xlu0 %v7362_v53, %s5990_s20 }
 0xaf3   : > { %3410 = vrot.lane.b32.xlu1 %v7376_v59, %s5990_s20 }
 0xaf6   : > { %3404 = vrot.lane.b32.xlu0 %v7366_v41, %s5990_s20 }
 0xafa   : > { %3408 = vrot.lane.b32.xlu0 %v7370_v43, %s5990_s20  ;;  %v3048_v34 = vpop.xlane.xlu0 %3047 }
 0xafb   : > { %v3046_v11 = vpop.xlane.xlu1 %3045 }
 0xafc   : > { %5761 = vrcp.f32 %v3046_v11 }
 0xafd   : > { %5763 = vrcp.f32 %v3048_v34 }
 0xafe   : > { %3412 = vrot.lane.b32.xlu0 %v7374_v9, %s5990_s20 }
 0xaff   : > { %v3052_v8 = vpop.xlane.xlu1 %3051 }
 0xb03   : > { %v3050_v16 = vpop.xlane.xlu1 %3049 }
 0xb04   : > { %5765 = vrcp.f32 %v3050_v16 }
 0xb05   : > { %5767 = vrcp.f32 %v3052_v8  ;;  %v7902_v8 = vld [vmem:[#allocation26_spill] sm:$0xff] }
 0xb06   : > { %v5762_v19 = vpop.eup %5761 }
 0xb07   : > { %v3056_v26 = vpop.xlane.xlu1 %3055  ;;  %v3078_v31 = vmul.f32 %v5762_v19, %v7409_v48  ;;  %v3054_v53 = vpop.xlane.xlu0 %3053 }
 0xb08   : > { %5769 = vrcp.f32 %v3054_v53  ;;  %v5764_v38 = vpop.eup %5763 }
 0xb09   : > { %4773 = vmatprep.mubr.f32.mxu1 %v3078_v31  ;;  %5771 = vrcp.f32 %v3056_v26  ;;  %v3080_v28 = vmul.f32 %v5764_v38, %v7407_v2 }
 0xb0b   : > { %v3060_v35 = vpop.xlane.xlu1 %3059 }
 0xb0e   : > { %v5766_v48 = vpop.eup %5765 }
 0xb0f   : > { %v3058_v39 = vpop.xlane.xlu1 %3057  ;;  %v5768_v60 = vpop.eup %5767  ;;  %v3082_v5 = vmul.f32 %v5766_v48, %v7417_v10  ;;  %v7904_v48 = vld [vmem:[#allocation37_spill] sm:$0xff] }
 0xb10   : > { %v3062_v41 = vpop.xlane.xlu0 %3061  ;;  %5773 = vrcp.f32 %v3058_v39  ;;  %v3084_v40 = vmul.f32 %v5768_v60, %v7413_v6 }
 0xb11   : > { %5775 = vrcp.f32 %v3060_v35 }
 0xb12   : > { %5777 = vrcp.f32 %v3062_v41  ;;  %v5770_v55 = vpop.eup %5769 }
 0xb13   : > { %v3064_v25 = vpop.xlane.xlu1 %3063  ;;  %v5772_v54 = vpop.eup %5771  ;;  %v3086_v1 = vmul.f32 %v5770_v55, %v7423_v42 }
 0xb14   : > { %v5534_v43 = vpop.permute.xlu0 %5533  ;;  %5779 = vrcp.f32 %v3064_v25  ;;  %v3088_v22 = vmul.f32 %v5772_v54, %v7421_v29  ;;  %v7897_v29 = vld [vmem:[#allocation24_spill] sm:$0xff]  ;;  %v7903_v25 = vld [vmem:[#allocation35_spill] sm:$0xff] }
 0xb15   : > { %v5536_v3 = vunpack.i.h.bf16 %v5534_v43  ;;  %v5535_v9 = vunpack.i.l.bf16 %v5534_v43 }
 0xb17   : > { %v5209_v59 = vpack.c.bf16 %v5536_v3, %v5535_v9  ;;  %v3068_v33 = vpop.xlane.xlu1 %3067 }
 0xb19   : > { %5210 = vmatprep.subr.bf16.mxu1 %v5209_v59 }
 0xb1a   : > { %5212 = vmatpush3.bf16.msra.mxu1 %v5209_v59  ;;  %v5774_v4 = vpop.eup %5773 }
 0xb1b   : > { %v3066_v45 = vpop.xlane.xlu1 %3065  ;;  %v5776_v10 = vpop.eup %5775  ;;  %v3090_v62 = vmul.f32 %v5774_v4, %v7432_v7 }
 0xb1c   : > { %5781 = vrcp.f32 %v3066_v45  ;;  %v5778_v63 = vpop.eup %5777  ;;  %v3092_v6 = vmul.f32 %v5776_v10, %v7428_v18 }
 0xb1d   : > { %4774 = vmatmul.mubr.f32.vlgmr.msra.gmra.mrb[64].mxu1 %v3080_v28  ;;  %5783 = vrcp.f32 %v3068_v33  ;;  %v3094_v42 = vmul.f32 %v5778_v63, %v7434_v12  ;;  %v7898_v12 = vld [vmem:[#allocation25_spill] sm:$0xff] }
 0xb1e   : > { %4776 = vmatprep.mubr.f32.mxu1 %v3082_v5  ;;  %v5780_v27 = vpop.eup %5779  ;;  %v7905_v5 = vld [vmem:[#allocation34_spill] sm:$0xff] }
 0xb1f   : > { %v3070_v56 = vpop.xlane.xlu1 %3069  ;;  %v3096_v0 = vmul.f32 %v5780_v27, %v7439_v61 }
 0xb20   : > { %5785 = vrcp.f32 %v3070_v56 }
 0xb21   : > { %4777 = vmatmul.mubr.f32.gmra.mrb[66].mxu1 %v3084_v40 }
 0xb22   : > { %4779 = vmatprep.mubr.f32.mxu1 %v3086_v1 }
 0xb23   : > { %v3074_v2 = vpop.xlane.xlu1 %3073 }
 0xb24   : > { %5787 = vrcp.f32 %v3074_v2 }
 0xb25   : > { %4780 = vmatmul.mubr.f32.gmra.mrb[68].mxu1 %v3088_v22 }
 0xb26   : > { %4782 = vmatprep.mubr.f32.mxu1 %v3090_v62  ;;  %v5782_v32 = vpop.eup %5781 }
 0xb27   : > { %v3076_v17 = vpop.xlane.xlu1 %3075  ;;  %v5784_v20 = vpop.eup %5783  ;;  %v3098_v7 = vmul.f32 %v5782_v32, %v7446_v47 }
 0xb28   : > { %v3100_v36 = vmul.f32 %v5784_v20, %v7443_v21  ;;  %v7901_v21 = vld [vmem:[#allocation30_spill] sm:$0xff] }
 0xb29   : > { %4783 = vmatmul.mubr.f32.gmra.mrb[70].mxu1 %v3092_v6 }
 0xb2a   : > { %4785 = vmatprep.mubr.f32.mxu1 %v3094_v42  ;;  %v5786_v15 = vpop.eup %5785 }
 0xb2b   : > { %v3319_v24 = vpop.permute.xlu1 %3318  ;;  %v3102_v49 = vmul.f32 %v5786_v15, %v7449_v51 }
 0xb2c   : > { %v7540_v52 = vsel %vm861_vm0, %v7897_v29, %v3319_v24 }
 0xb2d   : > { %4786 = vmatmul.mubr.f32.gmra.mrb[72].mxu1 %v3096_v0 }
 0xb2e   : > { %4788 = vmatprep.mubr.f32.mxu1 %v3098_v7  ;;  %v5788_v53 = vpop.eup %5787 }
 0xb2f   : > { %v3321_v18 = vpop.permute.xlu1 %3320  ;;  %v3106_v33 = vmul.f32 %v5788_v53, %v7452_v44 }
 0xb30   : > { %v7546_v23 = vsel %vm861_vm0, %v7898_v12, %v3321_v18 }
 0xb31   : > { %4789 = vmatmul.mubr.f32.gmra.mrb[74].mxu1 %v3100_v36 }
 0xb32   : > { %4791 = vmatprep.mubr.f32.mxu1 %v3102_v49 }
 0xb33   : > { %v3325_v61 = vpop.permute.xlu1 %3324 }
 0xb34   : > { %v7551_v58 = vsel %vm861_vm0, %v7899_v57, %v3325_v61 }
 0xb37   : > { %v3327_v47 = vpop.permute.xlu1 %3326 }
 0xb38   : > { %v7555_v46 = vsel %vm861_vm0, %v7900_v14, %v3327_v47 }
 0xb3b   : > { %v3329_v13 = vpop.permute.xlu1 %3328 }
 0xb3c   : > { %v7559_v50 = vsel %vm861_vm0, %v7901_v21, %v3329_v13 }
 0xb3f   : > { %v3331_v11 = vpop.permute.xlu1 %3330 }
 0xb40   : > { %v7563_v51 = vsel %vm861_vm0, %v7902_v8, %v3331_v11 }
 0xb43   : > { %v7565_v16 = vpop.permute.xlu1 %3332 }
 0xb45   : > { %v3072_v19 = vpop.xlane.xlu0 %3071 }
 0xb46   : > { %5789 = vrcp.f32 %v3072_v19 }
 0xb47   : > { %v7567_v26 = vpop.permute.xlu1 %3334  ;;  %5791 = vrcp.f32 %v3076_v17 }
 0xb49   : > { %v7569_v31 = vpop.permute.xlu0 %3322 }
 0xb4b   : > { %v7571_v34 = vpop.permute.xlu1 %3338 }
 0xb4d   : > { %v7573_v35 = vpop.permute.xlu0 %3336 }
 0xb4f   : > { %v3343_v39 = vpop.permute.xlu1 %3342 }
 0xb50   : > { %v5790_v41 = vpop.eup %5789  ;;  %v7577_v43 = vsel %vm861_vm0, %v7903_v25, %v3343_v39 }
 0xb51   : > { %v7579_v3 = vpop.permute.xlu0 %3340  ;;  %v3104_v9 = vmul.f32 %v5790_v41, %v7467_v30  ;;  %v5792_v59 = vpop.eup %5791  ;;  %v7906_v30 = vld [vmem:[#allocation36_spill] sm:$0xff] }
 0xb52   : > { %v3108_v60 = vmul.f32 %v5792_v59, %v7455_v37 }
 0xb53   : > { %4792 = vmatmul.mubr.f32.gmra.mrb[76].mxu1 %v3104_v9  ;;  %v3347_v38 = vpop.permute.xlu1 %3346 }
 0xb54   : > { %v7585_v28 = vsel %vm861_vm0, %v7904_v48, %v3347_v38  ;;  %4794 = vmatprep.mubr.f32.mxu1 %v3106_v33 }
 0xb55   : > { %v3345_v45 = vpop.permute.xlu0 %3344 }
 0xb56   : > { %v7590_v55 = vsel %vm861_vm0, %v7905_v5, %v3345_v45 }
 0xb57   : > { %4795 = vmatmul.mubr.f32.gmra.mrb[78].mxu1 %v3108_v60  ;;  %v3383_v20 = vpop.permute.xlu1 %3382 }
 0xb58   : > { %v3511_v53 = vsel %vm3510_vm2, %v7540_v52, %v3383_v20 }
 0xb59   : > { %v3349_v56 = vpop.permute.xlu0 %3348 }
 0xb5a   : > { %v7594_v40 = vsel %vm861_vm0, %v7906_v30, %v3349_v56 }
 0xb5b   : > { %v3387_v7 = vpop.permute.xlu1 %3386 }
 0xb5d   : > { %v3385_v0 = vpop.permute.xlu0 %3384 }
 0xb5e   : > { %v3512_v8 = vsel %vm3510_vm2, %v7546_v23, %v3385_v0  ;;  %v7907_v23 = vld [vmem:[#allocation18_spill] sm:$0xff] }
 0xb5f   : > { %v3391_v18 = vpop.permute.xlu1 %3390  ;;  %v3496_v9 = vsel %vm861_vm0, %v7907_v23, %v7569_v31 }
 0xb60   : > { %v3513_v33 = vsel %vm3510_vm2, %v3496_v9, %v3387_v7 }
 0xb61   : > { %v3389_v29 = vpop.permute.xlu0 %3388 }
 0xb62   : > { %v3514_v52 = vsel %vm3510_vm2, %v7551_v58, %v3389_v29  ;;  %v3515_v58 = vsel %vm3510_vm2, %v7555_v46, %v3391_v18 }
 0xb63   : > { %v3395_v12 = vpop.permute.xlu1 %3394 }
 0xb65   : > { %v3393_v15 = vpop.permute.xlu0 %3392 }
 0xb66   : > { %v3516_v60 = vsel %vm3510_vm2, %v7559_v50, %v3393_v15 }
 0xb67   : > { %v3399_v61 = vpop.permute.xlu1 %3398 }
 0xb69   : > { %v3397_v36 = vpop.permute.xlu0 %3396 }
 0xb6b   : > { %v3403_v47 = vpop.permute.xlu1 %3402 }
 0xb6d   : > { %v3401_v49 = vpop.permute.xlu0 %3400 }
 0xb6f   : > { %v7612_v13 = vpop.permute.xlu1 %3406 }
 0xb71   : > { %v3405_v57 = vpop.permute.xlu0 %3404 }
 0xb73   : > { %v7616_v11 = vpop.permute.xlu1 %3410 }
 0xb75   : > { %v3409_v14 = vpop.permute.xlu0 %3408 }
 0xb76   : > { %v3524_v18 = vsel %vm3510_vm2, %v7590_v55, %v3409_v14 }
 0xb79   : > { %v7614_v21 = vpop.permute.xlu0 %3412 }
 0xb7a   : > { %v3526_v55 = vsel %vm3510_vm2, %v7594_v40, %v7614_v21 }
 0xbf0   : > { %v4775_v44 = vpop.f32.mrb[64].mxu1 }
 0xbf1   : > { %3448 = vrot.lane.b32.xlu0 %v4775_v44, %s5989_s13  ;;  %v3223_v54 = vpop.f32.mrb[65].mxu1  ;;  %v7908_v44 = vld [vmem:[#allocation28_spill] sm:$0xff] }
 0xbf2   : > { %3446 = vrot.lane.b32.xlu1 %v3223_v54, %s5989_s13  ;;  %v3501_v54 = vsel %vm861_vm0, %v7908_v44, %v7565_v16  ;;  %v7910_v16 = vld [vmem:[#allocation31_spill] sm:$0xff] }
 0xbf4   : > { %v4778_v1 = vpop.f32.mrb[66].mxu1 }
 0xbf5   : > { %3452 = vrot.lane.b32.xlu0 %v4778_v1, %s5989_s13  ;;  %v3233_v37 = vpop.f32.mrb[67].mxu1  ;;  %v3518_v1 = vsel %vm3510_vm2, %v3501_v54, %v3397_v36 }
 0xbf6   : > { %3450 = vrot.lane.b32.xlu1 %v3233_v37, %s5989_s13  ;;  %v3517_v37 = vsel %vm3510_vm2, %v7563_v51, %v3395_v12 }
 0xbf8   : > { %v4781_v4 = vpop.f32.mrb[68].mxu1 }
 0xbf9   : > { %3456 = vrot.lane.b32.xlu0 %v4781_v4, %s5989_s13  ;;  %v3243_v2 = vpop.f32.mrb[69].mxu1 }
 0xbfa   : > { %3454 = vrot.lane.b32.xlu1 %v3243_v2, %s5989_s13 }
 0xbfc   : > { %v4784_v22 = vpop.f32.mrb[70].mxu1 }
 0xbfd   : > { %3460 = vrot.lane.b32.xlu0 %v4784_v22, %s5989_s13  ;;  %v3253_v10 = vpop.f32.mrb[71].mxu1  ;;  %v7909_v22 = vld [vmem:[#allocation27_spill] sm:$0xff] }
 0xbfe   : > { %3458 = vrot.lane.b32.xlu1 %v3253_v10, %s5989_s13  ;;  %v3503_v10 = vsel %vm861_vm0, %v7909_v22, %v7573_v35  ;;  %v7911_v35 = vld [vmem:[#allocation32_spill] sm:$0xff] }
 0xc00   : > { %v4787_v62 = vpop.f32.mrb[72].mxu1 }
 0xc01   : > { %3464 = vrot.lane.b32.xlu0 %v4787_v62, %s5989_s13  ;;  %v3263_v63 = vpop.f32.mrb[73].mxu1  ;;  %v3502_v62 = vsel %vm861_vm0, %v7910_v16, %v7567_v26  ;;  %v7912_v26 = vld [vmem:[#allocation33_spill] sm:$0xff] }
 0xc02   : > { %3462 = vrot.lane.b32.xlu1 %v3263_v63, %s5989_s13  ;;  %v3520_v63 = vsel %vm3510_vm2, %v3503_v10, %v3401_v49 }
 0xc04   : > { %v4790_v17 = vpop.f32.mrb[74].mxu1 }
 0xc05   : > { %3468 = vrot.lane.b32.xlu0 %v4790_v17, %s5989_s13  ;;  %v3273_v6 = vpop.f32.mrb[75].mxu1  ;;  %v3519_v17 = vsel %vm3510_vm2, %v3502_v62, %v3399_v61 }
 0xc06   : > { %3466 = vrot.lane.b32.xlu1 %v3273_v6, %s5989_s13 }
 0xc26   : > { %v4793_v27 = vpop.f32.mrb[76].mxu1 }
 0xc27   : > { %3472 = vrot.lane.b32.xlu0 %v4793_v27, %s5989_s13  ;;  %v3283_v42 = vpop.f32.mrb[77].mxu1 }
 0xc28   : > { %3470 = vrot.lane.b32.xlu1 %v3283_v42, %s5989_s13 }
 0xc2a   : > { %v4796_v32 = vpop.f32.mrb[78].mxu1 }
 0xc2b   : > { %3476 = vrot.lane.b32.xlu0 %v4796_v32, %s5989_s13  ;;  %v3293_v24 = vpop.f32.mrb[79].mxu1  ;;  %v3505_v32 = vsel %vm861_vm0, %v7911_v35, %v7579_v3 }
 0xc2c   : > { %3474 = vrot.lane.b32.xlu1 %v3293_v24, %s5989_s13  ;;  %v3504_v24 = vsel %vm861_vm0, %v7912_v26, %v7571_v34  ;;  %v3522_v0 = vsel %vm3510_vm2, %v3505_v32, %v3405_v57  ;;  %v3523_v34 = vsel %vm3510_vm2, %v7577_v43, %v7612_v13  ;;  %v3525_v43 = vsel %vm3510_vm2, %v7585_v28, %v7616_v11  ;;  %s5992_s13 = smov [#allocation10]  }
 0xc2d   : > { %v3521_v29 = vsel %vm3510_vm2, %v3504_v24, %v3403_v47  ;;  %s5911_s15 = sshll.u32 %s5992_s13, 4  ;;  %s5912_s15 = int_to_ptr.vmem [resolvable:$false] %s5911_s15 }
 0xc2e   : > { %s5913_s10 = scalar_lea.vmem %s5912_s15, 4096  ;;  %p5914_p12 = scmp.lt.s32.totalorder %s7701_s23, %s5912_s15 }
 0xc2f   : > { %p5915_p1 = scmp.lt.s32.totalorder %s5913_s10, %s5907_s9 }
 0xc31   : > { %p5916_p2 = por %p5915_p1, %p5914_p12 }
 0xc33   : > { %p5917_p4 = pnand %p5916_p2, %p5910_p7 }
 0xc63   : > { %v3449_v19 = vpop.permute.xlu0 %3448 }
 0xc64   : > { %v3529_v39 = vsel %vm3527_vm3, %v3512_v8, %v3449_v19  ;;  %v3447_v41 = vpop.permute.xlu1 %3446 }
 0xc65   : > { %3545 = vst [vmem:[%s7625_s16 + $0x8] sm:$0xff] %v3529_v39  ;;  %v3528_v25 = vsel %vm3527_vm3, %v3511_v53, %v3447_v41 }
 0xc66   : > { %3544 = vst [vmem:[%s7625_s16] sm:$0xff] %v3528_v25 }
 0xc67   : > { %v3453_v59 = vpop.permute.xlu0 %3452 }
 0xc68   : > { %v3531_v38 = vsel %vm3527_vm3, %v3514_v52, %v3453_v59  ;;  %v3451_v48 = vpop.permute.xlu1 %3450 }
 0xc69   : > { %3547 = vst [vmem:[%s7625_s16 + $0x18] sm:$0xff] %v3531_v38  ;;  %v3530_v45 = vsel %vm3527_vm3, %v3513_v33, %v3451_v48 }
 0xc6a   : > { %3546 = vst [vmem:[%s7625_s16 + $0x10] sm:$0xff] %v3530_v45 }
 0xc6b   : > { %v3457_v5 = vpop.permute.xlu0 %3456 }
 0xc6c   : > { %v3533_v31 = vsel %vm3527_vm3, %v3516_v60, %v3457_v5  ;;  %v3455_v56 = vpop.permute.xlu1 %3454 }
 0xc6d   : > { %3549 = vst [vmem:[%s7625_s16 + $0x28] sm:$0xff] %v3533_v31  ;;  %v3532_v30 = vsel %vm3527_vm3, %v3515_v58, %v3455_v56 }
 0xc6e   : > { %3548 = vst [vmem:[%s7625_s16 + $0x20] sm:$0xff] %v3532_v30 }
 0xc6f   : > { %v3461_v50 = vpop.permute.xlu0 %3460 }
 0xc70   : > { %v3535_v46 = vsel %vm3527_vm3, %v3518_v1, %v3461_v50  ;;  %v3459_v4 = vpop.permute.xlu1 %3458 }
 0xc71   : > { %3551 = vst [vmem:[%s7625_s16 + $0x38] sm:$0xff] %v3535_v46  ;;  %v3534_v2 = vsel %vm3527_vm3, %v3517_v37, %v3459_v4 }
 0xc72   : > { %3550 = vst [vmem:[%s7625_s16 + $0x30] sm:$0xff] %v3534_v2 }
 0xc73   : > { %v3465_v51 = vpop.permute.xlu0 %3464 }
 0xc74   : > { %v3537_v6 = vsel %vm3527_vm3, %v3520_v63, %v3465_v51  ;;  %v3463_v27 = vpop.permute.xlu1 %3462 }
 0xc75   : > { %3553 = vst [vmem:[%s7625_s16 + $0x48] sm:$0xff] %v3537_v6  ;;  %v3536_v42 = vsel %vm3527_vm3, %v3519_v17, %v3463_v27 }
 0xc76   : > { %3552 = vst [vmem:[%s7625_s16 + $0x40] sm:$0xff] %v3536_v42 }
 0xc77   : > { %v3469_v20 = vpop.permute.xlu0 %3468 }
 0xc78   : > { %v3539_v7 = vsel %vm3527_vm3, %v3522_v0, %v3469_v20  ;;  %v3467_v15 = vpop.permute.xlu1 %3466 }
 0xc79   : > { %3555 = vst [vmem:[%s7625_s16 + $0x58] sm:$0xff] %v3539_v7  ;;  %v3538_v3 = vsel %vm3527_vm3, %v3521_v29, %v3467_v15 }
 0xc7a   : > { %3554 = vst [vmem:[%s7625_s16 + $0x50] sm:$0xff] %v3538_v3 }
 0xc99   : > { %v3473_v36 = vpop.permute.xlu0 %3472 }
 0xc9a   : > { %v3541_v12 = vsel %vm3527_vm3, %v3524_v18, %v3473_v36  ;;  %v3471_v49 = vpop.permute.xlu1 %3470 }
 0xc9b   : > { %3557 = vst [vmem:[%s7625_s16 + $0x68] sm:$0xff] %v3541_v12  ;;  %v3540_v61 = vsel %vm3527_vm3, %v3523_v34, %v3471_v49 }
 0xc9c   : > { %3556 = vst [vmem:[%s7625_s16 + $0x60] sm:$0xff] %v3540_v61 }
 0xc9d   : > { %v3477_v57 = vpop.permute.xlu0 %3476 }
 0xc9e   : > { %v3543_v47 = vsel %vm3527_vm3, %v3526_v55, %v3477_v57  ;;  %v3475_v14 = vpop.permute.xlu1 %3474 }
 0xc9f   : > { %3559 = vst [vmem:[%s7625_s16 + $0x78] sm:$0xff] %v3543_v47  ;;  %v3542_v40 = vsel %vm3527_vm3, %v3525_v43, %v3475_v14 }
 0xca0   : > { %3558 = vst [vmem:[%s7625_s16 + $0x70] sm:$0xff] %v3542_v40 }
 0xca1   : > { %5920 = shalt.err (!%p5917_p4)
}
 0xca2   : > { %s5921_s14 = scalar_lea.hbm %s7699_s30, 2048  ;;  %s5925_s21 = scalar_lea.hbm %s7759_s7, 4096 }
 0xca3   : > { %p5922_p9 = scmp.ne.s32.totalorder %s7699_s30, %s5921_s14  ;;  %p5926_p8 = scmp.lt.u32.totalorder %s7699_s30, %s7759_s7 }
 0xca4   : > { %p5927_p13 = scmp.lt.u32.totalorder %s5925_s21, %s5921_s14  ;;  %p5929_p10 = scmp.lt.u32.totalorder %s5921_s14, %s7699_s30 }
 0xca5   : > { %p5923_p0 = pnand %p5922_p9, %p6189_p5 }
 0xca6   : > { %p5928_p6 = por %p5927_p13, %p5926_p8 }
 0xca7   : > { %p5924_p11 = pneg %p5923_p0 }
 0xca8   : > { %p5930_p3 = por %p5929_p10, %p5928_p6 }
 0xcaa   : > { %p5931_p7 = pnand %p5930_p3, %p5924_p11 }
 0xcac   : > { %5934 = shalt.err (!%p5931_p7)
}
 0xcad   : > { %s5993_s11 = smov 128   ;;  %s5994_s8 = smov 8  }
 0xcae   : > { %5227 = dma.vmem_to_hbm [thread:$0]  (%p6189_p5), %s7701_s23, 2048, %s7699_s30, %s3561_s28, %s5993_s11, %s5993_s11, %s5994_s8  }
 0xcaf PF: > { %s7913_s9 = sld [smem:[#allocation15_spill]]  ;;  %s3589_s13 = sand.u32 1, %s5969_s24  }
 0xcb0   : > { %p7915_p1 = scmp.ge.s32.totalorder %s5981_s27, 2  ;;  %s3590_s15 = scalar_lea.sflag [#allocation4], %s3589_s13 }
 0xcb5   : > { %p7914_p12 = scmp.ne.s32.totalorder %s7913_s9, 0 }
 0xcb7   : > { %p5244_p2 = pnand %p7915_p1, %p7914_p12 }
 0xcb9   : > { %5964 = dma.done.wait (!%p5244_p2), %s3590_s15, 2048  }
 0xcba   : > { %5966 = vsyncadd (!%p5244_p2), %s3590_s15, 4294965248  ;;  %p22_p4 = scmp.ge.s32.totalorder %s6175_s22, 4   ;;  %s7916_s24 = smov %s5973_s25 }
 0xcbb   : > { %s7917_s25 = smov %s5977_s26  ;;  %s7918_s26 = smov %s6185_s18 }
 0xcbc   : > { %s7919_s27 = smov %s6175_s22  ;;  %24 = sbr.rel (!%p22_p4) target bundleno = 7 (0x7), region = 105 }
 0xcc3   :  { %3595 = vsyncpa [#allocation3], 1 }
 0xcc4   :  { %3597 = vsyncpa [#allocation3 + $0x1], 1 }
 0xcc5   :  { %3598 = vsyncpa [#allocation6], 1 }
 0xcc6   :  { %3599 = vsyncpa [#allocation9], 1 }
 0xcc7   :  { %3600 = vsyncpa [#allocation4], 1 }
 0xcc8   :  { %3602 = vsyncpa [#allocation4 + $0x1], 1 }

</bundles_post_ra>
